<compile_context>
chip_gen: v7x
topology: tpu7x:2x2x1
jax: 0.10.0
libtpu: 0.0.40
codegen_flags: <defaults>
</compile_context>

<pallas_src>
import functools
import numpy as np
import jax
import jax.numpy as jnp
from jax.experimental import pallas as pl
from jax.experimental.pallas import tpu as pltpu

# ----------------------------- configuration -------------------------------
NUM_STAGES  = 3
NUM_LAYERS  = 3          # dilations 1, 2, 4
NUM_F_MAPS  = 32
DIM         = 16         # input feature channels
NUM_CLASSES = 8
B, T        = 2, 128


# ------------------------------ Pallas kernel ------------------------------
def make_multistage_kernel(num_stages, num_layers, batch_per_prog, seq_len):
    """Fused kernel: stage1 + (num_stages-1) softmax+stage blocks, one body.

    Activations live in (C, N) layout with time (and optionally batch) on the
    lane axis; N = batch_per_prog * seq_len.  All inter-stage tensors stay in
    VMEM/vregs.
    """
    n_lanes = batch_per_prog * seq_len
    dilations = [2 ** l for l in range(num_layers)]

    def kernel(x_ref, m_ref,
               w_in1, b_in1, wdp1, wdc1, wdn1, bd1, w11, b11, wo1, bo1,   # stage 1
               w_inr, b_inr, wdpr, wdcr, wdnr, bdr, w1r, b1r, wor, bor,   # stages 2..S
               o_ref):
        m = m_ref[0]                                        # (1, N)

        # Hoisted boundary masks: one iota/compare per (dilation, direction)
        # for the whole kernel.  t mod seq_len also kills cross-batch leakage
        # from pltpu.roll when batch is folded onto the lane axis.
        t_idx = jax.lax.broadcasted_iota(jnp.int32, (1, n_lanes), 1) % seq_len
        mp = [(t_idx >= d).astype(jnp.float32) for d in dilations]           # t-d valid
        mn = [(t_idx < seq_len - d).astype(jnp.float32) for d in dilations]  # t+d valid

        stage1_refs = dict(w_in=w_in1, b_in=b_in1, wdp=wdp1, wdc=wdc1, wdn=wdn1,
                           bd=bd1, w1=w11, b1=b11, wo=wo1, bo=bo1)
        rest_refs = dict(w_in=w_inr, b_in=b_inr, wdp=wdpr, wdc=wdcr, wdn=wdnr,
                         bd=bdr, w1=w1r, b1=b1r, wo=wor, bo=bor)

        def make_loader(refs, s=None):
            # Load each weight from its VMEM Ref at the point of use (per-layer
            # vld) instead of keeping whole stacked tensors live across the
            # unrolled stage -> lower vreg pressure.
            def load(name, *idx):
                full = idx if s is None else (s,) + idx
                r = refs[name]
                return r[full] if full else r[...]
            return load

        def stage(x, load):
            # 1x1 input conv:  (F, Cin) @ (Cin, N)
            h = jnp.dot(load("w_in"), x,
                        preferred_element_type=jnp.float32) + load("b_in")
            for l in range(num_layers):                      # static unroll
                d = dilations[l]
                # h_prev[t] = h[t-d], h_next[t] = h[t+d], zero-padded per batch.
                h_prev = mp[l] * pltpu.roll(h, shift=d, axis=1)
                h_next = mn[l] * pltpu.roll(h, shift=n_lanes - d, axis=1)
                # Dilated 3-tap conv as 3 short (F,F)@(F,N) dots (no concat).
                conv = (jnp.dot(load("wdc", l), h,
                                preferred_element_type=jnp.float32)
                        + jnp.dot(load("wdp", l), h_prev,
                                  preferred_element_type=jnp.float32)
                        + jnp.dot(load("wdn", l), h_next,
                                  preferred_element_type=jnp.float32)
                        + load("bd", l))
                conv = jnp.maximum(conv, 0.0)
                res = jnp.dot(load("w1", l), conv,
                              preferred_element_type=jnp.float32) + load("b1", l)
                # TODO(synk): nn.Dropout is identity here (inference semantics).
                h = (h + res) * m
            return (jnp.dot(load("wo"), h,
                            preferred_element_type=jnp.float32) + load("bo")) * m

        def store(s, out):                                   # lane-dense (NC, T) stores
            for b in range(batch_per_prog):
                o_ref[s, b] = out[:, b * seq_len:(b + 1) * seq_len].astype(o_ref.dtype)

        out = stage(x_ref[0], make_loader(stage1_refs))
        store(0, out)

        for s in range(num_stages - 1):                      # static unroll
            # softmax over channels (sublane axis) + mask, stays in VMEM/vregs
            xmax = jnp.max(out, axis=0, keepdims=True)
            e = jnp.exp(out - xmax)
            sm = e * pl.reciprocal(jnp.sum(e, axis=0, keepdims=True), approx=True)
            out = stage(sm * m, make_loader(rest_refs, s))
            store(s + 1, out)

    return kernel


def multi_stage_forward(x_nct, mask_nct, k1, kr, *, num_stages, num_layers,
                        use_batch_grid=False):
    """Full MultiStageModel forward. Returns (num_stages, B, num_classes, T)."""
    batch, in_dim, seq_len = x_nct.shape
    num_classes = k1["wo"].shape[0]

    names = ("w_in", "b_in", "wdp", "wdc", "wdn", "bd", "w1", "b1", "wo", "bo")
    weight_args = [k1[n] for n in names] + [kr[n] for n in names]
    vmem = pl.BlockSpec(memory_space=pltpu.MemorySpace.VMEM)
    out_shape = jax.ShapeDtypeStruct(
        (num_stages, batch, num_classes, seq_len), jnp.float32)

    if use_batch_grid:
        # v7x: one program per batch element; "parallel" axis shards the two
        # batches across the two TensorCores.  Each program still fills the
        # 128-lane vector unit (N = T = 128).
        kernel = make_multistage_kernel(num_stages, num_layers, 1, seq_len)
        x_arr = x_nct                                        # (B, Cin, T)
        m_arr = mask_nct[:, 0:1, :]                          # (B, 1, T)
        in_specs = ([pl.BlockSpec((1, in_dim, seq_len), lambda b: (b, 0, 0)),
                     pl.BlockSpec((1, 1, seq_len), lambda b: (b, 0, 0))]
                    + [vmem] * len(weight_args))
        out_specs = pl.BlockSpec((num_stages, 1, num_classes, seq_len),
                                 lambda b: (0, b, 0, 0))
        return pl.pallas_call(
            kernel,
            out_shape=out_shape,
            grid=(batch,),
            in_specs=in_specs,
            out_specs=out_specs,
            compiler_params=pltpu.CompilerParams(
                dimension_semantics=("parallel",)),
        )(x_arr, m_arr, *weight_args)

    # v5e / v6e (single TensorCore): fully fused single program, batch folded
    # onto the lane axis (N = B*T).  Per-batch output slices stay lane-aligned
    # only when T is a multiple of 128.
    assert seq_len % 128 == 0, "fused path assumes T % 128 == 0 (lane-aligned slabs)"
    kernel = make_multistage_kernel(num_stages, num_layers, batch, seq_len)
    x_arr = jnp.transpose(x_nct, (1, 0, 2)).reshape(1, in_dim, batch * seq_len)
    m_arr = mask_nct[:, 0, :].reshape(1, 1, batch * seq_len)
    return pl.pallas_call(
        kernel,
        out_shape=out_shape,
        in_specs=[vmem] * (2 + len(weight_args)),
        out_specs=vmem,
    )(x_arr, m_arr, *weight_args)


# --------------------------- parameter construction ------------------------
def init_stage_params_pt(key, num_layers, num_f_maps, in_dim, num_classes):
    """Deterministic params in PyTorch Conv1d layout: weight (out, in, k)."""
    ks = jax.random.split(key, 6)
    s = 0.1
    return dict(
        w_in=s * jax.random.normal(ks[0], (num_f_maps, in_dim, 1), jnp.float32),
        b_in=s * jax.random.normal(ks[1], (num_f_maps,), jnp.float32),
        wd=s * jax.random.normal(ks[2], (num_layers, num_f_maps, num_f_maps, 3),
                                 jnp.float32),
        bd=s * jax.random.normal(ks[3], (num_layers, num_f_maps), jnp.float32),
        w1=s * jax.random.normal(ks[4], (num_layers, num_f_maps, num_f_maps, 1),
                                 jnp.float32),
        b1=s * jax.random.normal(ks[5], (num_layers, num_f_maps), jnp.float32),
        wo=s * jax.random.normal(jax.random.fold_in(key, 7),
                                 (num_classes, num_f_maps, 1), jnp.float32),
        bo=s * jax.random.normal(jax.random.fold_in(key, 8),
                                 (num_classes,), jnp.float32),
    )


def pt_to_kernel(pt):
    """Kernel layout: (Cout, Cin) weights; dilated taps split into 3 matrices."""
    return dict(
        w_in=pt["w_in"][:, :, 0],          # (F, Cin)
        b_in=pt["b_in"][:, None],          # (F, 1)
        wdp=pt["wd"][..., 0],              # (L, F, F) tap at t-d
        wdc=pt["wd"][..., 1],              # (L, F, F) tap at t
        wdn=pt["wd"][..., 2],              # (L, F, F) tap at t+d
        bd=pt["bd"][:, :, None],           # (L, F, 1)
        w1=pt["w1"][..., 0],               # (L, F, F)
        b1=pt["b1"][:, :, None],           # (L, F, 1)
        wo=pt["wo"][:, :, 0],              # (NC, F)
        bo=pt["bo"][:, None],              # (NC, 1)
    )


# ------------------------- pure-JAX reference (NCT) ------------------------
def ref_stage(x_nct, mask_nct, pw, num_layers, apply_softmax):
    m = mask_nct[:, 0:1, :]
    if apply_softmax:
        x_nct = jax.nn.softmax(x_nct, axis=1) * m
    h = jnp.einsum("bct,fc->bft", x_nct, pw["w_in"][:, :, 0]) + pw["b_in"][None, :, None]
    seq_len = h.shape[-1]
    for l in range(num_layers):
        d = 2 ** l
        hp = jnp.pad(h, ((0, 0), (0, 0), (d, d)))
        conv = (jnp.einsum("bct,fc->bft", hp[:, :, 0:seq_len], pw["wd"][l][:, :, 0])
                + jnp.einsum("bct,fc->bft", hp[:, :, d:d + seq_len], pw["wd"][l][:, :, 1])
                + jnp.einsum("bct,fc->bft", hp[:, :, 2 * d:2 * d + seq_len], pw["wd"][l][:, :, 2])
                + pw["bd"][l][None, :, None])
        conv = jnp.maximum(conv, 0.0)
        res = jnp.einsum("bct,fc->bft", conv, pw["w1"][l][:, :, 0]) + pw["b1"][l][None, :, None]
        h = (h + res) * m
    return (jnp.einsum("bct,fc->bft", h, pw["wo"][:, :, 0]) + pw["bo"][None, :, None]) * m


def ref_forward(x_nct, mask_nct, pt_params, num_layers):
    out = ref_stage(x_nct, mask_nct, pt_params[0], num_layers, False)
    outs = [out]
    for pw in pt_params[1:]:
        out = ref_stage(out, mask_nct, pw, num_layers, True)
        outs.append(out)
    return jnp.stack(outs, axis=0)


# ----------------------------------- main -----------------------------------
if __name__ == "__main__":
    key = jax.random.PRNGKey(0)
    kx, km, kp = jax.random.split(key, 3)

    x = jax.random.normal(kx, (B, DIM, T), jnp.float32)        # PyTorch NCT
    # mask: (B, num_classes, T), ones with trailing padding zeroed on batch 1
    valid = jnp.arange(T) < jnp.array([T, T - 20])[:, None]
    mask = jnp.broadcast_to(valid[:, None, :], (B, NUM_CLASSES, T)).astype(jnp.float32)

    stage_keys = jax.random.split(kp, NUM_STAGES)
    pt_params = []
    for s in range(NUM_STAGES):
        in_dim = DIM if s == 0 else NUM_CLASSES
        pt_params.append(init_stage_params_pt(stage_keys[s], NUM_LAYERS,
                                              NUM_F_MAPS, in_dim, NUM_CLASSES))

    k1 = pt_to_kernel(pt_params[0])
    kr = jax.tree_util.tree_map(lambda *xs: jnp.stack(xs, axis=0),
                                *[pt_to_kernel(p) for p in pt_params[1:]])

    # v7x has 2 TensorCores/chip -> shard the batch across cores with a grid;
    # v5e/v6e (1 TC) keep the single fused program (grid only adds overhead).
    dev_kind = jax.devices()[0].device_kind.lower()
    use_batch_grid = any(tag in dev_kind for tag in ("v7", "7x"))

    fwd = functools.partial(multi_stage_forward,
                            num_stages=NUM_STAGES, num_layers=NUM_LAYERS,
                            use_batch_grid=use_batch_grid)
    out = jax.jit(fwd)(x, mask, k1, kr)
    out = jax.block_until_ready(out)

    ref = ref_forward(x, mask, pt_params, NUM_LAYERS)
    np.testing.assert_allclose(np.asarray(out), np.asarray(ref),
                               rtol=1e-3, atol=1e-3)
    assert out.shape == (NUM_STAGES, B, NUM_CLASSES, T)
    print("KERNEL_OK")
</pallas_src>

<mosaic_0001>
module attributes {stable_mosaic.version = 11 : i64} {
  func.func @kernel(%arg0: memref<1x16x256xf32, #tpu.memory_space<vmem>>, %arg1: memref<1x1x256xf32, #tpu.memory_space<vmem>>, %arg2: memref<32x16xf32, #tpu.memory_space<vmem>>, %arg3: memref<32x1xf32, #tpu.memory_space<vmem>>, %arg4: memref<3x32x32xf32, #tpu.memory_space<vmem>>, %arg5: memref<3x32x32xf32, #tpu.memory_space<vmem>>, %arg6: memref<3x32x32xf32, #tpu.memory_space<vmem>>, %arg7: memref<3x32x1xf32, #tpu.memory_space<vmem>>, %arg8: memref<3x32x32xf32, #tpu.memory_space<vmem>>, %arg9: memref<3x32x1xf32, #tpu.memory_space<vmem>>, %arg10: memref<8x32xf32, #tpu.memory_space<vmem>>, %arg11: memref<8x1xf32, #tpu.memory_space<vmem>>, %arg12: memref<2x32x8xf32, #tpu.memory_space<vmem>>, %arg13: memref<2x32x1xf32, #tpu.memory_space<vmem>>, %arg14: memref<2x3x32x32xf32, #tpu.memory_space<vmem>>, %arg15: memref<2x3x32x32xf32, #tpu.memory_space<vmem>>, %arg16: memref<2x3x32x32xf32, #tpu.memory_space<vmem>>, %arg17: memref<2x3x32x1xf32, #tpu.memory_space<vmem>>, %arg18: memref<2x3x32x32xf32, #tpu.memory_space<vmem>>, %arg19: memref<2x3x32x1xf32, #tpu.memory_space<vmem>>, %arg20: memref<2x8x32xf32, #tpu.memory_space<vmem>>, %arg21: memref<2x8x1xf32, #tpu.memory_space<vmem>>, %arg22: memref<3x2x8x128xf32, #tpu.memory_space<vmem>>) attributes {dimension_semantics = [], scalar_prefetch = 0 : i64, scratch_operands = 0 : i64, tpu.core_type = #tpu.core_type<tc>} {
    %c0 = arith.constant 0 : index
    %c0_0 = arith.constant 0 : index
    %c0_1 = arith.constant 0 : index
    %0 = vector.load %arg1[%c0, %c0_0, %c0_1] : memref<1x1x256xf32, #tpu.memory_space<vmem>>, vector<1x1x256xf32>
    %1 = vector.shape_cast %0 : vector<1x1x256xf32> to vector<1x256xf32>
    %2 = tpu.iota {dimensions = array<i32: 1>} : vector<1x256xi32>
    %c128_i32 = arith.constant 128 : i32
    %c0_i32 = arith.constant 0 : i32
    %3 = arith.cmpi eq, %c128_i32, %c0_i32 : i32
    %c1_i32 = arith.constant 1 : i32
    %4 = arith.select %3, %c1_i32, %c128_i32 : i32
    %5 = vector.broadcast %4 : i32 to vector<1x256xi32>
    %6 = arith.remsi %2, %5 : vector<1x256xi32>
    %c0_i32_2 = arith.constant 0 : i32
    %7 = vector.broadcast %c0_i32_2 : i32 to vector<1x256xi32>
    %8 = arith.cmpi ne, %6, %7 : vector<1x256xi32>
    %c0_i32_3 = arith.constant 0 : i32
    %9 = vector.broadcast %c0_i32_3 : i32 to vector<1x256xi32>
    %10 = arith.cmpi slt, %6, %9 : vector<1x256xi32>
    %c0_i32_4 = arith.constant 0 : i32
    %11 = arith.cmpi slt, %4, %c0_i32_4 : i32
    %12 = vector.broadcast %11 : i1 to vector<1x256xi1>
    %13 = vector.broadcast %12 : vector<1x256xi1> to vector<1x256xi1>
    %14 = arith.xori %10, %13 : vector<1x256xi1>
    %15 = arith.andi %14, %8 : vector<1x256xi1>
    %16 = vector.broadcast %4 : i32 to vector<1x256xi32>
    %17 = arith.addi %6, %16 : vector<1x256xi32>
    %18 = arith.select %15, %17, %6 : vector<1x256xi1>, vector<1x256xi32>
    %c1_i32_5 = arith.constant 1 : i32
    %19 = vector.broadcast %c1_i32_5 : i32 to vector<1x256xi32>
    %20 = arith.cmpi sge, %18, %19 : vector<1x256xi32>
    %21 = arith.extui %20 : vector<1x256xi1> to vector<1x256xi32>
    %22 = arith.sitofp %21 : vector<1x256xi32> to vector<1x256xf32>
    %c2_i32 = arith.constant 2 : i32
    %23 = vector.broadcast %c2_i32 : i32 to vector<1x256xi32>
    %24 = arith.cmpi sge, %18, %23 : vector<1x256xi32>
    %25 = arith.extui %24 : vector<1x256xi1> to vector<1x256xi32>
    %26 = arith.sitofp %25 : vector<1x256xi32> to vector<1x256xf32>
    %c4_i32 = arith.constant 4 : i32
    %27 = vector.broadcast %c4_i32 : i32 to vector<1x256xi32>
    %28 = arith.cmpi sge, %18, %27 : vector<1x256xi32>
    %29 = arith.extui %28 : vector<1x256xi1> to vector<1x256xi32>
    %30 = arith.sitofp %29 : vector<1x256xi32> to vector<1x256xf32>
    %c127_i32 = arith.constant 127 : i32
    %31 = vector.broadcast %c127_i32 : i32 to vector<1x256xi32>
    %32 = arith.cmpi slt, %18, %31 : vector<1x256xi32>
    %33 = arith.extui %32 : vector<1x256xi1> to vector<1x256xi32>
    %34 = arith.sitofp %33 : vector<1x256xi32> to vector<1x256xf32>
    %c126_i32 = arith.constant 126 : i32
    %35 = vector.broadcast %c126_i32 : i32 to vector<1x256xi32>
    %36 = arith.cmpi slt, %18, %35 : vector<1x256xi32>
    %37 = arith.extui %36 : vector<1x256xi1> to vector<1x256xi32>
    %38 = arith.sitofp %37 : vector<1x256xi32> to vector<1x256xf32>
    %c124_i32 = arith.constant 124 : i32
    %39 = vector.broadcast %c124_i32 : i32 to vector<1x256xi32>
    %40 = arith.cmpi slt, %18, %39 : vector<1x256xi32>
    %41 = arith.extui %40 : vector<1x256xi1> to vector<1x256xi32>
    %42 = arith.sitofp %41 : vector<1x256xi32> to vector<1x256xf32>
    %c0_6 = arith.constant 0 : index
    %c0_7 = arith.constant 0 : index
    %c0_8 = arith.constant 0 : index
    %43 = vector.load %arg0[%c0_6, %c0_7, %c0_8] : memref<1x16x256xf32, #tpu.memory_space<vmem>>, vector<1x16x256xf32>
    %44 = vector.shape_cast %43 : vector<1x16x256xf32> to vector<16x256xf32>
    %c0_9 = arith.constant 0 : index
    %c0_10 = arith.constant 0 : index
    %45 = vector.load %arg2[%c0_9, %c0_10] : memref<32x16xf32, #tpu.memory_space<vmem>>, vector<32x16xf32>
    %cst = arith.constant dense<0.000000e+00> : vector<32x256xf32>
    %46 = tpu.matmul %45, %44, %cst {dimension_numbers = #tpu.dot_dimension_numbers<[1], [0], [0], [1], [0, 0, 1, 1], [], []>} : vector<32x16xf32>, vector<16x256xf32>, vector<32x256xf32> -> vector<32x256xf32>
    %c0_11 = arith.constant 0 : index
    %c0_12 = arith.constant 0 : index
    %47 = vector.load %arg3[%c0_11, %c0_12] : memref<32x1xf32, #tpu.memory_space<vmem>>, vector<32x1xf32>
    %48 = vector.broadcast %47 : vector<32x1xf32> to vector<32x256xf32>
    %49 = arith.addf %46, %48 : vector<32x256xf32>
    %c1_i32_13 = arith.constant 1 : i32
    %50 = tpu.dynamic_rotate %49 by %c1_i32_13 dim 1 : vector<32x256xf32>, i32 -> vector<32x256xf32>
    %51 = vector.broadcast %22 : vector<1x256xf32> to vector<32x256xf32>
    %52 = arith.mulf %51, %50 : vector<32x256xf32>
    %c255_i32 = arith.constant 255 : i32
    %53 = tpu.dynamic_rotate %49 by %c255_i32 dim 1 : vector<32x256xf32>, i32 -> vector<32x256xf32>
    %54 = vector.broadcast %34 : vector<1x256xf32> to vector<32x256xf32>
    %55 = arith.mulf %54, %53 : vector<32x256xf32>
    %c0_14 = arith.constant 0 : index
    %c0_15 = arith.constant 0 : index
    %c0_16 = arith.constant 0 : index
    %56 = vector.load %arg5[%c0_14, %c0_15, %c0_16] : memref<3x32x32xf32, #tpu.memory_space<vmem>>, vector<1x32x32xf32>
    %57 = vector.shape_cast %56 : vector<1x32x32xf32> to vector<32x32xf32>
    %cst_17 = arith.constant dense<0.000000e+00> : vector<32x256xf32>
    %58 = tpu.matmul %57, %49, %cst_17 {dimension_numbers = #tpu.dot_dimension_numbers<[1], [0], [0], [1], [0, 0, 1, 1], [], []>} : vector<32x32xf32>, vector<32x256xf32>, vector<32x256xf32> -> vector<32x256xf32>
    %c0_18 = arith.constant 0 : index
    %c0_19 = arith.constant 0 : index
    %c0_20 = arith.constant 0 : index
    %59 = vector.load %arg4[%c0_18, %c0_19, %c0_20] : memref<3x32x32xf32, #tpu.memory_space<vmem>>, vector<1x32x32xf32>
    %60 = vector.shape_cast %59 : vector<1x32x32xf32> to vector<32x32xf32>
    %cst_21 = arith.constant dense<0.000000e+00> : vector<32x256xf32>
    %61 = tpu.matmul %60, %52, %cst_21 {dimension_numbers = #tpu.dot_dimension_numbers<[1], [0], [0], [1], [0, 0, 1, 1], [], []>} : vector<32x32xf32>, vector<32x256xf32>, vector<32x256xf32> -> vector<32x256xf32>
    %62 = arith.addf %58, %61 : vector<32x256xf32>
    %c0_22 = arith.constant 0 : index
    %c0_23 = arith.constant 0 : index
    %c0_24 = arith.constant 0 : index
    %63 = vector.load %arg6[%c0_22, %c0_23, %c0_24] : memref<3x32x32xf32, #tpu.memory_space<vmem>>, vector<1x32x32xf32>
    %64 = vector.shape_cast %63 : vector<1x32x32xf32> to vector<32x32xf32>
    %cst_25 = arith.constant dense<0.000000e+00> : vector<32x256xf32>
    %65 = tpu.matmul %64, %55, %cst_25 {dimension_numbers = #tpu.dot_dimension_numbers<[1], [0], [0], [1], [0, 0, 1, 1], [], []>} : vector<32x32xf32>, vector<32x256xf32>, vector<32x256xf32> -> vector<32x256xf32>
    %66 = arith.addf %62, %65 : vector<32x256xf32>
    %c0_26 = arith.constant 0 : index
    %c0_27 = arith.constant 0 : index
    %c0_28 = arith.constant 0 : index
    %67 = vector.load %arg7[%c0_26, %c0_27, %c0_28] : memref<3x32x1xf32, #tpu.memory_space<vmem>>, vector<1x32x1xf32>
    %68 = vector.shape_cast %67 : vector<1x32x1xf32> to vector<32x1xf32>
    %69 = vector.broadcast %68 : vector<32x1xf32> to vector<32x256xf32>
    %70 = arith.addf %66, %69 : vector<32x256xf32>
    %cst_29 = arith.constant 0.000000e+00 : f32
    %71 = vector.broadcast %cst_29 : f32 to vector<32x256xf32>
    %72 = arith.maximumf %70, %71 : vector<32x256xf32>
    %c0_30 = arith.constant 0 : index
    %c0_31 = arith.constant 0 : index
    %c0_32 = arith.constant 0 : index
    %73 = vector.load %arg8[%c0_30, %c0_31, %c0_32] : memref<3x32x32xf32, #tpu.memory_space<vmem>>, vector<1x32x32xf32>
    %74 = vector.shape_cast %73 : vector<1x32x32xf32> to vector<32x32xf32>
    %cst_33 = arith.constant dense<0.000000e+00> : vector<32x256xf32>
    %75 = tpu.matmul %74, %72, %cst_33 {dimension_numbers = #tpu.dot_dimension_numbers<[1], [0], [0], [1], [0, 0, 1, 1], [], []>} : vector<32x32xf32>, vector<32x256xf32>, vector<32x256xf32> -> vector<32x256xf32>
    %c0_34 = arith.constant 0 : index
    %c0_35 = arith.constant 0 : index
    %c0_36 = arith.constant 0 : index
    %76 = vector.load %arg9[%c0_34, %c0_35, %c0_36] : memref<3x32x1xf32, #tpu.memory_space<vmem>>, vector<1x32x1xf32>
    %77 = vector.shape_cast %76 : vector<1x32x1xf32> to vector<32x1xf32>
    %78 = vector.broadcast %77 : vector<32x1xf32> to vector<32x256xf32>
    %79 = arith.addf %75, %78 : vector<32x256xf32>
    %80 = arith.addf %49, %79 : vector<32x256xf32>
    %81 = vector.broadcast %1 : vector<1x256xf32> to vector<32x256xf32>
    %82 = arith.mulf %80, %81 : vector<32x256xf32>
    %c2_i32_37 = arith.constant 2 : i32
    %83 = tpu.dynamic_rotate %82 by %c2_i32_37 dim 1 : vector<32x256xf32>, i32 -> vector<32x256xf32>
    %84 = vector.broadcast %26 : vector<1x256xf32> to vector<32x256xf32>
    %85 = arith.mulf %84, %83 : vector<32x256xf32>
    %c254_i32 = arith.constant 254 : i32
    %86 = tpu.dynamic_rotate %82 by %c254_i32 dim 1 : vector<32x256xf32>, i32 -> vector<32x256xf32>
    %87 = vector.broadcast %38 : vector<1x256xf32> to vector<32x256xf32>
    %88 = arith.mulf %87, %86 : vector<32x256xf32>
    %c1 = arith.constant 1 : index
    %c0_38 = arith.constant 0 : index
    %c0_39 = arith.constant 0 : index
    %89 = vector.load %arg5[%c1, %c0_38, %c0_39] : memref<3x32x32xf32, #tpu.memory_space<vmem>>, vector<1x32x32xf32>
    %90 = vector.shape_cast %89 : vector<1x32x32xf32> to vector<32x32xf32>
    %cst_40 = arith.constant dense<0.000000e+00> : vector<32x256xf32>
    %91 = tpu.matmul %90, %82, %cst_40 {dimension_numbers = #tpu.dot_dimension_numbers<[1], [0], [0], [1], [0, 0, 1, 1], [], []>} : vector<32x32xf32>, vector<32x256xf32>, vector<32x256xf32> -> vector<32x256xf32>
    %c1_41 = arith.constant 1 : index
    %c0_42 = arith.constant 0 : index
    %c0_43 = arith.constant 0 : index
    %92 = vector.load %arg4[%c1_41, %c0_42, %c0_43] : memref<3x32x32xf32, #tpu.memory_space<vmem>>, vector<1x32x32xf32>
    %93 = vector.shape_cast %92 : vector<1x32x32xf32> to vector<32x32xf32>
    %cst_44 = arith.constant dense<0.000000e+00> : vector<32x256xf32>
    %94 = tpu.matmul %93, %85, %cst_44 {dimension_numbers = #tpu.dot_dimension_numbers<[1], [0], [0], [1], [0, 0, 1, 1], [], []>} : vector<32x32xf32>, vector<32x256xf32>, vector<32x256xf32> -> vector<32x256xf32>
    %95 = arith.addf %91, %94 : vector<32x256xf32>
    %c1_45 = arith.constant 1 : index
    %c0_46 = arith.constant 0 : index
    %c0_47 = arith.constant 0 : index
    %96 = vector.load %arg6[%c1_45, %c0_46, %c0_47] : memref<3x32x32xf32, #tpu.memory_space<vmem>>, vector<1x32x32xf32>
    %97 = vector.shape_cast %96 : vector<1x32x32xf32> to vector<32x32xf32>
    %cst_48 = arith.constant dense<0.000000e+00> : vector<32x256xf32>
    %98 = tpu.matmul %97, %88, %cst_48 {dimension_numbers = #tpu.dot_dimension_numbers<[1], [0], [0], [1], [0, 0, 1, 1], [], []>} : vector<32x32xf32>, vector<32x256xf32>, vector<32x256xf32> -> vector<32x256xf32>
    %99 = arith.addf %95, %98 : vector<32x256xf32>
    %c1_49 = arith.constant 1 : index
    %c0_50 = arith.constant 0 : index
    %c0_51 = arith.constant 0 : index
    %100 = vector.load %arg7[%c1_49, %c0_50, %c0_51] : memref<3x32x1xf32, #tpu.memory_space<vmem>>, vector<1x32x1xf32>
    %101 = vector.shape_cast %100 : vector<1x32x1xf32> to vector<32x1xf32>
    %102 = vector.broadcast %101 : vector<32x1xf32> to vector<32x256xf32>
    %103 = arith.addf %99, %102 : vector<32x256xf32>
    %cst_52 = arith.constant 0.000000e+00 : f32
    %104 = vector.broadcast %cst_52 : f32 to vector<32x256xf32>
    %105 = arith.maximumf %103, %104 : vector<32x256xf32>
    %c1_53 = arith.constant 1 : index
    %c0_54 = arith.constant 0 : index
    %c0_55 = arith.constant 0 : index
    %106 = vector.load %arg8[%c1_53, %c0_54, %c0_55] : memref<3x32x32xf32, #tpu.memory_space<vmem>>, vector<1x32x32xf32>
    %107 = vector.shape_cast %106 : vector<1x32x32xf32> to vector<32x32xf32>
    %cst_56 = arith.constant dense<0.000000e+00> : vector<32x256xf32>
    %108 = tpu.matmul %107, %105, %cst_56 {dimension_numbers = #tpu.dot_dimension_numbers<[1], [0], [0], [1], [0, 0, 1, 1], [], []>} : vector<32x32xf32>, vector<32x256xf32>, vector<32x256xf32> -> vector<32x256xf32>
    %c1_57 = arith.constant 1 : index
    %c0_58 = arith.constant 0 : index
    %c0_59 = arith.constant 0 : index
    %109 = vector.load %arg9[%c1_57, %c0_58, %c0_59] : memref<3x32x1xf32, #tpu.memory_space<vmem>>, vector<1x32x1xf32>
    %110 = vector.shape_cast %109 : vector<1x32x1xf32> to vector<32x1xf32>
    %111 = vector.broadcast %110 : vector<32x1xf32> to vector<32x256xf32>
    %112 = arith.addf %108, %111 : vector<32x256xf32>
    %113 = arith.addf %82, %112 : vector<32x256xf32>
    %114 = vector.broadcast %1 : vector<1x256xf32> to vector<32x256xf32>
    %115 = arith.mulf %113, %114 : vector<32x256xf32>
    %c4_i32_60 = arith.constant 4 : i32
    %116 = tpu.dynamic_rotate %115 by %c4_i32_60 dim 1 : vector<32x256xf32>, i32 -> vector<32x256xf32>
    %117 = vector.broadcast %30 : vector<1x256xf32> to vector<32x256xf32>
    %118 = arith.mulf %117, %116 : vector<32x256xf32>
    %c252_i32 = arith.constant 252 : i32
    %119 = tpu.dynamic_rotate %115 by %c252_i32 dim 1 : vector<32x256xf32>, i32 -> vector<32x256xf32>
    %120 = vector.broadcast %42 : vector<1x256xf32> to vector<32x256xf32>
    %121 = arith.mulf %120, %119 : vector<32x256xf32>
    %c2 = arith.constant 2 : index
    %c0_61 = arith.constant 0 : index
    %c0_62 = arith.constant 0 : index
    %122 = vector.load %arg5[%c2, %c0_61, %c0_62] : memref<3x32x32xf32, #tpu.memory_space<vmem>>, vector<1x32x32xf32>
    %123 = vector.shape_cast %122 : vector<1x32x32xf32> to vector<32x32xf32>
    %cst_63 = arith.constant dense<0.000000e+00> : vector<32x256xf32>
    %124 = tpu.matmul %123, %115, %cst_63 {dimension_numbers = #tpu.dot_dimension_numbers<[1], [0], [0], [1], [0, 0, 1, 1], [], []>} : vector<32x32xf32>, vector<32x256xf32>, vector<32x256xf32> -> vector<32x256xf32>
    %c2_64 = arith.constant 2 : index
    %c0_65 = arith.constant 0 : index
    %c0_66 = arith.constant 0 : index
    %125 = vector.load %arg4[%c2_64, %c0_65, %c0_66] : memref<3x32x32xf32, #tpu.memory_space<vmem>>, vector<1x32x32xf32>
    %126 = vector.shape_cast %125 : vector<1x32x32xf32> to vector<32x32xf32>
    %cst_67 = arith.constant dense<0.000000e+00> : vector<32x256xf32>
    %127 = tpu.matmul %126, %118, %cst_67 {dimension_numbers = #tpu.dot_dimension_numbers<[1], [0], [0], [1], [0, 0, 1, 1], [], []>} : vector<32x32xf32>, vector<32x256xf32>, vector<32x256xf32> -> vector<32x256xf32>
    %128 = arith.addf %124, %127 : vector<32x256xf32>
    %c2_68 = arith.constant 2 : index
    %c0_69 = arith.constant 0 : index
    %c0_70 = arith.constant 0 : index
    %129 = vector.load %arg6[%c2_68, %c0_69, %c0_70] : memref<3x32x32xf32, #tpu.memory_space<vmem>>, vector<1x32x32xf32>
    %130 = vector.shape_cast %129 : vector<1x32x32xf32> to vector<32x32xf32>
    %cst_71 = arith.constant dense<0.000000e+00> : vector<32x256xf32>
    %131 = tpu.matmul %130, %121, %cst_71 {dimension_numbers = #tpu.dot_dimension_numbers<[1], [0], [0], [1], [0, 0, 1, 1], [], []>} : vector<32x32xf32>, vector<32x256xf32>, vector<32x256xf32> -> vector<32x256xf32>
    %132 = arith.addf %128, %131 : vector<32x256xf32>
    %c2_72 = arith.constant 2 : index
    %c0_73 = arith.constant 0 : index
    %c0_74 = arith.constant 0 : index
    %133 = vector.load %arg7[%c2_72, %c0_73, %c0_74] : memref<3x32x1xf32, #tpu.memory_space<vmem>>, vector<1x32x1xf32>
    %134 = vector.shape_cast %133 : vector<1x32x1xf32> to vector<32x1xf32>
    %135 = vector.broadcast %134 : vector<32x1xf32> to vector<32x256xf32>
    %136 = arith.addf %132, %135 : vector<32x256xf32>
    %cst_75 = arith.constant 0.000000e+00 : f32
    %137 = vector.broadcast %cst_75 : f32 to vector<32x256xf32>
    %138 = arith.maximumf %136, %137 : vector<32x256xf32>
    %c2_76 = arith.constant 2 : index
    %c0_77 = arith.constant 0 : index
    %c0_78 = arith.constant 0 : index
    %139 = vector.load %arg8[%c2_76, %c0_77, %c0_78] : memref<3x32x32xf32, #tpu.memory_space<vmem>>, vector<1x32x32xf32>
    %140 = vector.shape_cast %139 : vector<1x32x32xf32> to vector<32x32xf32>
    %cst_79 = arith.constant dense<0.000000e+00> : vector<32x256xf32>
    %141 = tpu.matmul %140, %138, %cst_79 {dimension_numbers = #tpu.dot_dimension_numbers<[1], [0], [0], [1], [0, 0, 1, 1], [], []>} : vector<32x32xf32>, vector<32x256xf32>, vector<32x256xf32> -> vector<32x256xf32>
    %c2_80 = arith.constant 2 : index
    %c0_81 = arith.constant 0 : index
    %c0_82 = arith.constant 0 : index
    %142 = vector.load %arg9[%c2_80, %c0_81, %c0_82] : memref<3x32x1xf32, #tpu.memory_space<vmem>>, vector<1x32x1xf32>
    %143 = vector.shape_cast %142 : vector<1x32x1xf32> to vector<32x1xf32>
    %144 = vector.broadcast %143 : vector<32x1xf32> to vector<32x256xf32>
    %145 = arith.addf %141, %144 : vector<32x256xf32>
    %146 = arith.addf %115, %145 : vector<32x256xf32>
    %147 = vector.broadcast %1 : vector<1x256xf32> to vector<32x256xf32>
    %148 = arith.mulf %146, %147 : vector<32x256xf32>
    %c0_83 = arith.constant 0 : index
    %c0_84 = arith.constant 0 : index
    %149 = vector.load %arg10[%c0_83, %c0_84] : memref<8x32xf32, #tpu.memory_space<vmem>>, vector<8x32xf32>
    %cst_85 = arith.constant dense<0.000000e+00> : vector<8x256xf32>
    %150 = tpu.matmul %149, %148, %cst_85 {dimension_numbers = #tpu.dot_dimension_numbers<[1], [0], [0], [1], [0, 0, 1, 1], [], []>} : vector<8x32xf32>, vector<32x256xf32>, vector<8x256xf32> -> vector<8x256xf32>
    %c0_86 = arith.constant 0 : index
    %c0_87 = arith.constant 0 : index
    %151 = vector.load %arg11[%c0_86, %c0_87] : memref<8x1xf32, #tpu.memory_space<vmem>>, vector<8x1xf32>
    %152 = vector.broadcast %151 : vector<8x1xf32> to vector<8x256xf32>
    %153 = arith.addf %150, %152 : vector<8x256xf32>
    %154 = vector.broadcast %1 : vector<1x256xf32> to vector<8x256xf32>
    %155 = arith.mulf %153, %154 : vector<8x256xf32>
    %156 = vector.extract_strided_slice %155 {offsets = [0, 0], sizes = [8, 128], strides = [1, 1]} : vector<8x256xf32> to vector<8x128xf32>
    %c0_88 = arith.constant 0 : index
    %c0_89 = arith.constant 0 : index
    %c0_90 = arith.constant 0 : index
    %c0_91 = arith.constant 0 : index
    %157 = vector.load %arg22[%c0_88, %c0_89, %c0_90, %c0_91] : memref<3x2x8x128xf32, #tpu.memory_space<vmem>>, vector<1x1x8x128xf32>
    %158 = vector.shape_cast %157 : vector<1x1x8x128xf32> to vector<8x128xf32>
    %159 = vector.shape_cast %156 : vector<8x128xf32> to vector<1x1x8x128xf32>
    tpu.vector_store %arg22[%c0_88, %c0_89, %c0_90, %c0_91], %159 {strides = array<i32>} : memref<3x2x8x128xf32, #tpu.memory_space<vmem>>, vector<1x1x8x128xf32>,
    %160 = vector.extract_strided_slice %155 {offsets = [0, 128], sizes = [8, 128], strides = [1, 1]} : vector<8x256xf32> to vector<8x128xf32>
    %c0_92 = arith.constant 0 : index
    %c1_93 = arith.constant 1 : index
    %c0_94 = arith.constant 0 : index
    %c0_95 = arith.constant 0 : index
    %161 = vector.load %arg22[%c0_92, %c1_93, %c0_94, %c0_95] : memref<3x2x8x128xf32, #tpu.memory_space<vmem>>, vector<1x1x8x128xf32>
    %162 = vector.shape_cast %161 : vector<1x1x8x128xf32> to vector<8x128xf32>
    %163 = vector.shape_cast %160 : vector<8x128xf32> to vector<1x1x8x128xf32>
    tpu.vector_store %arg22[%c0_92, %c1_93, %c0_94, %c0_95], %163 {strides = array<i32>} : memref<3x2x8x128xf32, #tpu.memory_space<vmem>>, vector<1x1x8x128xf32>,
    %cst_96 = arith.constant dense<0xFF800000> : vector<256xf32>
    %164 = vector.multi_reduction <maximumf>, %155, %cst_96 [0] : vector<8x256xf32> to vector<256xf32>
    %165 = vector.shape_cast %164 : vector<256xf32> to vector<1x256xf32>
    %166 = vector.broadcast %165 : vector<1x256xf32> to vector<8x256xf32>
    %167 = arith.subf %155, %166 : vector<8x256xf32>
    %168 = math.exp %167 : vector<8x256xf32>
    %cst_97 = arith.constant dense<0.000000e+00> : vector<256xf32>
    %169 = vector.multi_reduction <add>, %168, %cst_97 [0] : vector<8x256xf32> to vector<256xf32>
    %170 = vector.shape_cast %169 : vector<256xf32> to vector<1x256xf32>
    %171 = tpu.reciprocal %170 {approx = true} : vector<1x256xf32> -> vector<1x256xf32>
    %172 = vector.broadcast %171 : vector<1x256xf32> to vector<8x256xf32>
    %173 = arith.mulf %168, %172 : vector<8x256xf32>
    %174 = vector.broadcast %1 : vector<1x256xf32> to vector<8x256xf32>
    %175 = arith.mulf %173, %174 : vector<8x256xf32>
    %c0_98 = arith.constant 0 : index
    %c0_99 = arith.constant 0 : index
    %c0_100 = arith.constant 0 : index
    %176 = vector.load %arg12[%c0_98, %c0_99, %c0_100] : memref<2x32x8xf32, #tpu.memory_space<vmem>>, vector<1x32x8xf32>
    %177 = vector.shape_cast %176 : vector<1x32x8xf32> to vector<32x8xf32>
    %cst_101 = arith.constant dense<0.000000e+00> : vector<32x256xf32>
    %178 = tpu.matmul %177, %175, %cst_101 {dimension_numbers = #tpu.dot_dimension_numbers<[1], [0], [0], [1], [0, 0, 1, 1], [], []>} : vector<32x8xf32>, vector<8x256xf32>, vector<32x256xf32> -> vector<32x256xf32>
    %c0_102 = arith.constant 0 : index
    %c0_103 = arith.constant 0 : index
    %c0_104 = arith.constant 0 : index
    %179 = vector.load %arg13[%c0_102, %c0_103, %c0_104] : memref<2x32x1xf32, #tpu.memory_space<vmem>>, vector<1x32x1xf32>
    %180 = vector.shape_cast %179 : vector<1x32x1xf32> to vector<32x1xf32>
    %181 = vector.broadcast %180 : vector<32x1xf32> to vector<32x256xf32>
    %182 = arith.addf %178, %181 : vector<32x256xf32>
    %c1_i32_105 = arith.constant 1 : i32
    %183 = tpu.dynamic_rotate %182 by %c1_i32_105 dim 1 : vector<32x256xf32>, i32 -> vector<32x256xf32>
    %184 = vector.broadcast %22 : vector<1x256xf32> to vector<32x256xf32>
    %185 = arith.mulf %184, %183 : vector<32x256xf32>
    %c255_i32_106 = arith.constant 255 : i32
    %186 = tpu.dynamic_rotate %182 by %c255_i32_106 dim 1 : vector<32x256xf32>, i32 -> vector<32x256xf32>
    %187 = vector.broadcast %34 : vector<1x256xf32> to vector<32x256xf32>
    %188 = arith.mulf %187, %186 : vector<32x256xf32>
    %c0_107 = arith.constant 0 : index
    %c0_108 = arith.constant 0 : index
    %c0_109 = arith.constant 0 : index
    %c0_110 = arith.constant 0 : index
    %189 = vector.load %arg15[%c0_107, %c0_108, %c0_109, %c0_110] : memref<2x3x32x32xf32, #tpu.memory_space<vmem>>, vector<1x1x32x32xf32>
    %190 = vector.shape_cast %189 : vector<1x1x32x32xf32> to vector<32x32xf32>
    %cst_111 = arith.constant dense<0.000000e+00> : vector<32x256xf32>
    %191 = tpu.matmul %190, %182, %cst_111 {dimension_numbers = #tpu.dot_dimension_numbers<[1], [0], [0], [1], [0, 0, 1, 1], [], []>} : vector<32x32xf32>, vector<32x256xf32>, vector<32x256xf32> -> vector<32x256xf32>
    %c0_112 = arith.constant 0 : index
    %c0_113 = arith.constant 0 : index
    %c0_114 = arith.constant 0 : index
    %c0_115 = arith.constant 0 : index
    %192 = vector.load %arg14[%c0_112, %c0_113, %c0_114, %c0_115] : memref<2x3x32x32xf32, #tpu.memory_space<vmem>>, vector<1x1x32x32xf32>
    %193 = vector.shape_cast %192 : vector<1x1x32x32xf32> to vector<32x32xf32>
    %cst_116 = arith.constant dense<0.000000e+00> : vector<32x256xf32>
    %194 = tpu.matmul %193, %185, %cst_116 {dimension_numbers = #tpu.dot_dimension_numbers<[1], [0], [0], [1], [0, 0, 1, 1], [], []>} : vector<32x32xf32>, vector<32x256xf32>, vector<32x256xf32> -> vector<32x256xf32>
    %195 = arith.addf %191, %194 : vector<32x256xf32>
    %c0_117 = arith.constant 0 : index
    %c0_118 = arith.constant 0 : index
    %c0_119 = arith.constant 0 : index
    %c0_120 = arith.constant 0 : index
    %196 = vector.load %arg16[%c0_117, %c0_118, %c0_119, %c0_120] : memref<2x3x32x32xf32, #tpu.memory_space<vmem>>, vector<1x1x32x32xf32>
    %197 = vector.shape_cast %196 : vector<1x1x32x32xf32> to vector<32x32xf32>
    %cst_121 = arith.constant dense<0.000000e+00> : vector<32x256xf32>
    %198 = tpu.matmul %197, %188, %cst_121 {dimension_numbers = #tpu.dot_dimension_numbers<[1], [0], [0], [1], [0, 0, 1, 1], [], []>} : vector<32x32xf32>, vector<32x256xf32>, vector<32x256xf32> -> vector<32x256xf32>
    %199 = arith.addf %195, %198 : vector<32x256xf32>
    %c0_122 = arith.constant 0 : index
    %c0_123 = arith.constant 0 : index
    %c0_124 = arith.constant 0 : index
    %c0_125 = arith.constant 0 : index
    %200 = vector.load %arg17[%c0_122, %c0_123, %c0_124, %c0_125] : memref<2x3x32x1xf32, #tpu.memory_space<vmem>>, vector<1x1x32x1xf32>
    %201 = vector.shape_cast %200 : vector<1x1x32x1xf32> to vector<32x1xf32>
    %202 = vector.broadcast %201 : vector<32x1xf32> to vector<32x256xf32>
    %203 = arith.addf %199, %202 : vector<32x256xf32>
    %cst_126 = arith.constant 0.000000e+00 : f32
    %204 = vector.broadcast %cst_126 : f32 to vector<32x256xf32>
    %205 = arith.maximumf %203, %204 : vector<32x256xf32>
    %c0_127 = arith.constant 0 : index
    %c0_128 = arith.constant 0 : index
    %c0_129 = arith.constant 0 : index
    %c0_130 = arith.constant 0 : index
    %206 = vector.load %arg18[%c0_127, %c0_128, %c0_129, %c0_130] : memref<2x3x32x32xf32, #tpu.memory_space<vmem>>, vector<1x1x32x32xf32>
    %207 = vector.shape_cast %206 : vector<1x1x32x32xf32> to vector<32x32xf32>
    %cst_131 = arith.constant dense<0.000000e+00> : vector<32x256xf32>
    %208 = tpu.matmul %207, %205, %cst_131 {dimension_numbers = #tpu.dot_dimension_numbers<[1], [0], [0], [1], [0, 0, 1, 1], [], []>} : vector<32x32xf32>, vector<32x256xf32>, vector<32x256xf32> -> vector<32x256xf32>
    %c0_132 = arith.constant 0 : index
    %c0_133 = arith.constant 0 : index
    %c0_134 = arith.constant 0 : index
    %c0_135 = arith.constant 0 : index
    %209 = vector.load %arg19[%c0_132, %c0_133, %c0_134, %c0_135] : memref<2x3x32x1xf32, #tpu.memory_space<vmem>>, vector<1x1x32x1xf32>
    %210 = vector.shape_cast %209 : vector<1x1x32x1xf32> to vector<32x1xf32>
    %211 = vector.broadcast %210 : vector<32x1xf32> to vector<32x256xf32>
    %212 = arith.addf %208, %211 : vector<32x256xf32>
    %213 = arith.addf %182, %212 : vector<32x256xf32>
    %214 = vector.broadcast %1 : vector<1x256xf32> to vector<32x256xf32>
    %215 = arith.mulf %213, %214 : vector<32x256xf32>
    %c2_i32_136 = arith.constant 2 : i32
    %216 = tpu.dynamic_rotate %215 by %c2_i32_136 dim 1 : vector<32x256xf32>, i32 -> vector<32x256xf32>
    %217 = vector.broadcast %26 : vector<1x256xf32> to vector<32x256xf32>
    %218 = arith.mulf %217, %216 : vector<32x256xf32>
    %c254_i32_137 = arith.constant 254 : i32
    %219 = tpu.dynamic_rotate %215 by %c254_i32_137 dim 1 : vector<32x256xf32>, i32 -> vector<32x256xf32>
    %220 = vector.broadcast %38 : vector<1x256xf32> to vector<32x256xf32>
    %221 = arith.mulf %220, %219 : vector<32x256xf32>
    %c0_138 = arith.constant 0 : index
    %c1_139 = arith.constant 1 : index
    %c0_140 = arith.constant 0 : index
    %c0_141 = arith.constant 0 : index
    %222 = vector.load %arg15[%c0_138, %c1_139, %c0_140, %c0_141] : memref<2x3x32x32xf32, #tpu.memory_space<vmem>>, vector<1x1x32x32xf32>
    %223 = vector.shape_cast %222 : vector<1x1x32x32xf32> to vector<32x32xf32>
    %cst_142 = arith.constant dense<0.000000e+00> : vector<32x256xf32>
    %224 = tpu.matmul %223, %215, %cst_142 {dimension_numbers = #tpu.dot_dimension_numbers<[1], [0], [0], [1], [0, 0, 1, 1], [], []>} : vector<32x32xf32>, vector<32x256xf32>, vector<32x256xf32> -> vector<32x256xf32>
    %c0_143 = arith.constant 0 : index
    %c1_144 = arith.constant 1 : index
    %c0_145 = arith.constant 0 : index
    %c0_146 = arith.constant 0 : index
    %225 = vector.load %arg14[%c0_143, %c1_144, %c0_145, %c0_146] : memref<2x3x32x32xf32, #tpu.memory_space<vmem>>, vector<1x1x32x32xf32>
    %226 = vector.shape_cast %225 : vector<1x1x32x32xf32> to vector<32x32xf32>
    %cst_147 = arith.constant dense<0.000000e+00> : vector<32x256xf32>
    %227 = tpu.matmul %226, %218, %cst_147 {dimension_numbers = #tpu.dot_dimension_numbers<[1], [0], [0], [1], [0, 0, 1, 1], [], []>} : vector<32x32xf32>, vector<32x256xf32>, vector<32x256xf32> -> vector<32x256xf32>
    %228 = arith.addf %224, %227 : vector<32x256xf32>
    %c0_148 = arith.constant 0 : index
    %c1_149 = arith.constant 1 : index
    %c0_150 = arith.constant 0 : index
    %c0_151 = arith.constant 0 : index
    %229 = vector.load %arg16[%c0_148, %c1_149, %c0_150, %c0_151] : memref<2x3x32x32xf32, #tpu.memory_space<vmem>>, vector<1x1x32x32xf32>
    %230 = vector.shape_cast %229 : vector<1x1x32x32xf32> to vector<32x32xf32>
    %cst_152 = arith.constant dense<0.000000e+00> : vector<32x256xf32>
    %231 = tpu.matmul %230, %221, %cst_152 {dimension_numbers = #tpu.dot_dimension_numbers<[1], [0], [0], [1], [0, 0, 1, 1], [], []>} : vector<32x32xf32>, vector<32x256xf32>, vector<32x256xf32> -> vector<32x256xf32>
    %232 = arith.addf %228, %231 : vector<32x256xf32>
    %c0_153 = arith.constant 0 : index
    %c1_154 = arith.constant 1 : index
    %c0_155 = arith.constant 0 : index
    %c0_156 = arith.constant 0 : index
    %233 = vector.load %arg17[%c0_153, %c1_154, %c0_155, %c0_156] : memref<2x3x32x1xf32, #tpu.memory_space<vmem>>, vector<1x1x32x1xf32>
    %234 = vector.shape_cast %233 : vector<1x1x32x1xf32> to vector<32x1xf32>
    %235 = vector.broadcast %234 : vector<32x1xf32> to vector<32x256xf32>
    %236 = arith.addf %232, %235 : vector<32x256xf32>
    %cst_157 = arith.constant 0.000000e+00 : f32
    %237 = vector.broadcast %cst_157 : f32 to vector<32x256xf32>
    %238 = arith.maximumf %236, %237 : vector<32x256xf32>
    %c0_158 = arith.constant 0 : index
    %c1_159 = arith.constant 1 : index
    %c0_160 = arith.constant 0 : index
    %c0_161 = arith.constant 0 : index
    %239 = vector.load %arg18[%c0_158, %c1_159, %c0_160, %c0_161] : memref<2x3x32x32xf32, #tpu.memory_space<vmem>>, vector<1x1x32x32xf32>
    %240 = vector.shape_cast %239 : vector<1x1x32x32xf32> to vector<32x32xf32>
    %cst_162 = arith.constant dense<0.000000e+00> : vector<32x256xf32>
    %241 = tpu.matmul %240, %238, %cst_162 {dimension_numbers = #tpu.dot_dimension_numbers<[1], [0], [0], [1], [0, 0, 1, 1], [], []>} : vector<32x32xf32>, vector<32x256xf32>, vector<32x256xf32> -> vector<32x256xf32>
    %c0_163 = arith.constant 0 : index
    %c1_164 = arith.constant 1 : index
    %c0_165 = arith.constant 0 : index
    %c0_166 = arith.constant 0 : index
    %242 = vector.load %arg19[%c0_163, %c1_164, %c0_165, %c0_166] : memref<2x3x32x1xf32, #tpu.memory_space<vmem>>, vector<1x1x32x1xf32>
    %243 = vector.shape_cast %242 : vector<1x1x32x1xf32> to vector<32x1xf32>
    %244 = vector.broadcast %243 : vector<32x1xf32> to vector<32x256xf32>
    %245 = arith.addf %241, %244 : vector<32x256xf32>
    %246 = arith.addf %215, %245 : vector<32x256xf32>
    %247 = vector.broadcast %1 : vector<1x256xf32> to vector<32x256xf32>
    %248 = arith.mulf %246, %247 : vector<32x256xf32>
    %c4_i32_167 = arith.constant 4 : i32
    %249 = tpu.dynamic_rotate %248 by %c4_i32_167 dim 1 : vector<32x256xf32>, i32 -> vector<32x256xf32>
    %250 = vector.broadcast %30 : vector<1x256xf32> to vector<32x256xf32>
    %251 = arith.mulf %250, %249 : vector<32x256xf32>
    %c252_i32_168 = arith.constant 252 : i32
    %252 = tpu.dynamic_rotate %248 by %c252_i32_168 dim 1 : vector<32x256xf32>, i32 -> vector<32x256xf32>
    %253 = vector.broadcast %42 : vector<1x256xf32> to vector<32x256xf32>
    %254 = arith.mulf %253, %252 : vector<32x256xf32>
    %c0_169 = arith.constant 0 : index
    %c2_170 = arith.constant 2 : index
    %c0_171 = arith.constant 0 : index
    %c0_172 = arith.constant 0 : index
    %255 = vector.load %arg15[%c0_169, %c2_170, %c0_171, %c0_172] : memref<2x3x32x32xf32, #tpu.memory_space<vmem>>, vector<1x1x32x32xf32>
    %256 = vector.shape_cast %255 : vector<1x1x32x32xf32> to vector<32x32xf32>
    %cst_173 = arith.constant dense<0.000000e+00> : vector<32x256xf32>
    %257 = tpu.matmul %256, %248, %cst_173 {dimension_numbers = #tpu.dot_dimension_numbers<[1], [0], [0], [1], [0, 0, 1, 1], [], []>} : vector<32x32xf32>, vector<32x256xf32>, vector<32x256xf32> -> vector<32x256xf32>
    %c0_174 = arith.constant 0 : index
    %c2_175 = arith.constant 2 : index
    %c0_176 = arith.constant 0 : index
    %c0_177 = arith.constant 0 : index
    %258 = vector.load %arg14[%c0_174, %c2_175, %c0_176, %c0_177] : memref<2x3x32x32xf32, #tpu.memory_space<vmem>>, vector<1x1x32x32xf32>
    %259 = vector.shape_cast %258 : vector<1x1x32x32xf32> to vector<32x32xf32>
    %cst_178 = arith.constant dense<0.000000e+00> : vector<32x256xf32>
    %260 = tpu.matmul %259, %251, %cst_178 {dimension_numbers = #tpu.dot_dimension_numbers<[1], [0], [0], [1], [0, 0, 1, 1], [], []>} : vector<32x32xf32>, vector<32x256xf32>, vector<32x256xf32> -> vector<32x256xf32>
    %261 = arith.addf %257, %260 : vector<32x256xf32>
    %c0_179 = arith.constant 0 : index
    %c2_180 = arith.constant 2 : index
    %c0_181 = arith.constant 0 : index
    %c0_182 = arith.constant 0 : index
    %262 = vector.load %arg16[%c0_179, %c2_180, %c0_181, %c0_182] : memref<2x3x32x32xf32, #tpu.memory_space<vmem>>, vector<1x1x32x32xf32>
    %263 = vector.shape_cast %262 : vector<1x1x32x32xf32> to vector<32x32xf32>
    %cst_183 = arith.constant dense<0.000000e+00> : vector<32x256xf32>
    %264 = tpu.matmul %263, %254, %cst_183 {dimension_numbers = #tpu.dot_dimension_numbers<[1], [0], [0], [1], [0, 0, 1, 1], [], []>} : vector<32x32xf32>, vector<32x256xf32>, vector<32x256xf32> -> vector<32x256xf32>
    %265 = arith.addf %261, %264 : vector<32x256xf32>
    %c0_184 = arith.constant 0 : index
    %c2_185 = arith.constant 2 : index
    %c0_186 = arith.constant 0 : index
    %c0_187 = arith.constant 0 : index
    %266 = vector.load %arg17[%c0_184, %c2_185, %c0_186, %c0_187] : memref<2x3x32x1xf32, #tpu.memory_space<vmem>>, vector<1x1x32x1xf32>
    %267 = vector.shape_cast %266 : vector<1x1x32x1xf32> to vector<32x1xf32>
    %268 = vector.broadcast %267 : vector<32x1xf32> to vector<32x256xf32>
    %269 = arith.addf %265, %268 : vector<32x256xf32>
    %cst_188 = arith.constant 0.000000e+00 : f32
    %270 = vector.broadcast %cst_188 : f32 to vector<32x256xf32>
    %271 = arith.maximumf %269, %270 : vector<32x256xf32>
    %c0_189 = arith.constant 0 : index
    %c2_190 = arith.constant 2 : index
    %c0_191 = arith.constant 0 : index
    %c0_192 = arith.constant 0 : index
    %272 = vector.load %arg18[%c0_189, %c2_190, %c0_191, %c0_192] : memref<2x3x32x32xf32, #tpu.memory_space<vmem>>, vector<1x1x32x32xf32>
    %273 = vector.shape_cast %272 : vector<1x1x32x32xf32> to vector<32x32xf32>
    %cst_193 = arith.constant dense<0.000000e+00> : vector<32x256xf32>
    %274 = tpu.matmul %273, %271, %cst_193 {dimension_numbers = #tpu.dot_dimension_numbers<[1], [0], [0], [1], [0, 0, 1, 1], [], []>} : vector<32x32xf32>, vector<32x256xf32>, vector<32x256xf32> -> vector<32x256xf32>
    %c0_194 = arith.constant 0 : index
    %c2_195 = arith.constant 2 : index
    %c0_196 = arith.constant 0 : index
    %c0_197 = arith.constant 0 : index
    %275 = vector.load %arg19[%c0_194, %c2_195, %c0_196, %c0_197] : memref<2x3x32x1xf32, #tpu.memory_space<vmem>>, vector<1x1x32x1xf32>
    %276 = vector.shape_cast %275 : vector<1x1x32x1xf32> to vector<32x1xf32>
    %277 = vector.broadcast %276 : vector<32x1xf32> to vector<32x256xf32>
    %278 = arith.addf %274, %277 : vector<32x256xf32>
    %279 = arith.addf %248, %278 : vector<32x256xf32>
    %280 = vector.broadcast %1 : vector<1x256xf32> to vector<32x256xf32>
    %281 = arith.mulf %279, %280 : vector<32x256xf32>
    %c0_198 = arith.constant 0 : index
    %c0_199 = arith.constant 0 : index
    %c0_200 = arith.constant 0 : index
    %282 = vector.load %arg20[%c0_198, %c0_199, %c0_200] : memref<2x8x32xf32, #tpu.memory_space<vmem>>, vector<1x8x32xf32>
    %283 = vector.shape_cast %282 : vector<1x8x32xf32> to vector<8x32xf32>
    %cst_201 = arith.constant dense<0.000000e+00> : vector<8x256xf32>
    %284 = tpu.matmul %283, %281, %cst_201 {dimension_numbers = #tpu.dot_dimension_numbers<[1], [0], [0], [1], [0, 0, 1, 1], [], []>} : vector<8x32xf32>, vector<32x256xf32>, vector<8x256xf32> -> vector<8x256xf32>
    %c0_202 = arith.constant 0 : index
    %c0_203 = arith.constant 0 : index
    %c0_204 = arith.constant 0 : index
    %285 = vector.load %arg21[%c0_202, %c0_203, %c0_204] : memref<2x8x1xf32, #tpu.memory_space<vmem>>, vector<1x8x1xf32>
    %286 = vector.shape_cast %285 : vector<1x8x1xf32> to vector<8x1xf32>
    %287 = vector.broadcast %286 : vector<8x1xf32> to vector<8x256xf32>
    %288 = arith.addf %284, %287 : vector<8x256xf32>
    %289 = vector.broadcast %1 : vector<1x256xf32> to vector<8x256xf32>
    %290 = arith.mulf %288, %289 : vector<8x256xf32>
    %291 = vector.extract_strided_slice %290 {offsets = [0, 0], sizes = [8, 128], strides = [1, 1]} : vector<8x256xf32> to vector<8x128xf32>
    %c1_205 = arith.constant 1 : index
    %c0_206 = arith.constant 0 : index
    %c0_207 = arith.constant 0 : index
    %c0_208 = arith.constant 0 : index
    %292 = vector.load %arg22[%c1_205, %c0_206, %c0_207, %c0_208] : memref<3x2x8x128xf32, #tpu.memory_space<vmem>>, vector<1x1x8x128xf32>
    %293 = vector.shape_cast %292 : vector<1x1x8x128xf32> to vector<8x128xf32>
    %294 = vector.shape_cast %291 : vector<8x128xf32> to vector<1x1x8x128xf32>
    tpu.vector_store %arg22[%c1_205, %c0_206, %c0_207, %c0_208], %294 {strides = array<i32>} : memref<3x2x8x128xf32, #tpu.memory_space<vmem>>, vector<1x1x8x128xf32>,
    %295 = vector.extract_strided_slice %290 {offsets = [0, 128], sizes = [8, 128], strides = [1, 1]} : vector<8x256xf32> to vector<8x128xf32>
    %c1_209 = arith.constant 1 : index
    %c1_210 = arith.constant 1 : index
    %c0_211 = arith.constant 0 : index
    %c0_212 = arith.constant 0 : index
    %296 = vector.load %arg22[%c1_209, %c1_210, %c0_211, %c0_212] : memref<3x2x8x128xf32, #tpu.memory_space<vmem>>, vector<1x1x8x128xf32>
    %297 = vector.shape_cast %296 : vector<1x1x8x128xf32> to vector<8x128xf32>
    %298 = vector.shape_cast %295 : vector<8x128xf32> to vector<1x1x8x128xf32>
    tpu.vector_store %arg22[%c1_209, %c1_210, %c0_211, %c0_212], %298 {strides = array<i32>} : memref<3x2x8x128xf32, #tpu.memory_space<vmem>>, vector<1x1x8x128xf32>,
    %cst_213 = arith.constant dense<0xFF800000> : vector<256xf32>
    %299 = vector.multi_reduction <maximumf>, %290, %cst_213 [0] : vector<8x256xf32> to vector<256xf32>
    %300 = vector.shape_cast %299 : vector<256xf32> to vector<1x256xf32>
    %301 = vector.broadcast %300 : vector<1x256xf32> to vector<8x256xf32>
    %302 = arith.subf %290, %301 : vector<8x256xf32>
    %303 = math.exp %302 : vector<8x256xf32>
    %cst_214 = arith.constant dense<0.000000e+00> : vector<256xf32>
    %304 = vector.multi_reduction <add>, %303, %cst_214 [0] : vector<8x256xf32> to vector<256xf32>
    %305 = vector.shape_cast %304 : vector<256xf32> to vector<1x256xf32>
    %306 = tpu.reciprocal %305 {approx = true} : vector<1x256xf32> -> vector<1x256xf32>
    %307 = vector.broadcast %306 : vector<1x256xf32> to vector<8x256xf32>
    %308 = arith.mulf %303, %307 : vector<8x256xf32>
    %309 = vector.broadcast %1 : vector<1x256xf32> to vector<8x256xf32>
    %310 = arith.mulf %308, %309 : vector<8x256xf32>
    %c1_215 = arith.constant 1 : index
    %c0_216 = arith.constant 0 : index
    %c0_217 = arith.constant 0 : index
    %311 = vector.load %arg12[%c1_215, %c0_216, %c0_217] : memref<2x32x8xf32, #tpu.memory_space<vmem>>, vector<1x32x8xf32>
    %312 = vector.shape_cast %311 : vector<1x32x8xf32> to vector<32x8xf32>
    %cst_218 = arith.constant dense<0.000000e+00> : vector<32x256xf32>
    %313 = tpu.matmul %312, %310, %cst_218 {dimension_numbers = #tpu.dot_dimension_numbers<[1], [0], [0], [1], [0, 0, 1, 1], [], []>} : vector<32x8xf32>, vector<8x256xf32>, vector<32x256xf32> -> vector<32x256xf32>
    %c1_219 = arith.constant 1 : index
    %c0_220 = arith.constant 0 : index
    %c0_221 = arith.constant 0 : index
    %314 = vector.load %arg13[%c1_219, %c0_220, %c0_221] : memref<2x32x1xf32, #tpu.memory_space<vmem>>, vector<1x32x1xf32>
    %315 = vector.shape_cast %314 : vector<1x32x1xf32> to vector<32x1xf32>
    %316 = vector.broadcast %315 : vector<32x1xf32> to vector<32x256xf32>
    %317 = arith.addf %313, %316 : vector<32x256xf32>
    %c1_i32_222 = arith.constant 1 : i32
    %318 = tpu.dynamic_rotate %317 by %c1_i32_222 dim 1 : vector<32x256xf32>, i32 -> vector<32x256xf32>
    %319 = vector.broadcast %22 : vector<1x256xf32> to vector<32x256xf32>
    %320 = arith.mulf %319, %318 : vector<32x256xf32>
    %c255_i32_223 = arith.constant 255 : i32
    %321 = tpu.dynamic_rotate %317 by %c255_i32_223 dim 1 : vector<32x256xf32>, i32 -> vector<32x256xf32>
    %322 = vector.broadcast %34 : vector<1x256xf32> to vector<32x256xf32>
    %323 = arith.mulf %322, %321 : vector<32x256xf32>
    %c1_224 = arith.constant 1 : index
    %c0_225 = arith.constant 0 : index
    %c0_226 = arith.constant 0 : index
    %c0_227 = arith.constant 0 : index
    %324 = vector.load %arg15[%c1_224, %c0_225, %c0_226, %c0_227] : memref<2x3x32x32xf32, #tpu.memory_space<vmem>>, vector<1x1x32x32xf32>
    %325 = vector.shape_cast %324 : vector<1x1x32x32xf32> to vector<32x32xf32>
    %cst_228 = arith.constant dense<0.000000e+00> : vector<32x256xf32>
    %326 = tpu.matmul %325, %317, %cst_228 {dimension_numbers = #tpu.dot_dimension_numbers<[1], [0], [0], [1], [0, 0, 1, 1], [], []>} : vector<32x32xf32>, vector<32x256xf32>, vector<32x256xf32> -> vector<32x256xf32>
    %c1_229 = arith.constant 1 : index
    %c0_230 = arith.constant 0 : index
    %c0_231 = arith.constant 0 : index
    %c0_232 = arith.constant 0 : index
    %327 = vector.load %arg14[%c1_229, %c0_230, %c0_231, %c0_232] : memref<2x3x32x32xf32, #tpu.memory_space<vmem>>, vector<1x1x32x32xf32>
    %328 = vector.shape_cast %327 : vector<1x1x32x32xf32> to vector<32x32xf32>
    %cst_233 = arith.constant dense<0.000000e+00> : vector<32x256xf32>
    %329 = tpu.matmul %328, %320, %cst_233 {dimension_numbers = #tpu.dot_dimension_numbers<[1], [0], [0], [1], [0, 0, 1, 1], [], []>} : vector<32x32xf32>, vector<32x256xf32>, vector<32x256xf32> -> vector<32x256xf32>
    %330 = arith.addf %326, %329 : vector<32x256xf32>
    %c1_234 = arith.constant 1 : index
    %c0_235 = arith.constant 0 : index
    %c0_236 = arith.constant 0 : index
    %c0_237 = arith.constant 0 : index
    %331 = vector.load %arg16[%c1_234, %c0_235, %c0_236, %c0_237] : memref<2x3x32x32xf32, #tpu.memory_space<vmem>>, vector<1x1x32x32xf32>
    %332 = vector.shape_cast %331 : vector<1x1x32x32xf32> to vector<32x32xf32>
    %cst_238 = arith.constant dense<0.000000e+00> : vector<32x256xf32>
    %333 = tpu.matmul %332, %323, %cst_238 {dimension_numbers = #tpu.dot_dimension_numbers<[1], [0], [0], [1], [0, 0, 1, 1], [], []>} : vector<32x32xf32>, vector<32x256xf32>, vector<32x256xf32> -> vector<32x256xf32>
    %334 = arith.addf %330, %333 : vector<32x256xf32>
    %c1_239 = arith.constant 1 : index
    %c0_240 = arith.constant 0 : index
    %c0_241 = arith.constant 0 : index
    %c0_242 = arith.constant 0 : index
    %335 = vector.load %arg17[%c1_239, %c0_240, %c0_241, %c0_242] : memref<2x3x32x1xf32, #tpu.memory_space<vmem>>, vector<1x1x32x1xf32>
    %336 = vector.shape_cast %335 : vector<1x1x32x1xf32> to vector<32x1xf32>
    %337 = vector.broadcast %336 : vector<32x1xf32> to vector<32x256xf32>
    %338 = arith.addf %334, %337 : vector<32x256xf32>
    %cst_243 = arith.constant 0.000000e+00 : f32
    %339 = vector.broadcast %cst_243 : f32 to vector<32x256xf32>
    %340 = arith.maximumf %338, %339 : vector<32x256xf32>
    %c1_244 = arith.constant 1 : index
    %c0_245 = arith.constant 0 : index
    %c0_246 = arith.constant 0 : index
    %c0_247 = arith.constant 0 : index
    %341 = vector.load %arg18[%c1_244, %c0_245, %c0_246, %c0_247] : memref<2x3x32x32xf32, #tpu.memory_space<vmem>>, vector<1x1x32x32xf32>
    %342 = vector.shape_cast %341 : vector<1x1x32x32xf32> to vector<32x32xf32>
    %cst_248 = arith.constant dense<0.000000e+00> : vector<32x256xf32>
    %343 = tpu.matmul %342, %340, %cst_248 {dimension_numbers = #tpu.dot_dimension_numbers<[1], [0], [0], [1], [0, 0, 1, 1], [], []>} : vector<32x32xf32>, vector<32x256xf32>, vector<32x256xf32> -> vector<32x256xf32>
    %c1_249 = arith.constant 1 : index
    %c0_250 = arith.constant 0 : index
    %c0_251 = arith.constant 0 : index
    %c0_252 = arith.constant 0 : index
    %344 = vector.load %arg19[%c1_249, %c0_250, %c0_251, %c0_252] : memref<2x3x32x1xf32, #tpu.memory_space<vmem>>, vector<1x1x32x1xf32>
    %345 = vector.shape_cast %344 : vector<1x1x32x1xf32> to vector<32x1xf32>
    %346 = vector.broadcast %345 : vector<32x1xf32> to vector<32x256xf32>
    %347 = arith.addf %343, %346 : vector<32x256xf32>
    %348 = arith.addf %317, %347 : vector<32x256xf32>
    %349 = vector.broadcast %1 : vector<1x256xf32> to vector<32x256xf32>
    %350 = arith.mulf %348, %349 : vector<32x256xf32>
    %c2_i32_253 = arith.constant 2 : i32
    %351 = tpu.dynamic_rotate %350 by %c2_i32_253 dim 1 : vector<32x256xf32>, i32 -> vector<32x256xf32>
    %352 = vector.broadcast %26 : vector<1x256xf32> to vector<32x256xf32>
    %353 = arith.mulf %352, %351 : vector<32x256xf32>
    %c254_i32_254 = arith.constant 254 : i32
    %354 = tpu.dynamic_rotate %350 by %c254_i32_254 dim 1 : vector<32x256xf32>, i32 -> vector<32x256xf32>
    %355 = vector.broadcast %38 : vector<1x256xf32> to vector<32x256xf32>
    %356 = arith.mulf %355, %354 : vector<32x256xf32>
    %c1_255 = arith.constant 1 : index
    %c1_256 = arith.constant 1 : index
    %c0_257 = arith.constant 0 : index
    %c0_258 = arith.constant 0 : index
    %357 = vector.load %arg15[%c1_255, %c1_256, %c0_257, %c0_258] : memref<2x3x32x32xf32, #tpu.memory_space<vmem>>, vector<1x1x32x32xf32>
    %358 = vector.shape_cast %357 : vector<1x1x32x32xf32> to vector<32x32xf32>
    %cst_259 = arith.constant dense<0.000000e+00> : vector<32x256xf32>
    %359 = tpu.matmul %358, %350, %cst_259 {dimension_numbers = #tpu.dot_dimension_numbers<[1], [0], [0], [1], [0, 0, 1, 1], [], []>} : vector<32x32xf32>, vector<32x256xf32>, vector<32x256xf32> -> vector<32x256xf32>
    %c1_260 = arith.constant 1 : index
    %c1_261 = arith.constant 1 : index
    %c0_262 = arith.constant 0 : index
    %c0_263 = arith.constant 0 : index
    %360 = vector.load %arg14[%c1_260, %c1_261, %c0_262, %c0_263] : memref<2x3x32x32xf32, #tpu.memory_space<vmem>>, vector<1x1x32x32xf32>
    %361 = vector.shape_cast %360 : vector<1x1x32x32xf32> to vector<32x32xf32>
    %cst_264 = arith.constant dense<0.000000e+00> : vector<32x256xf32>
    %362 = tpu.matmul %361, %353, %cst_264 {dimension_numbers = #tpu.dot_dimension_numbers<[1], [0], [0], [1], [0, 0, 1, 1], [], []>} : vector<32x32xf32>, vector<32x256xf32>, vector<32x256xf32> -> vector<32x256xf32>
    %363 = arith.addf %359, %362 : vector<32x256xf32>
    %c1_265 = arith.constant 1 : index
    %c1_266 = arith.constant 1 : index
    %c0_267 = arith.constant 0 : index
    %c0_268 = arith.constant 0 : index
    %364 = vector.load %arg16[%c1_265, %c1_266, %c0_267, %c0_268] : memref<2x3x32x32xf32, #tpu.memory_space<vmem>>, vector<1x1x32x32xf32>
    %365 = vector.shape_cast %364 : vector<1x1x32x32xf32> to vector<32x32xf32>
    %cst_269 = arith.constant dense<0.000000e+00> : vector<32x256xf32>
    %366 = tpu.matmul %365, %356, %cst_269 {dimension_numbers = #tpu.dot_dimension_numbers<[1], [0], [0], [1], [0, 0, 1, 1], [], []>} : vector<32x32xf32>, vector<32x256xf32>, vector<32x256xf32> -> vector<32x256xf32>
    %367 = arith.addf %363, %366 : vector<32x256xf32>
    %c1_270 = arith.constant 1 : index
    %c1_271 = arith.constant 1 : index
    %c0_272 = arith.constant 0 : index
    %c0_273 = arith.constant 0 : index
    %368 = vector.load %arg17[%c1_270, %c1_271, %c0_272, %c0_273] : memref<2x3x32x1xf32, #tpu.memory_space<vmem>>, vector<1x1x32x1xf32>
    %369 = vector.shape_cast %368 : vector<1x1x32x1xf32> to vector<32x1xf32>
    %370 = vector.broadcast %369 : vector<32x1xf32> to vector<32x256xf32>
    %371 = arith.addf %367, %370 : vector<32x256xf32>
    %cst_274 = arith.constant 0.000000e+00 : f32
    %372 = vector.broadcast %cst_274 : f32 to vector<32x256xf32>
    %373 = arith.maximumf %371, %372 : vector<32x256xf32>
    %c1_275 = arith.constant 1 : index
    %c1_276 = arith.constant 1 : index
    %c0_277 = arith.constant 0 : index
    %c0_278 = arith.constant 0 : index
    %374 = vector.load %arg18[%c1_275, %c1_276, %c0_277, %c0_278] : memref<2x3x32x32xf32, #tpu.memory_space<vmem>>, vector<1x1x32x32xf32>
    %375 = vector.shape_cast %374 : vector<1x1x32x32xf32> to vector<32x32xf32>
    %cst_279 = arith.constant dense<0.000000e+00> : vector<32x256xf32>
    %376 = tpu.matmul %375, %373, %cst_279 {dimension_numbers = #tpu.dot_dimension_numbers<[1], [0], [0], [1], [0, 0, 1, 1], [], []>} : vector<32x32xf32>, vector<32x256xf32>, vector<32x256xf32> -> vector<32x256xf32>
    %c1_280 = arith.constant 1 : index
    %c1_281 = arith.constant 1 : index
    %c0_282 = arith.constant 0 : index
    %c0_283 = arith.constant 0 : index
    %377 = vector.load %arg19[%c1_280, %c1_281, %c0_282, %c0_283] : memref<2x3x32x1xf32, #tpu.memory_space<vmem>>, vector<1x1x32x1xf32>
    %378 = vector.shape_cast %377 : vector<1x1x32x1xf32> to vector<32x1xf32>
    %379 = vector.broadcast %378 : vector<32x1xf32> to vector<32x256xf32>
    %380 = arith.addf %376, %379 : vector<32x256xf32>
    %381 = arith.addf %350, %380 : vector<32x256xf32>
    %382 = vector.broadcast %1 : vector<1x256xf32> to vector<32x256xf32>
    %383 = arith.mulf %381, %382 : vector<32x256xf32>
    %c4_i32_284 = arith.constant 4 : i32
    %384 = tpu.dynamic_rotate %383 by %c4_i32_284 dim 1 : vector<32x256xf32>, i32 -> vector<32x256xf32>
    %385 = vector.broadcast %30 : vector<1x256xf32> to vector<32x256xf32>
    %386 = arith.mulf %385, %384 : vector<32x256xf32>
    %c252_i32_285 = arith.constant 252 : i32
    %387 = tpu.dynamic_rotate %383 by %c252_i32_285 dim 1 : vector<32x256xf32>, i32 -> vector<32x256xf32>
    %388 = vector.broadcast %42 : vector<1x256xf32> to vector<32x256xf32>
    %389 = arith.mulf %388, %387 : vector<32x256xf32>
    %c1_286 = arith.constant 1 : index
    %c2_287 = arith.constant 2 : index
    %c0_288 = arith.constant 0 : index
    %c0_289 = arith.constant 0 : index
    %390 = vector.load %arg15[%c1_286, %c2_287, %c0_288, %c0_289] : memref<2x3x32x32xf32, #tpu.memory_space<vmem>>, vector<1x1x32x32xf32>
    %391 = vector.shape_cast %390 : vector<1x1x32x32xf32> to vector<32x32xf32>
    %cst_290 = arith.constant dense<0.000000e+00> : vector<32x256xf32>
    %392 = tpu.matmul %391, %383, %cst_290 {dimension_numbers = #tpu.dot_dimension_numbers<[1], [0], [0], [1], [0, 0, 1, 1], [], []>} : vector<32x32xf32>, vector<32x256xf32>, vector<32x256xf32> -> vector<32x256xf32>
    %c1_291 = arith.constant 1 : index
    %c2_292 = arith.constant 2 : index
    %c0_293 = arith.constant 0 : index
    %c0_294 = arith.constant 0 : index
    %393 = vector.load %arg14[%c1_291, %c2_292, %c0_293, %c0_294] : memref<2x3x32x32xf32, #tpu.memory_space<vmem>>, vector<1x1x32x32xf32>
    %394 = vector.shape_cast %393 : vector<1x1x32x32xf32> to vector<32x32xf32>
    %cst_295 = arith.constant dense<0.000000e+00> : vector<32x256xf32>
    %395 = tpu.matmul %394, %386, %cst_295 {dimension_numbers = #tpu.dot_dimension_numbers<[1], [0], [0], [1], [0, 0, 1, 1], [], []>} : vector<32x32xf32>, vector<32x256xf32>, vector<32x256xf32> -> vector<32x256xf32>
    %396 = arith.addf %392, %395 : vector<32x256xf32>
    %c1_296 = arith.constant 1 : index
    %c2_297 = arith.constant 2 : index
    %c0_298 = arith.constant 0 : index
    %c0_299 = arith.constant 0 : index
    %397 = vector.load %arg16[%c1_296, %c2_297, %c0_298, %c0_299] : memref<2x3x32x32xf32, #tpu.memory_space<vmem>>, vector<1x1x32x32xf32>
    %398 = vector.shape_cast %397 : vector<1x1x32x32xf32> to vector<32x32xf32>
    %cst_300 = arith.constant dense<0.000000e+00> : vector<32x256xf32>
    %399 = tpu.matmul %398, %389, %cst_300 {dimension_numbers = #tpu.dot_dimension_numbers<[1], [0], [0], [1], [0, 0, 1, 1], [], []>} : vector<32x32xf32>, vector<32x256xf32>, vector<32x256xf32> -> vector<32x256xf32>
    %400 = arith.addf %396, %399 : vector<32x256xf32>
    %c1_301 = arith.constant 1 : index
    %c2_302 = arith.constant 2 : index
    %c0_303 = arith.constant 0 : index
    %c0_304 = arith.constant 0 : index
    %401 = vector.load %arg17[%c1_301, %c2_302, %c0_303, %c0_304] : memref<2x3x32x1xf32, #tpu.memory_space<vmem>>, vector<1x1x32x1xf32>
    %402 = vector.shape_cast %401 : vector<1x1x32x1xf32> to vector<32x1xf32>
    %403 = vector.broadcast %402 : vector<32x1xf32> to vector<32x256xf32>
    %404 = arith.addf %400, %403 : vector<32x256xf32>
    %cst_305 = arith.constant 0.000000e+00 : f32
    %405 = vector.broadcast %cst_305 : f32 to vector<32x256xf32>
    %406 = arith.maximumf %404, %405 : vector<32x256xf32>
    %c1_306 = arith.constant 1 : index
    %c2_307 = arith.constant 2 : index
    %c0_308 = arith.constant 0 : index
    %c0_309 = arith.constant 0 : index
    %407 = vector.load %arg18[%c1_306, %c2_307, %c0_308, %c0_309] : memref<2x3x32x32xf32, #tpu.memory_space<vmem>>, vector<1x1x32x32xf32>
    %408 = vector.shape_cast %407 : vector<1x1x32x32xf32> to vector<32x32xf32>
    %cst_310 = arith.constant dense<0.000000e+00> : vector<32x256xf32>
    %409 = tpu.matmul %408, %406, %cst_310 {dimension_numbers = #tpu.dot_dimension_numbers<[1], [0], [0], [1], [0, 0, 1, 1], [], []>} : vector<32x32xf32>, vector<32x256xf32>, vector<32x256xf32> -> vector<32x256xf32>
    %c1_311 = arith.constant 1 : index
    %c2_312 = arith.constant 2 : index
    %c0_313 = arith.constant 0 : index
    %c0_314 = arith.constant 0 : index
    %410 = vector.load %arg19[%c1_311, %c2_312, %c0_313, %c0_314] : memref<2x3x32x1xf32, #tpu.memory_space<vmem>>, vector<1x1x32x1xf32>
    %411 = vector.shape_cast %410 : vector<1x1x32x1xf32> to vector<32x1xf32>
    %412 = vector.broadcast %411 : vector<32x1xf32> to vector<32x256xf32>
    %413 = arith.addf %409, %412 : vector<32x256xf32>
    %414 = arith.addf %383, %413 : vector<32x256xf32>
    %415 = vector.broadcast %1 : vector<1x256xf32> to vector<32x256xf32>
    %416 = arith.mulf %414, %415 : vector<32x256xf32>
    %c1_315 = arith.constant 1 : index
    %c0_316 = arith.constant 0 : index
    %c0_317 = arith.constant 0 : index
    %417 = vector.load %arg20[%c1_315, %c0_316, %c0_317] : memref<2x8x32xf32, #tpu.memory_space<vmem>>, vector<1x8x32xf32>
    %418 = vector.shape_cast %417 : vector<1x8x32xf32> to vector<8x32xf32>
    %cst_318 = arith.constant dense<0.000000e+00> : vector<8x256xf32>
    %419 = tpu.matmul %418, %416, %cst_318 {dimension_numbers = #tpu.dot_dimension_numbers<[1], [0], [0], [1], [0, 0, 1, 1], [], []>} : vector<8x32xf32>, vector<32x256xf32>, vector<8x256xf32> -> vector<8x256xf32>
    %c1_319 = arith.constant 1 : index
    %c0_320 = arith.constant 0 : index
    %c0_321 = arith.constant 0 : index
    %420 = vector.load %arg21[%c1_319, %c0_320, %c0_321] : memref<2x8x1xf32, #tpu.memory_space<vmem>>, vector<1x8x1xf32>
    %421 = vector.shape_cast %420 : vector<1x8x1xf32> to vector<8x1xf32>
    %422 = vector.broadcast %421 : vector<8x1xf32> to vector<8x256xf32>
    %423 = arith.addf %419, %422 : vector<8x256xf32>
    %424 = vector.broadcast %1 : vector<1x256xf32> to vector<8x256xf32>
    %425 = arith.mulf %423, %424 : vector<8x256xf32>
    %426 = vector.extract_strided_slice %425 {offsets = [0, 0], sizes = [8, 128], strides = [1, 1]} : vector<8x256xf32> to vector<8x128xf32>
    %c2_322 = arith.constant 2 : index
    %c0_323 = arith.constant 0 : index
    %c0_324 = arith.constant 0 : index
    %c0_325 = arith.constant 0 : index
    %427 = vector.load %arg22[%c2_322, %c0_323, %c0_324, %c0_325] : memref<3x2x8x128xf32, #tpu.memory_space<vmem>>, vector<1x1x8x128xf32>
    %428 = vector.shape_cast %427 : vector<1x1x8x128xf32> to vector<8x128xf32>
    %429 = vector.shape_cast %426 : vector<8x128xf32> to vector<1x1x8x128xf32>
    tpu.vector_store %arg22[%c2_322, %c0_323, %c0_324, %c0_325], %429 {strides = array<i32>} : memref<3x2x8x128xf32, #tpu.memory_space<vmem>>, vector<1x1x8x128xf32>,
    %430 = vector.extract_strided_slice %425 {offsets = [0, 128], sizes = [8, 128], strides = [1, 1]} : vector<8x256xf32> to vector<8x128xf32>
    %c2_326 = arith.constant 2 : index
    %c1_327 = arith.constant 1 : index
    %c0_328 = arith.constant 0 : index
    %c0_329 = arith.constant 0 : index
    %431 = vector.load %arg22[%c2_326, %c1_327, %c0_328, %c0_329] : memref<3x2x8x128xf32, #tpu.memory_space<vmem>>, vector<1x1x8x128xf32>
    %432 = vector.shape_cast %431 : vector<1x1x8x128xf32> to vector<8x128xf32>
    %433 = vector.shape_cast %430 : vector<8x128xf32> to vector<1x1x8x128xf32>
    tpu.vector_store %arg22[%c2_326, %c1_327, %c0_328, %c0_329], %433 {strides = array<i32>} : memref<3x2x8x128xf32, #tpu.memory_space<vmem>>, vector<1x1x8x128xf32>,
    return
  }
}

</mosaic_0001>

<bundles_post_ra>
// kernel: multi_stage_forward.1
= control target key start
LH: loop header
LB: loop body
LE: loop exit
PB: predicated region body
PF: predicated region fallthrough
CT: control target
= control target key end

     0   :  { %s9345_s0 = inlined_call_operand.vmem [shape: f32[1,16,256], index: 0, kind: input, shape index: {}]   ;;  %s9346_s1 = inlined_call_operand.vmem [shape: f32[1,1,256], index: 1, kind: input, shape index: {}]   ;;  %s9347_s2 = inlined_call_operand.vmem [shape: f32[32,16], index: 2, kind: input, shape index: {}]   ;;  %s9348_s3 = inlined_call_operand.vmem [shape: f32[32,1], index: 3, kind: input, shape index: {}]   ;;  %s9349_s4 = inlined_call_operand.vmem [shape: f32[3,32,32], index: 4, kind: input, shape index: {}]   ;;  %s9350_s5 = inlined_call_operand.vmem [shape: f32[3,32,32], index: 5, kind: input, shape index: {}]   ;;  %s9351_s6 = inlined_call_operand.hbm [shape: f32[3,32,32], index: 6, kind: input, shape index: {}]   ;;  %s9352_s7 = inlined_call_operand.vmem [shape: f32[3,32,1], index: 7, kind: input, shape index: {}]   ;;  %s9353_s8 = inlined_call_operand.hbm [shape: f32[3,32,32], index: 8, kind: input, shape index: {}]   ;;  %s9354_s9 = inlined_call_operand.vmem [shape: f32[3,32,1], index: 9, kind: input, shape index: {}]   ;;  %s9355_s10 = inlined_call_operand.vmem [shape: f32[8,32], index: 10, kind: input, shape index: {}]   ;;  %s9356_s11 = inlined_call_operand.vmem [shape: f32[8,1], index: 11, kind: input, shape index: {}]   ;;  %s9357_s12 = inlined_call_operand.vmem [shape: f32[2,32,8], index: 12, kind: input, shape index: {}]   ;;  %s9358_s13 = inlined_call_operand.vmem [shape: f32[2,32,1], index: 13, kind: input, shape index: {}]   ;;  %s9359_s14 = inlined_call_operand.vmem [shape: f32[2,3,32,32], index: 14, kind: input, shape index: {}]   ;;  %s9360_s15 = inlined_call_operand.vmem [shape: f32[2,3,32,32], index: 15, kind: input, shape index: {}]   ;;  %s9361_s16 = inlined_call_operand.vmem [shape: f32[2,3,32,32], index: 16, kind: input, shape index: {}]   ;;  %s9362_s17 = inlined_call_operand.vmem [shape: f32[2,3,32,1], index: 17, kind: input, shape index: {}]   ;;  %s9363_s18 = inlined_call_operand.vmem [shape: f32[2,3,32,32], index: 18, kind: input, shape index: {}]   ;;  %s9364_s19 = inlined_call_operand.vmem [shape: f32[2,3,32,1], index: 19, kind: input, shape index: {}]   ;;  %s9365_s20 = inlined_call_operand.vmem [shape: f32[2,8,32], index: 20, kind: input, shape index: {}]   ;;  %s9366_s21 = inlined_call_operand.vmem [shape: f32[2,8,1], index: 21, kind: input, shape index: {}]   ;;  %s9367_s22 = inlined_call_operand.hbm [shape: f32[3,2,8,128], index: 22, kind: output, shape index: {}]  }
   0x1   :  { %9379 = sst [smem:[#allocation11_spill]] %s9345_s0 }
   0x2   :  { %9380 = sst [smem:[#allocation12_spill]] %s9346_s1 }
   0x3   :  { %9381 = sst [smem:[#allocation13_spill]] %s9347_s2 }
   0x4   :  { %9382 = sst [smem:[#allocation14_spill]] %s9348_s3 }
   0x5   :  { %9383 = sst [smem:[#allocation15_spill]] %s9349_s4 }
   0x6   :  { %9384 = sst [smem:[#allocation16_spill]] %s9350_s5 }
   0x7   :  { %9385 = sst [smem:[#allocation17_spill]] %s9351_s6 }
   0x8   :  { %9386 = sst [smem:[#allocation18_spill]] %s9367_s22 }
   0x9   :  { %27 = vsyncpa [#allocation3], 0 }
   0xa   :  { %28 = vsyncpa [#allocation6], 0 }
   0xb   :  { %29 = vsyncpa [#allocation4], 0  ;;  %s7019_s3 = smov [#allocation2]   ;;  %s9387_s4 = sld [smem:[#allocation17_spill]] }
   0xc   :  { %s47_s28 = sshll.u32 %s7019_s3, 4  ;;  %s48_s28 = int_to_ptr.vmem [resolvable:$true] %s47_s28 }
  0x11   :  { %s6947_s0 = scalar_lea.hbm %s9387_s4, 1536 }
  0x12   :  { %p6948_p0 = scmp.ne.s32.totalorder %s9387_s4, %s6947_s0  ;;  %p6951_p1 = scmp.lt.u32.totalorder %s6947_s0, %s9387_s4 }
  0x14   :  { %p6953_p2 = pnand %p6951_p1, %p6948_p0 }
  0x16   :  { %6956 = shalt.err (!%p6953_p2)
}
  0x17   :  { %s6957_s6 = scalar_lea.vmem %s48_s28, 1536  ;;  %p6962_p4 = scmp.lt.s32.totalorder %s48_s28, %s48_s28 }
  0x18   :  { %p6958_p3 = scmp.ne.s32.totalorder %s48_s28, %s6957_s6  ;;  %p6963_p5 = scmp.lt.s32.totalorder %s6957_s6, %s6957_s6 }
  0x1a   :  { %p6964_p6 = por %p6963_p5, %p6962_p4 }
  0x1c   :  { %p6965_p7 = pnand %p6964_p6, %p6958_p3 }
  0x1e   :  { %6968 = shalt.err (!%p6965_p7)
}
  0x1f   :  { %s9375_s25 = smov 128   ;;  %s9376_s26 = smov 8  }
  0x20   :  { %53 = dma.hbm_to_vmem [thread:$0]  %s9387_s4, 1536, %s48_s28, [#allocation3], %s9375_s25, %s9375_s25, %s9376_s26  }
  0x21   :  { %s7022_s3 = smov [#allocation5]   ;;  %s6969_s23 = scalar_lea.hbm %s9353_s8, 1536 }
  0x22   :  { %s61_s29 = sshll.u32 %s7022_s3, 4  ;;  %p6970_p8 = scmp.ne.s32.totalorder %s9353_s8, %s6969_s23  ;;  %s62_s29 = int_to_ptr.vmem [resolvable:$true] %s61_s29 }
  0x23   :  { %p6973_p9 = scmp.lt.u32.totalorder %s6969_s23, %s9353_s8 }
  0x25   :  { %p6975_p10 = pnand %p6973_p9, %p6970_p8 }
  0x27   :  { %6978 = shalt.err (!%p6975_p10)
}
  0x28   :  { %s6979_s22 = scalar_lea.vmem %s62_s29, 1536  ;;  %p6984_p12 = scmp.lt.s32.totalorder %s62_s29, %s62_s29 }
  0x29   :  { %p6980_p11 = scmp.ne.s32.totalorder %s62_s29, %s6979_s22  ;;  %p6985_p13 = scmp.lt.s32.totalorder %s6979_s22, %s6979_s22 }
  0x2b   :  { %p6986_p0 = por %p6985_p13, %p6984_p12 }
  0x2d   :  { %p6987_p1 = pnand %p6986_p0, %p6980_p11 }
  0x2f   :  { %6990 = shalt.err (!%p6987_p1)
}
  0x30   :  { %67 = dma.hbm_to_vmem [thread:$0]  %s9353_s8, 1536, %s62_s29, [#allocation6], %s9375_s25, %s9375_s25, %s9376_s26  }
  0x31   :  { %7013 = dma.done.wait [#allocation3], 1536  }
  0x32   :  { %7014 = vsyncadd [#allocation3], 4294965760 }
  0x33   :  { %7015 = dma.done.wait [#allocation6], 1536  }
  0x34   :  { %7016 = vsyncadd [#allocation6], 4294965760  ;;  %v7023_v0 = vmov 0.0   ;;  %v7024_v1 = vmov 0   ;;  %s9388_s27 = sld [smem:[#allocation11_spill]]  ;;  %s9389_s24 = sld [smem:[#allocation14_spill]]  ;;  %v101_v44 = vlaneseq }
  0x35   :  { %273 = vmatprep.mubr.f32.mxu0 %v7023_v0  ;;  %6929 = vset.pattern.permute.xlu0 %v7024_v1  ;;  %s9390_s2 = sld [smem:[#allocation13_spill]]  ;;  %vm196_vm0 = vcmask 130048   ;;  %s7025_s6 = smov 1   ;;  %v688_v36 = vld [vmem:[%s9352_s7] sm:$0xff]  ;;  %v689_v37 = vld [vmem:[%s9352_s7 + $0x8] sm:$0xff]  ;;  %v690_v38 = vld [vmem:[%s9352_s7 + $0x10] sm:$0xff] }
  0x36   :  { %6930 = vset.pattern.permute.xlu1 %v7024_v1  ;;  %461 = vmatprep.mubr.f32.mxu1 %v7023_v0  ;;  %s7026_s28 = smov 127   ;;  %v691_v39 = vld [vmem:[%s9352_s7 + $0x18] sm:$0xff]  ;;  %v732_v40 = vld [vmem:[%s9354_s9] sm:$0xff]  ;;  %v733_v41 = vld [vmem:[%s9354_s9 + $0x8] sm:$0xff]  ;;  %v7292_v45 = vand.u32 127, %v101_v44  ;;  %vm372_vm6 = vcmask 261120  }
  0x37   :  { %v734_v42 = vld [vmem:[%s9354_s9 + $0x10] sm:$0xff]  ;;  %v735_v43 = vld [vmem:[%s9354_s9 + $0x18] sm:$0xff]  ;;  %s9392_s22 = sld [smem:[#allocation16_spill]]  ;;  %s9393_s5 = sld [smem:[#allocation12_spill]] }
  0x38   :  { %v103_v46 = vadd.s32 128, %v7292_v45  ;;  %vm128_vm1 = vcmp.ge.s32.totalorder %v7292_v45, 1  ;;  %vm314_vm3 = vcmp.lt.s32.totalorder %v7292_v45, 1  ;;  %vm146_vm4 = vcmp.lt.s32.totalorder %v7292_v45, 127  ;;  %s7028_s4 = smov 126   ;;  %s7029_s30 = smov 4  }
  0x39   :  { %v7301_v51 = vsel %vm128_vm1, 1.0, %v7023_v0  ;;  %vm900_vm7 = vcmp.lt.s32.totalorder %v7292_v45, 2  ;;  %vm134_vm8 = vcmp.ge.s32.totalorder %v7292_v45, 2  ;;  %vm152_vm10 = vcmp.lt.s32.totalorder %v7292_v45, 126  ;;  %s9377_s8 = smov 124   ;;  %s9394_s0 = smov 124  }
  0x3a   :  { %v165_v2 = vld [vmem:[%s9388_s27 + $0x8] sm:$0xff]  ;;  %v167_v3 = vld [vmem:[%s9388_s27 + $0x18] sm:$0xff]  ;;  %v164_v4 = vld [vmem:[%s9388_s27] sm:$0xff]  ;;  %v7295_v48 = vand.u32 127, %v103_v46  ;;  %vm1480_vm12 = vcmp.lt.s32.totalorder %v7292_v45, 4  ;;  %vm140_vm13 = vcmp.ge.s32.totalorder %v7292_v45, 4 }
  0x3b   :  { %v6452_v5 = vpack.c.bf16 %v167_v3, %v165_v2  ;;  %v166_v6 = vld [vmem:[%s9388_s27 + $0x10] sm:$0xff]  ;;  %v172_v8 = vld [vmem:[%s9389_s24] sm:$0xff]  ;;  %v173_v11 = vld [vmem:[%s9389_s24 + $0x8] sm:$0xff]  ;;  %s9391_s27 = sld [smem:[#allocation15_spill]]  ;;  %vm158_vm15 = vcmp.lt.s32.totalorder %v7292_v45, 124  ;;  %vm2194_vm1 = vcmask 64512  }
  0x3c   :  { %v6454_v7 = vpack.c.bf16 %v166_v6, %v164_v4  ;;  %178 = vperm.xlu0 %6929, %v172_v8   ;;  %v174_v9 = vld [vmem:[%s9389_s24 + $0x10] sm:$0xff]  ;;  %v168_v10 = vld [vmem:[%s9390_s2] sm:$0xff]  ;;  %v175_v12 = vld [vmem:[%s9389_s24 + $0x18] sm:$0xff]  ;;  %vm129_vm2 = vcmp.ge.s32.totalorder %v7295_v48, 1  ;;  %vm147_vm5 = vcmp.lt.s32.totalorder %v7295_v48, 127  ;;  %s7027_s24 = smov 2  }
  0x3d   :  { %6453 = vmatprep.subr.bf16.mxu0 %v6452_v5  ;;  %188 = vperm.xlu1 %6930, %v174_v9   ;;  %v169_v13 = vld [vmem:[%s9390_s2 + $0x8] sm:$0xff]  ;;  %v170_v14 = vld [vmem:[%s9390_s2 + $0x10] sm:$0xff]  ;;  %v171_v15 = vld [vmem:[%s9390_s2 + $0x18] sm:$0xff]  ;;  %v7304_v52 = vsel %vm129_vm2, 1.0, %v7023_v0  ;;  %vm135_vm9 = vcmp.ge.s32.totalorder %v7295_v48, 2  ;;  %vm153_vm11 = vcmp.lt.s32.totalorder %v7295_v48, 126 }
  0x3e   :  { %6455 = vmatpush1.bf16.msra.mxu0 %v6454_v7  ;;  %vm141_vm14 = vcmp.ge.s32.totalorder %v7295_v48, 4  ;;  %s7031_s26 = smov [#allocation7]  }
  0x40   :  { %183 = vperm.xlu0 %6929, %v173_v11  }
  0x41   :  { %6131 = vmatmul.mubr.msk.f32.vlgmr.msra.gmra.mrb[0].mxu0 %vm196_vm0, %v168_v10  ;;  %193 = vperm.xlu1 %6930, %v175_v12  }
  0x42   :  { %279 = vmatprep.mubr.f32.mxu0 %v7023_v0 }
  0x45   :  { %6132 = vmatmul.mubr.msk.f32.gmra.mrb[2].mxu0 %vm196_vm0, %v169_v13 }
  0x46   :  { %285 = vmatprep.mubr.f32.mxu0 %v7023_v0 }
  0x49   :  { %6133 = vmatmul.mubr.msk.f32.gmra.mrb[4].mxu0 %vm196_vm0, %v170_v14 }
  0x4a   :  { %291 = vmatprep.mubr.f32.mxu0 %v7023_v0 }
  0x4d   :  { %6134 = vmatmul.mubr.msk.f32.gmra.mrb[6].mxu0 %vm196_vm0, %v171_v15  ;;  %vm159_vm0 = vcmp.lt.s32.totalorder %v7295_v48, 124 }
  0x4e   :  { %449 = vmatprep.mubr.f32.mxu0 %v7023_v0 }
  0xbb   :  { %v179_v16 = vpop.permute.xlu0 %178 }
  0xbc   :  { %v189_v25 = vpop.permute.xlu1 %188 }
  0xbf   :  { %v184_v20 = vpop.permute.xlu0 %183 }
  0xc0   :  { %v194_v30 = vpop.permute.xlu1 %193 }
 0x114   :  { %v275_v17 = vpop.f32.mrb[0].mxu0 }
 0x115   :  { %v7219_v18 = vadd.f32 %v275_v17, %v179_v16  ;;  %v277_v19 = vpop.f32.mrb[1].mxu0 }
 0x116   :  { %v7223_v22 = vadd.f32 %v277_v19, %v179_v16 }
 0x117   :  { %298 = vrot.lane.b32.xlu0 %v7219_v18, %s7025_s6 }
 0x118   :  { %v281_v21 = vpop.f32.mrb[2].mxu0 }
 0x119   :  { %v7225_v23 = vadd.f32 %v281_v21, %v184_v20  ;;  %v283_v24 = vpop.f32.mrb[3].mxu0  ;;  %v368_v21 = vld [vmem:[%s9391_s27] sm:$0xff] }
 0x11a   :  { %v7231_v27 = vadd.f32 %v283_v24, %v184_v20  ;;  %v370_v20 = vld [vmem:[%s9391_s27 + $0x10] sm:$0xff] }
 0x11b   :  { %300 = vrot.lane.b32.xlu1 %v7225_v23, %s7025_s6  ;;  %306 = vrot.lane.b32.xlu0 %v7223_v22, %s7025_s6 }
 0x11c   :  { %v287_v26 = vpop.f32.mrb[4].mxu0  ;;  %v6464_v19 = vpack.c.bf16 %v7231_v27, %v7223_v22 }
 0x11d   :  { %v7233_v28 = vadd.f32 %v287_v26, %v189_v25  ;;  %v289_v29 = vpop.f32.mrb[5].mxu0  ;;  %v7341_v26 = vsel %vm147_vm5, 1.0, %v7023_v0 }
 0x11e   :  { %v7239_v32 = vadd.f32 %v289_v29, %v189_v25 }
 0x11f   :  { %308 = vrot.lane.b32.xlu1 %v7231_v27, %s7025_s6  ;;  %302 = vrot.lane.b32.xlu0 %v7233_v28, %s7025_s6 }
 0x120   :  { %v293_v31 = vpop.f32.mrb[6].mxu0 }
 0x121   :  { %v7241_v33 = vadd.f32 %v293_v31, %v194_v30  ;;  %v295_v34 = vpop.f32.mrb[7].mxu0  ;;  %v6466_v31 = vpack.c.bf16 %v7225_v23, %v7219_v18 }
 0x122   :  { %v7247_v35 = vadd.f32 %v295_v34, %v194_v30 }
 0x123   :  { %304 = vrot.lane.b32.xlu1 %v7241_v33, %s7025_s6  ;;  %310 = vrot.lane.b32.xlu0 %v7239_v32, %s7025_s6 }
 0x127   :  { %312 = vrot.lane.b32.xlu1 %v7247_v35, %s7025_s6  ;;  %331 = vrot.lane.b32.xlu0 %v7219_v18, %s7026_s28 }
 0x12b   :  { %333 = vrot.lane.b32.xlu1 %v7225_v23, %s7026_s28  ;;  %339 = vrot.lane.b32.xlu0 %v7223_v22, %s7026_s28 }
 0x12f   :  { %341 = vrot.lane.b32.xlu1 %v7231_v27, %s7026_s28  ;;  %335 = vrot.lane.b32.xlu0 %v7233_v28, %s7026_s28 }
 0x133   :  { %337 = vrot.lane.b32.xlu1 %v7241_v33, %s7026_s28  ;;  %343 = vrot.lane.b32.xlu0 %v7239_v32, %s7026_s28 }
 0x137   :  { %345 = vrot.lane.b32.xlu1 %v7247_v35, %s7026_s28  ;;  %694 = vperm.xlu0 %6929, %v688_v36  }
 0x13b   :  { %699 = vperm.xlu1 %6930, %v689_v37   ;;  %704 = vperm.xlu0 %6929, %v690_v38   ;;  %v6468_v37 = vpack.c.bf16 %v7247_v35, %v7239_v32  ;;  %v371_v38 = vld [vmem:[%s9391_s27 + $0x18] sm:$0xff] }
 0x13f   :  { %709 = vperm.xlu1 %6930, %v691_v39   ;;  %738 = vperm.xlu0 %6929, %v732_v40   ;;  %v369_v39 = vld [vmem:[%s9391_s27 + $0x8] sm:$0xff]  ;;  %v7366_v40 = vsel %vm146_vm4, 1.0, %v7023_v0 }
 0x143   :  { %743 = vperm.xlu1 %6930, %v733_v41   ;;  %748 = vperm.xlu0 %6929, %v734_v42  }
 0x147   :  { %753 = vperm.xlu1 %6930, %v735_v43  }
 0x189   :  { %v299_v47 = vpop.permute.xlu0 %298 }
 0x18d   :  { %v301_v49 = vpop.permute.xlu1 %300  ;;  %v307_v50 = vpop.permute.xlu0 %306 }
 0x18e   :  { %v315_v53 = vsel %vm314_vm3, %v299_v47, %v307_v50  ;;  %v319_v54 = vsel %vm314_vm3, %v307_v50, %v299_v47 }
 0x18f   :  { %v323_v59 = vmul.f32 %v7301_v51, %v319_v54  ;;  %v324_v60 = vmul.f32 %v7304_v52, %v315_v53 }
 0x191   :  { %v309_v55 = vpop.permute.xlu1 %308  ;;  %v303_v56 = vpop.permute.xlu0 %302 }
 0x192   :  { %v316_v57 = vsel %vm314_vm3, %v301_v49, %v309_v55  ;;  %v320_v58 = vsel %vm314_vm3, %v309_v55, %v301_v49  ;;  %v6470_v49 = vpack.c.bf16 %v7241_v33, %v7233_v28 }
 0x193   :  { %v325_v61 = vmul.f32 %v7301_v51, %v320_v58  ;;  %v326_v62 = vmul.f32 %v7304_v52, %v316_v57 }
 0x195   :  { %v6458_v63 = vpack.c.bf16 %v325_v61, %v323_v59  ;;  %v305_v1 = vpop.permute.xlu1 %304  ;;  %v311_v2 = vpop.permute.xlu0 %310  ;;  %v6456_v3 = vpack.c.bf16 %v326_v62, %v324_v60 }
 0x196   :  { %v317_v4 = vsel %vm314_vm3, %v303_v56, %v311_v2  ;;  %v321_v5 = vsel %vm314_vm3, %v311_v2, %v303_v56  ;;  %v364_v56 = vld [vmem:[%s9392_s22] sm:$0xff]  ;;  %v365_v2 = vld [vmem:[%s9392_s22 + $0x8] sm:$0xff] }
 0x197   :  { %6457 = vmatprep.subr.bf16.mxu0 %v6456_v3  ;;  %6768 = vmatprep.subr.bf16.mxu1 %v6456_v3  ;;  %v327_v10 = vmul.f32 %v7301_v51, %v321_v5  ;;  %v328_v11 = vmul.f32 %v7304_v52, %v317_v4  ;;  %v366_v5 = vld [vmem:[%s9392_s22 + $0x10] sm:$0xff] }
 0x198   :  { %6459 = vmatpush1.bf16.msra.mxu0 %v6458_v63  ;;  %6770 = vmatpush1.bf16.msra.mxu1 %v6458_v63 }
 0x199   :  { %v313_v6 = vpop.permute.xlu1 %312  ;;  %v332_v7 = vpop.permute.xlu0 %331 }
 0x19a   :  { %v318_v8 = vsel %vm314_vm3, %v305_v1, %v313_v6  ;;  %v322_v9 = vsel %vm314_vm3, %v313_v6, %v305_v1  ;;  %v367_v6 = vld [vmem:[%s9392_s22 + $0x18] sm:$0xff] }
 0x19b   :  { %v329_v12 = vmul.f32 %v7301_v51, %v322_v9  ;;  %v330_v13 = vmul.f32 %v7304_v52, %v318_v8  ;;  %v576_v8 = vld [vmem:[#allocation2 + $0x8] sm:$0xff]  ;;  %v577_v9 = vld [vmem:[#allocation2 + $0x10] sm:$0xff] }
 0x19d   :  { %v6462_v14 = vpack.c.bf16 %v329_v12, %v327_v10  ;;  %v334_v15 = vpop.permute.xlu1 %333  ;;  %v340_v16 = vpop.permute.xlu0 %339  ;;  %v6460_v17 = vpack.c.bf16 %v330_v13, %v328_v11  ;;  %v578_v10 = vld [vmem:[#allocation2 + $0x18] sm:$0xff] }
 0x19e   :  { %v352_v29 = vsel %vm146_vm4, %v340_v16, %v332_v7  ;;  %v348_v41 = vsel %vm146_vm4, %v332_v7, %v340_v16  ;;  %v575_v7 = vld [vmem:[#allocation2] sm:$0xff] }
 0x19f   :  { %6461 = vmatprep.subr.bf16.mxu0 %v6460_v17  ;;  %6769 = vmatprep.subr.bf16.mxu1 %v6460_v17  ;;  %v357_v42 = vmul.f32 %v7341_v26, %v352_v29  ;;  %v356_v53 = vmul.f32 %v7366_v40, %v348_v41 }
 0x1a0   :  { %6463 = vmatpush1.bf16.msra.mxu0 %v6462_v14  ;;  %6771 = vmatpush1.bf16.msra.mxu1 %v6462_v14 }
 0x1a1   :  { %v342_v24 = vpop.permute.xlu1 %341  ;;  %6465 = vmatprep.subr.bf16.mxu1 %v6464_v19  ;;  %v336_v25 = vpop.permute.xlu0 %335 }
 0x1a2   :  { %v353_v30 = vsel %vm146_vm4, %v342_v24, %v334_v15  ;;  %v349_v34 = vsel %vm146_vm4, %v334_v15, %v342_v24 }
 0x1a3   :  { %v359_v36 = vmul.f32 %v7341_v26, %v353_v30  ;;  %6137 = vmatmul.mubr.msk.f32.vlgmr.msra.gmra.mrb[0].mxu1 %vm372_vm6, %v370_v20  ;;  %6135 = vmatmul.mubr.msk.f32.vlgmr.msra.gmra.mrb[8].mxu0 %vm372_vm6, %v368_v21  ;;  %v358_v47 = vmul.f32 %v7366_v40, %v349_v34 }
 0x1a4   :  { %6467 = vmatpush1.bf16.msra.mxu1 %v6466_v31  ;;  %467 = vmatprep.mubr.f32.mxu1 %v7023_v0 }
 0x1a5   :  { %v338_v43 = vpop.permute.xlu1 %337  ;;  %v344_v46 = vpop.permute.xlu0 %343  ;;  %6469 = vmatprep.subr.bf16.mxu1 %v6468_v37  ;;  %455 = vmatprep.mubr.f32.mxu0 %v7023_v0  ;;  %v6472_v50 = vpack.c.bf16 %v359_v36, %v357_v42  ;;  %v6474_v58 = vpack.c.bf16 %v358_v47, %v356_v53 }
 0x1a6   :  { %v350_v54 = vsel %vm146_vm4, %v336_v25, %v344_v46  ;;  %v354_v55 = vsel %vm146_vm4, %v344_v46, %v336_v25 }
 0x1a7   :  { %6138 = vmatmul.mubr.msk.f32.gmra.mrb[2].mxu1 %vm372_vm6, %v371_v38  ;;  %6136 = vmatmul.mubr.msk.f32.gmra.mrb[10].mxu0 %vm372_vm6, %v369_v39  ;;  %v360_v61 = vmul.f32 %v7366_v40, %v350_v54  ;;  %v361_v62 = vmul.f32 %v7341_v26, %v354_v55 }
 0x1a8   :  { %6471 = vmatpush1.bf16.msra.mxu1 %v6470_v49  ;;  %550 = vmatprep.mubr.f32.mxu1 %v7023_v0 }
 0x1a9   :  { %v346_v57 = vpop.permute.xlu1 %345  ;;  %6473 = vmatprep.subr.bf16.mxu1 %v6472_v50  ;;  %832 = vmatprep.mubr.f32.mxu0 %v7023_v0 }
 0x1aa   :  { %v351_v59 = vsel %vm146_vm4, %v338_v43, %v346_v57  ;;  %v355_v60 = vsel %vm146_vm4, %v346_v57, %v338_v43 }
 0x1ab   :  { %v362_v63 = vmul.f32 %v7366_v40, %v351_v59  ;;  %v363_v1 = vmul.f32 %v7341_v26, %v355_v60  ;;  %6139 = vmatmul.mubr.msk.f32.vlgmr.msra.gmra.mrb[4].mxu1 %vm372_vm6, %v364_v56 }
 0x1ac   :  { %6475 = vmatpush1.bf16.msra.mxu1 %v6474_v58  ;;  %556 = vmatprep.mubr.f32.mxu1 %v7023_v0 }
 0x1ad   :  { %v6478_v3 = vpack.c.bf16 %v362_v63, %v360_v61  ;;  %v6476_v4 = vpack.c.bf16 %v363_v1, %v361_v62 }
 0x1af   :  { %6140 = vmatmul.mubr.msk.f32.gmra.mrb[6].mxu1 %vm372_vm6, %v365_v2  ;;  %6477 = vmatprep.subr.bf16.mxu1 %v6476_v4  ;;  %v729_v4 = vld [vmem:[#allocation5 + $0x8] sm:$0xff] }
 0x1b0   :  { %6479 = vmatpush1.bf16.msra.mxu1 %v6478_v3  ;;  %562 = vmatprep.mubr.f32.mxu1 %v7023_v0  ;;  %v728_v3 = vld [vmem:[#allocation5] sm:$0xff] }
 0x1b3   :  { %6141 = vmatmul.mubr.msk.f32.gmra.mrb[0].mxu1 %vm372_vm6, %v366_v5  ;;  %v730_v5 = vld [vmem:[#allocation5 + $0x10] sm:$0xff] }
 0x1b4   :  { %568 = vmatprep.mubr.f32.mxu1 %v7023_v0 }
 0x1b6   :  { %v695_v20 = vpop.permute.xlu0 %694 }
 0x1b7   :  { %6142 = vmatmul.mubr.msk.f32.gmra.mrb[2].mxu1 %vm372_vm6, %v367_v6  ;;  %v731_v6 = vld [vmem:[#allocation5 + $0x18] sm:$0xff] }
 0x1b8   :  { %655 = vmatprep.mubr.f32.mxu1 %v7023_v0 }
 0x1ba   :  { %v700_v30 = vpop.permute.xlu1 %699  ;;  %v705_v43 = vpop.permute.xlu0 %704 }
 0x1bb   :  { %6143 = vmatmul.mubr.msk.f32.vlgmr.msra.gmra.mrb[4].mxu1 %vm372_vm6, %v575_v7  ;;  %v867_v7 = vshrl.u32 %v101_v44, 7 }
 0x1bc   :  { %661 = vmatprep.mubr.f32.mxu1 %v7023_v0 }
 0x1be   :  { %v710_v53 = vpop.permute.xlu1 %709 }
 0x1bf   :  { %6144 = vmatmul.mubr.msk.f32.gmra.mrb[6].mxu1 %vm372_vm6, %v576_v8  ;;  %v868_v8 = vsub.s32 0, %v867_v7 }
 0x1c0   :  { %667 = vmatprep.mubr.f32.mxu1 %v7023_v0 }
 0x1c3   :  { %6145 = vmatmul.mubr.msk.f32.gmra.mrb[0].mxu1 %vm372_vm6, %v577_v9  ;;  %v100_v9 = vld [vmem:[%s9393_s5] sm:$0x3] }
 0x1c4   :  { %673 = vmatprep.mubr.f32.mxu1 %v7023_v0 }
 0x1c7   :  { %6146 = vmatmul.mubr.msk.f32.gmra.mrb[2].mxu1 %vm372_vm6, %v578_v10  ;;  %v739_v10 = vpop.permute.xlu0 %738 }
 0x1c8   :  { %1423 = vmatprep.mubr.f32.mxu1 %v7023_v0 }
 0x276   :  { %v451_v11 = vpop.f32.mrb[8].mxu0 }
 0x277   :  { %v453_v12 = vpop.f32.mrb[9].mxu0 }
 0x27a   :  { %v457_v13 = vpop.f32.mrb[10].mxu0 }
 0x27b   :  { %v459_v14 = vpop.f32.mrb[11].mxu0 }
 0x28e   :  { %v657_v15 = vpop.f32.mrb[4].mxu1 }
 0x28f   :  { %v6772_v16 = vadd.f32 %v657_v15, %v451_v11  ;;  %v659_v17 = vpop.f32.mrb[5].mxu1 }
 0x290   :  { %v6773_v19 = vadd.f32 %v659_v17, %v453_v12  ;;  %v872_v12 = vsub.s32 1, %v867_v7 }
 0x291   :  { %v712_v24 = vadd.f32 %v6772_v16, %v695_v20 }
 0x292   :  { %v663_v21 = vpop.f32.mrb[6].mxu1  ;;  %v713_v31 = vadd.f32 %v6773_v19, %v695_v20  ;;  %v744_v19 = vpop.permute.xlu1 %743 }
 0x293   :  { %v6774_v25 = vadd.f32 %v663_v21, %v457_v13  ;;  %v665_v29 = vpop.f32.mrb[7].mxu1  ;;  %v720_v39 = vmax.f32 %v712_v24, 0.0  ;;  %v7432_v13 = vrot.slane %v100_v9, %v868_v8  ;;  %v7435_v21 = vrot.slane %v100_v9, %v872_v12 }
 0x294   :  { %v6775_v34 = vadd.f32 %v665_v29, %v459_v14  ;;  %v721_v46 = vmax.f32 %v713_v31, 0.0 }
 0x295   :  { %v714_v36 = vadd.f32 %v6774_v25, %v700_v30 }
 0x296   :  { %v715_v37 = vadd.f32 %v6775_v34, %v700_v30  ;;  %v669_v38 = vpop.f32.mrb[0].mxu1  ;;  %v749_v34 = vpop.permute.xlu0 %748 }
 0x297   :  { %v722_v41 = vmax.f32 %v714_v36, 0.0  ;;  %v671_v42 = vpop.f32.mrb[1].mxu1  ;;  %v716_v50 = vadd.f32 %v705_v43, %v669_v38 }
 0x298   :  { %v723_v47 = vmax.f32 %v715_v37, 0.0  ;;  %v717_v54 = vadd.f32 %v705_v43, %v671_v42 }
 0x299   :  { %v6482_v49 = vpack.c.bf16 %v722_v41, %v720_v39  ;;  %v724_v60 = vmax.f32 %v716_v50, 0.0 }
 0x29a   :  { %v675_v55 = vpop.f32.mrb[2].mxu1  ;;  %v6480_v56 = vpack.c.bf16 %v723_v47, %v721_v46  ;;  %v725_v62 = vmax.f32 %v717_v54, 0.0 }
 0x29b   :  { %v718_v57 = vadd.f32 %v710_v53, %v675_v55  ;;  %v677_v58 = vpop.f32.mrb[3].mxu1 }
 0x29c   :  { %v719_v59 = vadd.f32 %v710_v53, %v677_v58  ;;  %6481 = vmatprep.subr.bf16.mxu0 %v6480_v56  ;;  %v6174_v58 = vld [vmem:[%s9352_s7 + $0x38] sm:$0xff] }
 0x29d   :  { %v726_v61 = vmax.f32 %v718_v57, 0.0  ;;  %6483 = vmatpush1.bf16.msra.mxu0 %v6482_v49  ;;  %v6173_v57 = vld [vmem:[%s9352_s7 + $0x30] sm:$0xff] }
 0x29e   :  { %v727_v63 = vmax.f32 %v719_v59, 0.0  ;;  %v6175_v59 = vld [vmem:[%s9354_s9 + $0x20] sm:$0xff] }
 0x29f   :  { %v6486_v1 = vpack.c.bf16 %v726_v61, %v724_v60  ;;  %v6176_v60 = vld [vmem:[%s9354_s9 + $0x28] sm:$0xff]  ;;  %v6177_v61 = vld [vmem:[%s9354_s9 + $0x30] sm:$0xff] }
 0x2a0   :  { %v6484_v2 = vpack.c.bf16 %v727_v63, %v725_v62  ;;  %v6178_v62 = vld [vmem:[%s9354_s9 + $0x38] sm:$0xff] }
 0x2a2   :  { %6485 = vmatprep.subr.bf16.mxu0 %v6484_v2 }
 0x2a3   :  { %6487 = vmatpush1.bf16.msra.mxu0 %v6486_v1 }
 0x2a6   :  { %6147 = vmatmul.mubr.msk.f32.vlgmr.msra.gmra.mrb[12].mxu0 %vm372_vm6, %v728_v3  ;;  %v7528_v3 = vsel %vm134_vm8, 1.0, %v7023_v0 }
 0x2a7   :  { %838 = vmatprep.mubr.f32.mxu0 %v7023_v0 }
 0x2aa   :  { %6148 = vmatmul.mubr.msk.f32.gmra.mrb[14].mxu0 %vm372_vm6, %v729_v4  ;;  %v7531_v4 = vsel %vm135_vm9, 1.0, %v7023_v0 }
 0x2ab   :  { %844 = vmatprep.mubr.f32.mxu0 %v7023_v0 }
 0x2ae   :  { %6149 = vmatmul.mubr.msk.f32.gmra.mrb[16].mxu0 %vm372_vm6, %v730_v5 }
 0x2af   :  { %850 = vmatprep.mubr.f32.mxu0 %v7023_v0 }
 0x2b2   :  { %6150 = vmatmul.mubr.msk.f32.gmra.mrb[18].mxu0 %vm372_vm6, %v731_v6 }
 0x2b3   :  { %1036 = vmatprep.mubr.f32.mxu0 %v7023_v0 }
 0x379   :  { %v834_v11 = vpop.f32.mrb[12].mxu0 }
 0x37a   :  { %v835_v14 = vadd.f32 %v834_v11, %v739_v10  ;;  %v836_v15 = vpop.f32.mrb[13].mxu0 }
 0x37b   :  { %v837_v16 = vadd.f32 %v836_v15, %v739_v10 }
 0x37c   :  { %v857_v17 = vadd.f32 %v835_v14, %v7219_v18 }
 0x37d   :  { %v840_v20 = vpop.f32.mrb[14].mxu0  ;;  %v858_v24 = vadd.f32 %v837_v16, %v7223_v22 }
 0x37e   :  { %v7438_v44 = vmul.f32 %v7432_v13, %v857_v17  ;;  %v841_v25 = vadd.f32 %v840_v20, %v744_v19  ;;  %v842_v29 = vpop.f32.mrb[15].mxu0 }
 0x37f   :  { %v843_v30 = vadd.f32 %v842_v29, %v744_v19  ;;  %v7445_v36 = vmul.f32 %v7435_v21, %v858_v24 }
 0x380   :  { %v859_v31 = vadd.f32 %v841_v25, %v7225_v23  ;;  %884 = vrot.lane.b32.xlu0 %v7438_v44, %s7027_s24  ;;  %v754_v23 = vpop.permute.xlu1 %753 }
 0x381   :  { %v846_v18 = vpop.f32.mrb[16].mxu0  ;;  %v860_v38 = vadd.f32 %v843_v30, %v7231_v27 }
 0x382   :  { %v7448_v37 = vmul.f32 %v7432_v13, %v859_v31  ;;  %v847_v22 = vadd.f32 %v846_v18, %v749_v34  ;;  %v848_v39 = vpop.f32.mrb[17].mxu0 }
 0x383   :  { %v849_v41 = vadd.f32 %v848_v39, %v749_v34  ;;  %v7457_v46 = vmul.f32 %v7435_v21, %v860_v38 }
 0x384   :  { %v861_v42 = vadd.f32 %v847_v22, %v7233_v28  ;;  %886 = vrot.lane.b32.xlu1 %v7448_v37, %s7027_s24  ;;  %892 = vrot.lane.b32.xlu0 %v7445_v36, %s7027_s24 }
 0x385   :  { %v852_v43 = vpop.f32.mrb[18].mxu0  ;;  %v862_v27 = vadd.f32 %v849_v41, %v7239_v32 }
 0x386   :  { %v7460_v47 = vmul.f32 %v7432_v13, %v861_v42  ;;  %v853_v49 = vadd.f32 %v852_v43, %v754_v23  ;;  %v854_v50 = vpop.f32.mrb[19].mxu0 }
 0x387   :  { %v855_v53 = vadd.f32 %v854_v50, %v754_v23  ;;  %v7469_v54 = vmul.f32 %v7435_v21, %v862_v27  ;;  %v6496_v27 = vpack.c.bf16 %v7457_v46, %v7445_v36 }
 0x388   :  { %v863_v28 = vadd.f32 %v853_v49, %v7241_v33  ;;  %894 = vrot.lane.b32.xlu1 %v7457_v46, %s7027_s24  ;;  %888 = vrot.lane.b32.xlu0 %v7460_v47, %s7027_s24  ;;  %v6171_v33 = vld [vmem:[%s9352_s7 + $0x20] sm:$0xff] }
 0x389   :  { %v864_v56 = vadd.f32 %v855_v53, %v7247_v35  ;;  %v6172_v35 = vld [vmem:[%s9352_s7 + $0x28] sm:$0xff]  ;;  %v6155_v49 = vld [vmem:[%s9391_s27 + $0x20] sm:$0xff]  ;;  %v7565_v53 = vsel %vm153_vm11, 1.0, %v7023_v0 }
 0x38a   :  { %v7472_v55 = vmul.f32 %v7432_v13, %v863_v28 }
 0x38b   :  { %v7480_v32 = vmul.f32 %v7435_v21, %v864_v56 }
 0x38c   :  { %890 = vrot.lane.b32.xlu1 %v7472_v55, %s7027_s24  ;;  %896 = vrot.lane.b32.xlu0 %v7469_v54, %s7027_s24 }
 0x390   :  { %898 = vrot.lane.b32.xlu1 %v7480_v32, %s7027_s24  ;;  %917 = vrot.lane.b32.xlu0 %v7438_v44, %s7028_s4 }
 0x394   :  { %919 = vrot.lane.b32.xlu1 %v7448_v37, %s7028_s4  ;;  %925 = vrot.lane.b32.xlu0 %v7445_v36, %s7028_s4 }
 0x398   :  { %927 = vrot.lane.b32.xlu1 %v7457_v46, %s7028_s4  ;;  %921 = vrot.lane.b32.xlu0 %v7460_v47, %s7028_s4 }
 0x39c   :  { %923 = vrot.lane.b32.xlu1 %v7472_v55, %s7028_s4  ;;  %929 = vrot.lane.b32.xlu0 %v7469_v54, %s7028_s4 }
 0x3a0   :  { %931 = vrot.lane.b32.xlu1 %v7480_v32, %s7028_s4  ;;  %1283 = vperm.xlu0 %6929, %v6171_v33   ;;  %v6498_v33 = vpack.c.bf16 %v7448_v37, %v7438_v44 }
 0x3a4   :  { %1288 = vperm.xlu1 %6930, %v6172_v35   ;;  %1293 = vperm.xlu0 %6929, %v6173_v57   ;;  %v6500_v57 = vpack.c.bf16 %v7480_v32, %v7469_v54 }
 0x3a8   :  { %1298 = vperm.xlu1 %6930, %v6174_v58   ;;  %1329 = vperm.xlu0 %6929, %v6175_v59   ;;  %v6156_v58 = vld [vmem:[%s9391_s27 + $0x28] sm:$0xff] }
 0x3ac   :  { %1334 = vperm.xlu1 %6930, %v6176_v60   ;;  %1339 = vperm.xlu0 %6929, %v6177_v61  }
 0x3b0   :  { %1344 = vperm.xlu1 %6930, %v6178_v62   ;;  %v6502_v62 = vpack.c.bf16 %v7472_v55, %v7460_v47 }
 0x3f2   :  { %v885_v63 = vpop.permute.xlu0 %884 }
 0x3f6   :  { %v887_v1 = vpop.permute.xlu1 %886  ;;  %v893_v2 = vpop.permute.xlu0 %892 }
 0x3f7   :  { %v901_v5 = vsel %vm900_vm7, %v885_v63, %v893_v2  ;;  %v905_v6 = vsel %vm900_vm7, %v893_v2, %v885_v63 }
 0x3f8   :  { %v909_v11 = vmul.f32 %v7528_v3, %v905_v6  ;;  %v910_v12 = vmul.f32 %v7531_v4, %v901_v5 }
 0x3fa   :  { %v895_v7 = vpop.permute.xlu1 %894  ;;  %v889_v8 = vpop.permute.xlu0 %888 }
 0x3fb   :  { %v902_v9 = vsel %vm900_vm7, %v887_v1, %v895_v7  ;;  %v906_v10 = vsel %vm900_vm7, %v895_v7, %v887_v1  ;;  %v6157_v1 = vld [vmem:[%s9391_s27 + $0x30] sm:$0xff] }
 0x3fc   :  { %v911_v14 = vmul.f32 %v7528_v3, %v906_v10  ;;  %v912_v15 = vmul.f32 %v7531_v4, %v902_v9  ;;  %v7601_v9 = vsel %vm152_vm10, 1.0, %v7023_v0 }
 0x3fe   :  { %v6490_v16 = vpack.c.bf16 %v911_v14, %v909_v11  ;;  %v891_v17 = vpop.permute.xlu1 %890  ;;  %v897_v19 = vpop.permute.xlu0 %896  ;;  %v6488_v20 = vpack.c.bf16 %v912_v15, %v910_v12 }
 0x3ff   :  { %v903_v24 = vsel %vm900_vm7, %v889_v8, %v897_v19  ;;  %v907_v25 = vsel %vm900_vm7, %v897_v19, %v889_v8  ;;  %v6158_v8 = vld [vmem:[%s9391_s27 + $0x38] sm:$0xff] }
 0x400   :  { %6489 = vmatprep.subr.bf16.mxu0 %v6488_v20  ;;  %v913_v18 = vmul.f32 %v7528_v3, %v907_v25  ;;  %v914_v38 = vmul.f32 %v7531_v4, %v903_v24 }
 0x401   :  { %6491 = vmatpush1.bf16.msra.mxu0 %v6490_v16 }
 0x402   :  { %v899_v29 = vpop.permute.xlu1 %898  ;;  %v918_v30 = vpop.permute.xlu0 %917 }
 0x403   :  { %v904_v31 = vsel %vm900_vm7, %v891_v17, %v899_v29  ;;  %v908_v34 = vsel %vm900_vm7, %v899_v29, %v891_v17  ;;  %v6151_v17 = vld [vmem:[%s9392_s22 + $0x20] sm:$0xff] }
 0x404   :  { %v915_v22 = vmul.f32 %v7528_v3, %v908_v34  ;;  %v916_v39 = vmul.f32 %v7531_v4, %v904_v31  ;;  %v6152_v31 = vld [vmem:[%s9392_s22 + $0x28] sm:$0xff] }
 0x406   :  { %v6494_v41 = vpack.c.bf16 %v915_v22, %v913_v18  ;;  %v920_v42 = vpop.permute.xlu1 %919  ;;  %v6492_v23 = vpack.c.bf16 %v916_v39, %v914_v38  ;;  %v926_v43 = vpop.permute.xlu0 %925  ;;  %v6153_v18 = vld [vmem:[%s9392_s22 + $0x30] sm:$0xff]  ;;  %v6154_v38 = vld [vmem:[%s9392_s22 + $0x38] sm:$0xff]  ;;  %v1163_v22 = vld [vmem:[#allocation2 + $0x20] sm:$0xff] }
 0x407   :  { %v938_v28 = vsel %vm152_vm10, %v926_v43, %v918_v30  ;;  %v934_v10 = vsel %vm152_vm10, %v918_v30, %v926_v43  ;;  %v1164_v39 = vld [vmem:[#allocation2 + $0x28] sm:$0xff] }
 0x408   :  { %6493 = vmatprep.subr.bf16.mxu0 %v6492_v23  ;;  %v943_v59 = vmul.f32 %v7565_v53, %v938_v28  ;;  %v942_v16 = vmul.f32 %v7601_v9, %v934_v10 }
 0x409   :  { %6495 = vmatpush1.bf16.msra.mxu0 %v6494_v41  ;;  %v1165_v41 = vld [vmem:[#allocation2 + $0x30] sm:$0xff] }
 0x40a   :  { %v928_v50 = vpop.permute.xlu1 %927  ;;  %6497 = vmatprep.subr.bf16.mxu0 %v6496_v27  ;;  %v922_v60 = vpop.permute.xlu0 %921 }
 0x40b   :  { %v939_v56 = vsel %vm152_vm10, %v928_v50, %v920_v42  ;;  %v935_v5 = vsel %vm152_vm10, %v920_v42, %v928_v50  ;;  %v1166_v42 = vld [vmem:[#allocation2 + $0x38] sm:$0xff] }
 0x40c   :  { %v945_v35 = vmul.f32 %v7565_v53, %v939_v56  ;;  %6159 = vmatmul.mubr.msk.f32.vlgmr.msra.gmra.mrb[20].mxu0 %vm372_vm6, %v6155_v49  ;;  %v944_v11 = vmul.f32 %v7601_v9, %v935_v5 }
 0x40d   :  { %6499 = vmatpush1.bf16.msra.mxu0 %v6498_v33  ;;  %1042 = vmatprep.mubr.f32.mxu0 %v7023_v0 }
 0x40e   :  { %v924_v61 = vpop.permute.xlu1 %923  ;;  %6501 = vmatprep.subr.bf16.mxu0 %v6500_v57  ;;  %v6504_v63 = vpack.c.bf16 %v945_v35, %v943_v59  ;;  %v930_v6 = vpop.permute.xlu0 %929  ;;  %v6506_v24 = vpack.c.bf16 %v944_v11, %v942_v16 }
 0x40f   :  { %v940_v12 = vsel %vm152_vm10, %v930_v6, %v922_v60  ;;  %v936_v19 = vsel %vm152_vm10, %v922_v60, %v930_v6 }
 0x410   :  { %6160 = vmatmul.mubr.msk.f32.gmra.mrb[22].mxu0 %vm372_vm6, %v6156_v58  ;;  %v947_v20 = vmul.f32 %v7565_v53, %v940_v12  ;;  %v946_v30 = vmul.f32 %v7601_v9, %v936_v19 }
 0x411   :  { %6503 = vmatpush1.bf16.msra.mxu0 %v6502_v62  ;;  %1048 = vmatprep.mubr.f32.mxu0 %v7023_v0 }
 0x412   :  { %v932_v2 = vpop.permute.xlu1 %931  ;;  %6505 = vmatprep.subr.bf16.mxu0 %v6504_v63 }
 0x413   :  { %v941_v7 = vsel %vm152_vm10, %v932_v2, %v924_v61  ;;  %v937_v14 = vsel %vm152_vm10, %v924_v61, %v932_v2 }
 0x414   :  { %6161 = vmatmul.mubr.msk.f32.gmra.mrb[24].mxu0 %vm372_vm6, %v6157_v1  ;;  %v949_v15 = vmul.f32 %v7565_v53, %v941_v7  ;;  %v948_v25 = vmul.f32 %v7601_v9, %v937_v14 }
 0x415   :  { %1054 = vmatprep.mubr.f32.mxu0 %v7023_v0 }
 0x416   :  { %v6508_v29 = vpack.c.bf16 %v949_v15, %v947_v20  ;;  %v6510_v34 = vpack.c.bf16 %v948_v25, %v946_v30  ;;  %v1318_v25 = vld [vmem:[#allocation5 + $0x20] sm:$0xff]  ;;  %v1320_v30 = vld [vmem:[#allocation5 + $0x30] sm:$0xff] }
 0x418   :  { %6162 = vmatmul.mubr.msk.f32.gmra.mrb[26].mxu0 %vm372_vm6, %v6158_v8 }
 0x419   :  { %1137 = vmatprep.mubr.f32.mxu0 %v7023_v0 }
 0x41c   :  { %6163 = vmatmul.mubr.msk.f32.vlgmr.msra.gmra.mrb[20].mxu0 %vm372_vm6, %v6151_v17 }
 0x41d   :  { %6507 = vmatpush1.bf16.msra.mxu0 %v6506_v24  ;;  %1143 = vmatprep.mubr.f32.mxu0 %v7023_v0 }
 0x41e   :  { %6509 = vmatprep.subr.bf16.mxu0 %v6508_v29  ;;  %v1319_v29 = vld [vmem:[#allocation5 + $0x28] sm:$0xff] }
 0x41f   :  { %v1284_v27 = vpop.permute.xlu0 %1283 }
 0x420   :  { %6164 = vmatmul.mubr.msk.f32.gmra.mrb[22].mxu0 %vm372_vm6, %v6152_v31  ;;  %v1321_v31 = vld [vmem:[#allocation5 + $0x38] sm:$0xff] }
 0x421   :  { %6511 = vmatpush1.bf16.msra.mxu0 %v6510_v34  ;;  %1149 = vmatprep.mubr.f32.mxu0 %v7023_v0 }
 0x423   :  { %v1289_v50 = vpop.permute.xlu1 %1288  ;;  %v1294_v2 = vpop.permute.xlu0 %1293 }
 0x424   :  { %6165 = vmatmul.mubr.msk.f32.gmra.mrb[24].mxu0 %vm372_vm6, %v6153_v18 }
 0x425   :  { %1155 = vmatprep.mubr.f32.mxu0 %v7023_v0 }
 0x427   :  { %v1299_v7 = vpop.permute.xlu1 %1298  ;;  %v1330_v34 = vpop.permute.xlu0 %1329 }
 0x428   :  { %6166 = vmatmul.mubr.msk.f32.gmra.mrb[26].mxu0 %vm372_vm6, %v6154_v38 }
 0x429   :  { %1243 = vmatprep.mubr.f32.mxu0 %v7023_v0 }
 0x42c   :  { %6167 = vmatmul.mubr.msk.f32.vlgmr.msra.gmra.mrb[20].mxu0 %vm372_vm6, %v1163_v22 }
 0x42d   :  { %1249 = vmatprep.mubr.f32.mxu0 %v7023_v0 }
 0x430   :  { %6168 = vmatmul.mubr.msk.f32.gmra.mrb[22].mxu0 %vm372_vm6, %v1164_v39 }
 0x431   :  { %1255 = vmatprep.mubr.f32.mxu0 %v7023_v0 }
 0x434   :  { %6169 = vmatmul.mubr.msk.f32.gmra.mrb[24].mxu0 %vm372_vm6, %v1165_v41 }
 0x435   :  { %1261 = vmatprep.mubr.f32.mxu0 %v7023_v0 }
 0x438   :  { %6170 = vmatmul.mubr.msk.f32.gmra.mrb[26].mxu0 %vm372_vm6, %v1166_v42  ;;  %v1335_v42 = vpop.permute.xlu1 %1334 }
 0x439   :  { %2003 = vmatprep.mubr.f32.mxu0 %v7023_v0 }
 0x4ff   :  { %v1245_v23 = vpop.f32.mrb[20].mxu0 }
 0x500   :  { %v1247_v43 = vpop.f32.mrb[21].mxu0  ;;  %v1301_v49 = vadd.f32 %v1284_v27, %v1245_v23 }
 0x501   :  { %v1302_v28 = vadd.f32 %v1284_v27, %v1247_v43 }
 0x502   :  { %v1309_v58 = vmax.f32 %v1301_v49, 0.0 }
 0x503   :  { %v1251_v56 = vpop.f32.mrb[22].mxu0  ;;  %v1310_v60 = vmax.f32 %v1302_v28, 0.0 }
 0x504   :  { %v1303_v33 = vadd.f32 %v1289_v50, %v1251_v56  ;;  %v1253_v35 = vpop.f32.mrb[23].mxu0 }
 0x505   :  { %v1304_v57 = vadd.f32 %v1289_v50, %v1253_v35 }
 0x506   :  { %v1311_v59 = vmax.f32 %v1303_v33, 0.0  ;;  %v1340_v33 = vpop.permute.xlu0 %1339 }
 0x507   :  { %v1312_v61 = vmax.f32 %v1304_v57, 0.0  ;;  %v1257_v62 = vpop.f32.mrb[24].mxu0 }
 0x508   :  { %v6514_v63 = vpack.c.bf16 %v1311_v59, %v1309_v58  ;;  %v1259_v1 = vpop.f32.mrb[25].mxu0  ;;  %v1305_v6 = vadd.f32 %v1294_v2, %v1257_v62 }
 0x509   :  { %v6512_v5 = vpack.c.bf16 %v1312_v61, %v1310_v60  ;;  %v1306_v8 = vadd.f32 %v1294_v2, %v1259_v1 }
 0x50a   :  { %v1313_v15 = vmax.f32 %v1305_v6, 0.0 }
 0x50b   :  { %v1263_v10 = vpop.f32.mrb[26].mxu0  ;;  %6513 = vmatprep.subr.bf16.mxu1 %v6512_v5  ;;  %v1314_v17 = vmax.f32 %v1306_v8, 0.0 }
 0x50c   :  { %v1307_v11 = vadd.f32 %v1299_v7, %v1263_v10  ;;  %v1265_v12 = vpop.f32.mrb[27].mxu0  ;;  %6515 = vmatpush1.bf16.msra.mxu1 %v6514_v63 }
 0x50d   :  { %v1308_v14 = vadd.f32 %v1299_v7, %v1265_v12  ;;  %v6206_v12 = vld [vmem:[%s9352_s7 + $0x58] sm:$0xff] }
 0x50e   :  { %v1315_v16 = vmax.f32 %v1307_v11, 0.0  ;;  %v6205_v11 = vld [vmem:[%s9352_s7 + $0x50] sm:$0xff] }
 0x50f   :  { %v1316_v19 = vmax.f32 %v1308_v14, 0.0  ;;  %v6207_v14 = vld [vmem:[%s9354_s9 + $0x40] sm:$0xff] }
 0x510   :  { %v6518_v20 = vpack.c.bf16 %v1315_v16, %v1313_v15  ;;  %v6208_v15 = vld [vmem:[%s9354_s9 + $0x48] sm:$0xff]  ;;  %v6209_v16 = vld [vmem:[%s9354_s9 + $0x50] sm:$0xff] }
 0x511   :  { %v6516_v24 = vpack.c.bf16 %v1316_v19, %v1314_v17  ;;  %v6210_v17 = vld [vmem:[%s9354_s9 + $0x58] sm:$0xff]  ;;  %v2045_v19 = vld [vmem:[%s9356_s11] sm:$0xff] }
 0x513   :  { %6517 = vmatprep.subr.bf16.mxu1 %v6516_v24  ;;  %v2171_v24 = vld [vmem:[%s9358_s13 + $0x8] sm:$0xff] }
 0x514   :  { %6519 = vmatpush1.bf16.msra.mxu1 %v6518_v20  ;;  %v2170_v20 = vld [vmem:[%s9358_s13] sm:$0xff] }
 0x517   :  { %6179 = vmatmul.mubr.msk.f32.vlgmr.msra.gmra.mrb[8].mxu1 %vm372_vm6, %v1318_v25  ;;  %v2172_v25 = vld [vmem:[%s9358_s13 + $0x10] sm:$0xff] }
 0x518   :  { %1429 = vmatprep.mubr.f32.mxu1 %v7023_v0 }
 0x51b   :  { %6180 = vmatmul.mubr.msk.f32.gmra.mrb[10].mxu1 %vm372_vm6, %v1319_v29  ;;  %v2173_v29 = vld [vmem:[%s9358_s13 + $0x18] sm:$0xff] }
 0x51c   :  { %1435 = vmatprep.mubr.f32.mxu1 %v7023_v0 }
 0x51f   :  { %6181 = vmatmul.mubr.msk.f32.gmra.mrb[12].mxu1 %vm372_vm6, %v1320_v30 }
 0x520   :  { %1441 = vmatprep.mubr.f32.mxu1 %v7023_v0 }
 0x523   :  { %6182 = vmatmul.mubr.msk.f32.gmra.mrb[14].mxu1 %vm372_vm6, %v1321_v31 }
 0x524   :  { %1616 = vmatprep.mubr.f32.mxu1 %v7023_v0 }
 0x5ea   :  { %v1425_v18 = vpop.f32.mrb[8].mxu1 }
 0x5eb   :  { %v1426_v38 = vadd.f32 %v1425_v18, %v1330_v34  ;;  %v1427_v22 = vpop.f32.mrb[9].mxu1  ;;  %v7762_v18 = vsel %vm140_vm13, 1.0, %v7023_v0 }
 0x5ec   :  { %v1428_v39 = vadd.f32 %v1427_v22, %v1330_v34 }
 0x5ed   :  { %v1448_v41 = vadd.f32 %v1426_v38, %v7438_v44  ;;  %v7765_v38 = vsel %vm141_vm14, 1.0, %v7023_v0 }
 0x5ee   :  { %v1431_v23 = vpop.f32.mrb[10].mxu1  ;;  %v1449_v27 = vadd.f32 %v1428_v39, %v7445_v36 }
 0x5ef   :  { %v7657_v43 = vmul.f32 %v1448_v41, %v7432_v13  ;;  %v1432_v49 = vadd.f32 %v1431_v23, %v1335_v42  ;;  %v1433_v50 = vpop.f32.mrb[11].mxu1 }
 0x5f0   :  { %v1434_v28 = vadd.f32 %v1433_v50, %v1335_v42  ;;  %v7664_v44 = vmul.f32 %v1449_v27, %v7435_v21 }
 0x5f1   :  { %v1450_v56 = vadd.f32 %v1432_v49, %v7448_v37  ;;  %1464 = vrot.lane.b32.xlu0 %v7657_v43, %s7029_s30  ;;  %v1345_v37 = vpop.permute.xlu1 %1344 }
 0x5f2   :  { %v1437_v35 = vpop.f32.mrb[12].mxu1  ;;  %v1451_v58 = vadd.f32 %v1434_v28, %v7457_v46 }
 0x5f3   :  { %v7667_v57 = vmul.f32 %v1450_v56, %v7432_v13  ;;  %v1438_v36 = vadd.f32 %v1437_v35, %v1340_v33  ;;  %v1439_v59 = vpop.f32.mrb[13].mxu1 }
 0x5f4   :  { %v1440_v60 = vadd.f32 %v1439_v59, %v1340_v33  ;;  %v7676_v63 = vmul.f32 %v1451_v58, %v7435_v21 }
 0x5f5   :  { %v1452_v61 = vadd.f32 %v1438_v36, %v7460_v47  ;;  %1466 = vrot.lane.b32.xlu1 %v7667_v57, %s7029_s30  ;;  %1472 = vrot.lane.b32.xlu0 %v7664_v44, %s7029_s30 }
 0x5f6   :  { %v1443_v62 = vpop.f32.mrb[14].mxu1  ;;  %v1453_v46 = vadd.f32 %v1440_v60, %v7469_v54 }
 0x5f7   :  { %v7679_v1 = vmul.f32 %v1452_v61, %v7432_v13  ;;  %v1444_v2 = vadd.f32 %v1443_v62, %v1345_v37  ;;  %v1445_v5 = vpop.f32.mrb[15].mxu1 }
 0x5f8   :  { %v1446_v6 = vadd.f32 %v1445_v5, %v1345_v37  ;;  %v7688_v7 = vmul.f32 %v1453_v46, %v7435_v21 }
 0x5f9   :  { %v1454_v47 = vadd.f32 %v1444_v2, %v7472_v55  ;;  %1474 = vrot.lane.b32.xlu1 %v7676_v63, %s7029_s30  ;;  %1468 = vrot.lane.b32.xlu0 %v7679_v1, %s7029_s30  ;;  %v6203_v55 = vld [vmem:[%s9352_s7 + $0x40] sm:$0xff] }
 0x5fa   :  { %v1455_v10 = vadd.f32 %v1446_v6, %v7480_v32  ;;  %v6204_v32 = vld [vmem:[%s9352_s7 + $0x48] sm:$0xff] }
 0x5fb   :  { %v7691_v8 = vmul.f32 %v1454_v47, %v7432_v13 }
 0x5fc   :  { %v7699_v54 = vmul.f32 %v1455_v10, %v7435_v21 }
 0x5fd   :  { %1470 = vrot.lane.b32.xlu1 %v7691_v8, %s7029_s30  ;;  %1476 = vrot.lane.b32.xlu0 %v7688_v7, %s7029_s30 }
 0x601   :  { %1478 = vrot.lane.b32.xlu1 %v7699_v54, %s7029_s30  ;;  %1497 = vrot.lane.b32.xlu0 %v7657_v43, %s9377_s8 }
 0x605   :  { %1499 = vrot.lane.b32.xlu1 %v7667_v57, %s9377_s8  ;;  %1505 = vrot.lane.b32.xlu0 %v7664_v44, %s9377_s8 }
 0x609   :  { %1507 = vrot.lane.b32.xlu1 %v7676_v63, %s9377_s8  ;;  %1501 = vrot.lane.b32.xlu0 %v7679_v1, %s9377_s8 }
 0x60d   :  { %1503 = vrot.lane.b32.xlu1 %v7691_v8, %s9377_s8  ;;  %1509 = vrot.lane.b32.xlu0 %v7688_v7, %s9377_s8 }
 0x611   :  { %1511 = vrot.lane.b32.xlu1 %v7699_v54, %s9377_s8  ;;  %1863 = vperm.xlu0 %6929, %v6203_v55  }
 0x615   :  { %1868 = vperm.xlu1 %6930, %v6204_v32   ;;  %1873 = vperm.xlu0 %6929, %v6205_v11  }
 0x619   :  { %1878 = vperm.xlu1 %6930, %v6206_v12   ;;  %1909 = vperm.xlu0 %6929, %v6207_v14   ;;  %v6528_v12 = vpack.c.bf16 %v7676_v63, %v7664_v44  ;;  %v6187_v14 = vld [vmem:[%s9391_s27 + $0x40] sm:$0xff] }
 0x61d   :  { %1914 = vperm.xlu1 %6930, %v6208_v15   ;;  %1919 = vperm.xlu0 %6929, %v6209_v16   ;;  %v7799_v16 = vsel %vm159_vm0, 1.0, %v7023_v0 }
 0x621   :  { %1924 = vperm.xlu1 %6930, %v6210_v17   ;;  %2048 = vperm.xlu0 %6929, %v2045_v19   ;;  %v6530_v19 = vpack.c.bf16 %v7667_v57, %v7657_v43 }
 0x625   :  { %2176 = vperm.xlu1 %6930, %v2170_v20   ;;  %2181 = vperm.xlu0 %6929, %v2171_v24   ;;  %v6532_v24 = vpack.c.bf16 %v7699_v54, %v7688_v7 }
 0x629   :  { %2186 = vperm.xlu1 %6930, %v2172_v25   ;;  %2191 = vperm.xlu0 %6929, %v2173_v29   ;;  %v6188_v25 = vld [vmem:[%s9391_s27 + $0x48] sm:$0xff] }
 0x663   :  { %v1465_v30 = vpop.permute.xlu0 %1464 }
 0x667   :  { %v1467_v31 = vpop.permute.xlu1 %1466  ;;  %v1473_v34 = vpop.permute.xlu0 %1472 }
 0x668   :  { %v1481_v22 = vsel %vm1480_vm12, %v1465_v30, %v1473_v34  ;;  %v1485_v39 = vsel %vm1480_vm12, %v1473_v34, %v1465_v30  ;;  %v6534_v34 = vpack.c.bf16 %v7691_v8, %v7679_v1 }
 0x669   :  { %v1489_v49 = vmul.f32 %v7762_v18, %v1485_v39  ;;  %v1490_v50 = vmul.f32 %v7765_v38, %v1481_v22  ;;  %v6189_v39 = vld [vmem:[%s9391_s27 + $0x50] sm:$0xff] }
 0x66b   :  { %v1475_v41 = vpop.permute.xlu1 %1474  ;;  %v1469_v42 = vpop.permute.xlu0 %1468 }
 0x66c   :  { %v1482_v23 = vsel %vm1480_vm12, %v1467_v31, %v1475_v41  ;;  %v1486_v27 = vsel %vm1480_vm12, %v1475_v41, %v1467_v31 }
 0x66d   :  { %v1491_v28 = vmul.f32 %v7762_v18, %v1486_v27  ;;  %v1492_v56 = vmul.f32 %v7765_v38, %v1482_v23 }
 0x66f   :  { %v6522_v33 = vpack.c.bf16 %v1491_v28, %v1489_v49  ;;  %v1471_v35 = vpop.permute.xlu1 %1470  ;;  %v1477_v58 = vpop.permute.xlu0 %1476  ;;  %v6520_v36 = vpack.c.bf16 %v1492_v56, %v1490_v50  ;;  %v6190_v49 = vld [vmem:[%s9391_s27 + $0x58] sm:$0xff]  ;;  %v7835_v50 = vsel %vm158_vm15, 1.0, %v7023_v0  ;;  %s6106_s27 = sshll.u32 %s7031_s26, 4  ;;  %s6107_s27 = int_to_ptr.vmem [resolvable:$true] %s6106_s27 }
 0x670   :  { %v1483_v59 = vsel %vm1480_vm12, %v1469_v42, %v1477_v58  ;;  %v1487_v60 = vsel %vm1480_vm12, %v1477_v58, %v1469_v42  ;;  %s6991_s8 = scalar_lea.vmem %s6107_s27, 768  ;;  %p6996_p3 = scmp.lt.s32.totalorder %s6107_s27, %s6107_s27 }
 0x671   :  { %6521 = vmatprep.subr.bf16.mxu1 %v6520_v36  ;;  %v1493_v2 = vmul.f32 %v7762_v18, %v1487_v60  ;;  %v1494_v5 = vmul.f32 %v7765_v38, %v1483_v59  ;;  %v6183_v59 = vld [vmem:[%s9392_s22 + $0x40] sm:$0xff]  ;;  %p6992_p2 = scmp.ne.s32.totalorder %s6107_s27, %s6991_s8  ;;  %p6997_p4 = scmp.lt.s32.totalorder %s6991_s8, %s6991_s8 }
 0x672   :  { %6523 = vmatpush1.bf16.msra.mxu1 %v6522_v33 }
 0x673   :  { %v1479_v61 = vpop.permute.xlu1 %1478  ;;  %v1498_v37 = vpop.permute.xlu0 %1497  ;;  %p6998_p5 = por %p6997_p4, %p6996_p3 }
 0x674   :  { %v1484_v62 = vsel %vm1480_vm12, %v1471_v35, %v1479_v61  ;;  %v1488_v46 = vsel %vm1480_vm12, %v1479_v61, %v1471_v35 }
 0x675   :  { %v1495_v6 = vmul.f32 %v7762_v18, %v1488_v46  ;;  %v1496_v47 = vmul.f32 %v7765_v38, %v1484_v62  ;;  %p6999_p6 = pnand %p6998_p5, %p6992_p2 }
 0x677   :  { %v6526_v10 = vpack.c.bf16 %v1495_v6, %v1493_v2  ;;  %v1500_v55 = vpop.permute.xlu1 %1499  ;;  %v6524_v32 = vpack.c.bf16 %v1496_v47, %v1494_v5  ;;  %v1506_v11 = vpop.permute.xlu0 %1505  ;;  %v6184_v5 = vld [vmem:[%s9392_s22 + $0x48] sm:$0xff]  ;;  %v6185_v47 = vld [vmem:[%s9392_s22 + $0x50] sm:$0xff] }
 0x678   :  { %v1518_v17 = vsel %vm158_vm15, %v1506_v11, %v1498_v37  ;;  %v1514_v28 = vsel %vm158_vm15, %v1498_v37, %v1506_v11  ;;  %v1745_v11 = vld [vmem:[#allocation2 + $0x50] sm:$0xff] }
 0x679   :  { %6525 = vmatprep.subr.bf16.mxu1 %v6524_v32  ;;  %v1523_v29 = vmul.f32 %v7799_v16, %v1518_v17  ;;  %v1522_v36 = vmul.f32 %v7835_v50, %v1514_v28  ;;  %v1744_v32 = vld [vmem:[#allocation2 + $0x48] sm:$0xff] }
 0x67a   :  { %6527 = vmatpush1.bf16.msra.mxu1 %v6526_v10  ;;  %v6186_v10 = vld [vmem:[%s9392_s22 + $0x58] sm:$0xff] }
 0x67b   :  { %v1508_v15 = vpop.permute.xlu1 %1507  ;;  %6529 = vmatprep.subr.bf16.mxu1 %v6528_v12  ;;  %v1502_v30 = vpop.permute.xlu0 %1501  ;;  %v1746_v12 = vld [vmem:[#allocation2 + $0x58] sm:$0xff] }
 0x67c   :  { %v1519_v48 = vsel %vm158_vm15, %v1508_v15, %v1500_v55  ;;  %v1515_v42 = vsel %vm158_vm15, %v1500_v55, %v1508_v15  ;;  %v1743_v55 = vld [vmem:[#allocation2 + $0x40] sm:$0xff] }
 0x67d   :  { %v1525_v20 = vmul.f32 %v7799_v16, %v1519_v48  ;;  %6191 = vmatmul.mubr.msk.f32.vlgmr.msra.gmra.mrb[16].mxu1 %vm372_vm6, %v6187_v14  ;;  %v1524_v56 = vmul.f32 %v7835_v50, %v1515_v42 }
 0x67e   :  { %6531 = vmatpush1.bf16.msra.mxu1 %v6530_v19  ;;  %1622 = vmatprep.mubr.f32.mxu1 %v7023_v0 }
 0x67f   :  { %v1504_v31 = vpop.permute.xlu1 %1503  ;;  %6533 = vmatprep.subr.bf16.mxu1 %v6532_v24  ;;  %v6536_v22 = vpack.c.bf16 %v1525_v20, %v1523_v29  ;;  %v1510_v23 = vpop.permute.xlu0 %1509  ;;  %v6538_v37 = vpack.c.bf16 %v1524_v56, %v1522_v36 }
 0x680   :  { %v1520_v33 = vsel %vm158_vm15, %v1510_v23, %v1502_v30  ;;  %v1516_v60 = vsel %vm158_vm15, %v1502_v30, %v1510_v23 }
 0x681   :  { %6192 = vmatmul.mubr.msk.f32.gmra.mrb[18].mxu1 %vm372_vm6, %v6188_v25  ;;  %v1527_v61 = vmul.f32 %v7799_v16, %v1520_v33  ;;  %v1526_v2 = vmul.f32 %v7835_v50, %v1516_v60 }
 0x682   :  { %6535 = vmatpush1.bf16.msra.mxu1 %v6534_v34  ;;  %1628 = vmatprep.mubr.f32.mxu1 %v7023_v0 }
 0x683   :  { %v1512_v41 = vpop.permute.xlu1 %1511  ;;  %6537 = vmatprep.subr.bf16.mxu1 %v6536_v22 }
 0x684   :  { %v1521_v27 = vsel %vm158_vm15, %v1512_v41, %v1504_v31  ;;  %v1517_v35 = vsel %vm158_vm15, %v1504_v31, %v1512_v41 }
 0x685   :  { %6193 = vmatmul.mubr.msk.f32.gmra.mrb[20].mxu1 %vm372_vm6, %v6189_v39  ;;  %v1529_v58 = vmul.f32 %v7799_v16, %v1521_v27  ;;  %v1528_v62 = vmul.f32 %v7835_v50, %v1517_v35 }
 0x686   :  { %1634 = vmatprep.mubr.f32.mxu1 %v7023_v0 }
 0x687   :  { %v6540_v46 = vpack.c.bf16 %v1529_v58, %v1527_v61  ;;  %v6542_v6 = vpack.c.bf16 %v1528_v62, %v1526_v2 }
 0x689   :  { %6194 = vmatmul.mubr.msk.f32.gmra.mrb[22].mxu1 %vm372_vm6, %v6190_v49 }
 0x68a   :  { %1717 = vmatprep.mubr.f32.mxu1 %v7023_v0 }
 0x68d   :  { %6195 = vmatmul.mubr.msk.f32.vlgmr.msra.gmra.mrb[16].mxu1 %vm372_vm6, %v6183_v59 }
 0x68e   :  { %6539 = vmatpush1.bf16.msra.mxu1 %v6538_v37  ;;  %1723 = vmatprep.mubr.f32.mxu1 %v7023_v0 }
 0x68f   :  { %6541 = vmatprep.subr.bf16.mxu1 %v6540_v46 }
 0x690   :  { %v1864_v17 = vpop.permute.xlu0 %1863 }
 0x691   :  { %6196 = vmatmul.mubr.msk.f32.gmra.mrb[18].mxu1 %vm372_vm6, %v6184_v5  ;;  %v1898_v5 = vld [vmem:[#allocation5 + $0x40] sm:$0xff] }
 0x692   :  { %6543 = vmatpush1.bf16.msra.mxu1 %v6542_v6  ;;  %1729 = vmatprep.mubr.f32.mxu1 %v7023_v0  ;;  %v1899_v6 = vld [vmem:[#allocation5 + $0x48] sm:$0xff] }
 0x694   :  { %v1869_v19 = vpop.permute.xlu1 %1868  ;;  %v1874_v27 = vpop.permute.xlu0 %1873 }
 0x695   :  { %6197 = vmatmul.mubr.msk.f32.gmra.mrb[20].mxu1 %vm372_vm6, %v6185_v47  ;;  %v1900_v47 = vld [vmem:[#allocation5 + $0x50] sm:$0xff] }
 0x696   :  { %1735 = vmatprep.mubr.f32.mxu1 %v7023_v0 }
 0x698   :  { %v1879_v56 = vpop.permute.xlu1 %1878 }
 0x699   :  { %6198 = vmatmul.mubr.msk.f32.gmra.mrb[22].mxu1 %vm372_vm6, %v6186_v10  ;;  %v1901_v10 = vld [vmem:[#allocation5 + $0x58] sm:$0xff] }
 0x69a   :  { %1823 = vmatprep.mubr.f32.mxu1 %v7023_v0 }
 0x69d   :  { %6199 = vmatmul.mubr.msk.f32.vlgmr.msra.gmra.mrb[16].mxu1 %vm372_vm6, %v1743_v55  ;;  %v1910_v55 = vpop.permute.xlu0 %1909 }
 0x69e   :  { %1829 = vmatprep.mubr.f32.mxu1 %v7023_v0 }
 0x6a1   :  { %6200 = vmatmul.mubr.msk.f32.gmra.mrb[18].mxu1 %vm372_vm6, %v1744_v32 }
 0x6a2   :  { %1835 = vmatprep.mubr.f32.mxu1 %v7023_v0 }
 0x6a5   :  { %6201 = vmatmul.mubr.msk.f32.gmra.mrb[20].mxu1 %vm372_vm6, %v1745_v11 }
 0x6a6   :  { %1841 = vmatprep.mubr.f32.mxu1 %v7023_v0 }
 0x6a9   :  { %6202 = vmatmul.mubr.msk.f32.gmra.mrb[22].mxu1 %vm372_vm6, %v1746_v12 }
 0x6aa   :  { %2827 = vmatprep.mubr.f32.mxu1 %v7023_v0 }
 0x770   :  { %v1825_v14 = vpop.f32.mrb[16].mxu1 }
 0x771   :  { %v1827_v15 = vpop.f32.mrb[17].mxu1  ;;  %v1881_v48 = vadd.f32 %v1864_v17, %v1825_v14 }
 0x772   :  { %v1882_v20 = vadd.f32 %v1864_v17, %v1827_v15  ;;  %v1915_v15 = vpop.permute.xlu1 %1914 }
 0x773   :  { %v1889_v31 = vmax.f32 %v1881_v48, 0.0 }
 0x774   :  { %v1831_v24 = vpop.f32.mrb[18].mxu1  ;;  %v1890_v22 = vmax.f32 %v1882_v20, 0.0 }
 0x775   :  { %v1883_v25 = vadd.f32 %v1869_v19, %v1831_v24  ;;  %v1833_v29 = vpop.f32.mrb[19].mxu1 }
 0x776   :  { %v1884_v30 = vadd.f32 %v1869_v19, %v1833_v29 }
 0x777   :  { %v1891_v34 = vmax.f32 %v1883_v25, 0.0 }
 0x778   :  { %v1892_v39 = vmax.f32 %v1884_v30, 0.0  ;;  %v1837_v41 = vpop.f32.mrb[20].mxu1  ;;  %v1920_v30 = vpop.permute.xlu0 %1919 }
 0x779   :  { %v6546_v42 = vpack.c.bf16 %v1891_v34, %v1889_v31  ;;  %v1839_v23 = vpop.f32.mrb[21].mxu1  ;;  %v1885_v28 = vadd.f32 %v1874_v27, %v1837_v41 }
 0x77a   :  { %v6544_v49 = vpack.c.bf16 %v1892_v39, %v1890_v22  ;;  %v1886_v33 = vadd.f32 %v1874_v27, %v1839_v23 }
 0x77b   :  { %v1893_v60 = vmax.f32 %v1885_v28, 0.0 }
 0x77c   :  { %v1843_v35 = vpop.f32.mrb[22].mxu1  ;;  %6545 = vmatprep.subr.bf16.mxu0 %v6544_v49  ;;  %v1894_v37 = vmax.f32 %v1886_v33, 0.0 }
 0x77d   :  { %v1887_v58 = vadd.f32 %v1879_v56, %v1843_v35  ;;  %v1845_v36 = vpop.f32.mrb[23].mxu1  ;;  %6547 = vmatpush1.bf16.msra.mxu0 %v6546_v42 }
 0x77e   :  { %v1888_v59 = vadd.f32 %v1879_v56, %v1845_v36 }
 0x77f   :  { %v1895_v61 = vmax.f32 %v1887_v58, 0.0 }
 0x780   :  { %v1896_v62 = vmax.f32 %v1888_v59, 0.0 }
 0x781   :  { %v6550_v46 = vpack.c.bf16 %v1895_v61, %v1893_v60 }
 0x782   :  { %v6548_v2 = vpack.c.bf16 %v1896_v62, %v1894_v37 }
 0x784   :  { %6549 = vmatprep.subr.bf16.mxu0 %v6548_v2 }
 0x785   :  { %6551 = vmatpush1.bf16.msra.mxu0 %v6550_v46 }
 0x788   :  { %6211 = vmatmul.mubr.msk.f32.vlgmr.msra.gmra.mrb[28].mxu0 %vm372_vm6, %v1898_v5 }
 0x789   :  { %2009 = vmatprep.mubr.f32.mxu0 %v7023_v0 }
 0x78c   :  { %6212 = vmatmul.mubr.msk.f32.gmra.mrb[30].mxu0 %vm372_vm6, %v1899_v6 }
 0x78d   :  { %2015 = vmatprep.mubr.f32.mxu0 %v7023_v0 }
 0x790   :  { %6213 = vmatmul.mubr.msk.f32.gmra.mrb[32].mxu0 %vm372_vm6, %v1900_v47 }
 0x791   :  { %2021 = vmatprep.mubr.f32.mxu0 %v7023_v0 }
 0x794   :  { %6214 = vmatmul.mubr.msk.f32.gmra.mrb[34].mxu0 %vm372_vm6, %v1901_v10 }
 0x795   :  { %2118 = vmatprep.mubr.f32.mxu0 %v7023_v0 }
 0x85b   :  { %v2005_v32 = vpop.f32.mrb[28].mxu0 }
 0x85c   :  { %v2006_v11 = vadd.f32 %v2005_v32, %v1910_v55  ;;  %v2007_v12 = vpop.f32.mrb[29].mxu0 }
 0x85d   :  { %v2008_v14 = vadd.f32 %v2007_v12, %v1910_v55 }
 0x85e   :  { %v2028_v48 = vadd.f32 %v2006_v11, %v7657_v43 }
 0x85f   :  { %v2011_v17 = vpop.f32.mrb[30].mxu0  ;;  %v2029_v24 = vadd.f32 %v2008_v14, %v7664_v44  ;;  %v1925_v44 = vpop.permute.xlu1 %1924 }
 0x860   :  { %v2012_v19 = vadd.f32 %v2011_v17, %v1915_v15  ;;  %v2013_v20 = vpop.f32.mrb[31].mxu0  ;;  %v2036_v22 = vmul.f32 %v2028_v48, %v7432_v13 }
 0x861   :  { %v2014_v25 = vadd.f32 %v2013_v20, %v1915_v15  ;;  %v2037_v23 = vmul.f32 %v2029_v24, %v7435_v21 }
 0x862   :  { %v2030_v29 = vadd.f32 %v2012_v19, %v7667_v57 }
 0x863   :  { %v2031_v31 = vadd.f32 %v2014_v25, %v7676_v63  ;;  %v2017_v34 = vpop.f32.mrb[32].mxu0 }
 0x864   :  { %v2038_v39 = vmul.f32 %v2030_v29, %v7432_v13  ;;  %v2018_v41 = vadd.f32 %v2017_v34, %v1920_v30  ;;  %v2019_v42 = vpop.f32.mrb[33].mxu0 }
 0x865   :  { %v2039_v43 = vmul.f32 %v2031_v31, %v7435_v21  ;;  %v2020_v27 = vadd.f32 %v2019_v42, %v1920_v30 }
 0x866   :  { %v6554_v49 = vpack.c.bf16 %v2038_v39, %v2036_v22  ;;  %v2032_v57 = vadd.f32 %v2018_v41, %v7679_v1 }
 0x867   :  { %v2023_v28 = vpop.f32.mrb[34].mxu0  ;;  %v6552_v56 = vpack.c.bf16 %v2039_v43, %v2037_v23  ;;  %v2033_v35 = vadd.f32 %v2020_v27, %v7688_v7  ;;  %v2044_v7 = vld [vmem:[%s9355_s10] sm:$0xff] }
 0x868   :  { %v2024_v33 = vadd.f32 %v2023_v28, %v1925_v44  ;;  %v2025_v63 = vpop.f32.mrb[35].mxu0  ;;  %v2040_v60 = vmul.f32 %v2032_v57, %v7432_v13 }
 0x869   :  { %v2026_v58 = vadd.f32 %v2025_v63, %v1925_v44  ;;  %6553 = vmatprep.subr.bf16.mxu0 %v6552_v56  ;;  %v2041_v37 = vmul.f32 %v2033_v35, %v7435_v21 }
 0x86a   :  { %v2034_v36 = vadd.f32 %v2024_v33, %v7691_v8  ;;  %6555 = vmatpush1.bf16.msra.mxu0 %v6554_v49  ;;  %v2049_v8 = vpop.permute.xlu0 %2048 }
 0x86b   :  { %v2035_v59 = vadd.f32 %v2026_v58, %v7699_v54 }
 0x86c   :  { %v2042_v61 = vmul.f32 %v2034_v36, %v7432_v13 }
 0x86d   :  { %v2043_v62 = vmul.f32 %v2035_v59, %v7435_v21 }
 0x86e   :  { %v6558_v1 = vpack.c.bf16 %v2042_v61, %v2040_v60 }
 0x86f   :  { %v6556_v46 = vpack.c.bf16 %v2043_v62, %v2041_v37  ;;  %v2166_v37 = vld [vmem:[%s9357_s12] sm:$0xff]  ;;  %v2167_v62 = vld [vmem:[%s9357_s12 + $0x8] sm:$0xff] }
 0x871   :  { %6557 = vmatprep.subr.bf16.mxu0 %v6556_v46  ;;  %v2169_v46 = vld [vmem:[%s9357_s12 + $0x18] sm:$0xff] }
 0x872   :  { %6559 = vmatpush1.bf16.msra.mxu0 %v6558_v1  ;;  %v2168_v1 = vld [vmem:[%s9357_s12 + $0x10] sm:$0xff] }
 0x875   :  { %6215 = vmatmul.mubr.msk.f32.vlgmr.msra.gmra.mrb[36].mxu0 %vm372_vm6, %v2044_v7  ;;  %v2177_v7 = vpop.permute.xlu1 %2176 }
 0x876   :  { %2271 = vmatprep.mubr.f32.mxu0 %v7023_v0 }
 0x948   :  { %v2120_v54 = vpop.f32.mrb[36].mxu0 }
 0x949   :  { %v2121_v2 = vadd.f32 %v2120_v54, %v2049_v8  ;;  %v2122_v5 = vpop.f32.mrb[37].mxu0 }
 0x94a   :  { %v2123_v6 = vadd.f32 %v2122_v5, %v2049_v8  ;;  %v2182_v5 = vpop.permute.xlu0 %2181 }
 0x94b   :  { %v2125_v47 = vmul.f32 %v2121_v2, %v7432_v13 }
 0x94c   :  { %v2126_v10 = vmul.f32 %v2123_v6, %v7435_v21 }
 0x94d   :  { %2127 = vst [vmem:[#allocation7] sm:$0xff] %v2125_v47  ;;  %v2130_v55 = vrot.slane %v2125_v47, 4 }
 0x94e   :  { %2129 = vst [vmem:[#allocation7 + $0x8] sm:$0xff] %v2126_v10  ;;  %v2136_v32 = vrot.slane %v2126_v10, 4 }
 0x94f   :  { %v2131_v11 = vmax.f32 %v2125_v47, %v2130_v55 }
 0x950   :  { %v2137_v12 = vmax.f32 %v2126_v10, %v2136_v32  ;;  %v2187_v32 = vpop.permute.xlu1 %2186 }
 0x951   :  { %v2132_v14 = vrot.slane %v2131_v11, 2 }
 0x952   :  { %v2138_v15 = vrot.slane %v2137_v12, 2 }
 0x953   :  { %v2133_v17 = vmax.f32 %v2131_v11, %v2132_v14 }
 0x954   :  { %v2139_v48 = vmax.f32 %v2137_v12, %v2138_v15 }
 0x955   :  { %v2134_v19 = vrot.slane %v2133_v17, 1 }
 0x956   :  { %v2140_v20 = vrot.slane %v2139_v48, 1 }
 0x957   :  { %v2135_v24 = vmax.f32 %v2133_v17, %v2134_v19  ;;  %v2192_v17 = vpop.permute.xlu0 %2191 }
 0x958   :  { %v2141_v25 = vmax.f32 %v2139_v48, %v2140_v20 }
 0x959   :  { %v2142_v29 = vsub.f32 %v2125_v47, %v2135_v24 }
 0x95a   :  { %v2143_v30 = vsub.f32 %v2126_v10, %v2141_v25 }
 0x95b   :  { %v2144_v31 = vmul.f32 1.442695, %v2142_v29  ;;  %v2683_v29 = vld [vmem:[%s9362_s17] sm:$0xff] }
 0x95c   :  { %v2146_v34 = vmul.f32 1.442695, %v2143_v30  ;;  %v2684_v30 = vld [vmem:[%s9362_s17 + $0x8] sm:$0xff] }
 0x95d   :  { %6931 = vpow2.f32 %v2144_v31  ;;  %v2685_v31 = vld [vmem:[%s9362_s17 + $0x10] sm:$0xff] }
 0x95e   :  { %6933 = vpow2.f32 %v2146_v34  ;;  %v2686_v34 = vld [vmem:[%s9362_s17 + $0x18] sm:$0xff] }
 0x967   :  { %v6932_v22 = vpop.eup %6931 }
 0x968   :  { %v6934_v39 = vpop.eup %6933  ;;  %v2148_v41 = vrot.slane %v6932_v22, 4 }
 0x969   :  { %v2154_v42 = vrot.slane %v6934_v39, 4 }
 0x96a   :  { %v2149_v23 = vadd.f32 %v6932_v22, %v2148_v41  ;;  %v2729_v41 = vld [vmem:[%s9364_s19 + $0x10] sm:$0xff] }
 0x96b   :  { %v2155_v43 = vadd.f32 %v6934_v39, %v2154_v42  ;;  %v2730_v42 = vld [vmem:[%s9364_s19 + $0x18] sm:$0xff] }
 0x96c   :  { %v2150_v27 = vrot.slane %v2149_v23, 2 }
 0x96d   :  { %v2156_v49 = vrot.slane %v2155_v43, 2 }
 0x96e   :  { %v2151_v44 = vadd.f32 %v2150_v27, %v2149_v23 }
 0x96f   :  { %v2157_v28 = vadd.f32 %v2156_v49, %v2155_v43 }
 0x970   :  { %v2152_v56 = vrot.slane %v2151_v44, 1 }
 0x971   :  { %v2158_v57 = vrot.slane %v2157_v28, 1 }
 0x972   :  { %v2153_v33 = vadd.f32 %v2152_v56, %v2151_v44 }
 0x973   :  { %v2159_v63 = vadd.f32 %v2158_v57, %v2157_v28 }
 0x974   :  { %6935 = vrcp.f32 %v2153_v33 }
 0x975   :  { %6937 = vrcp.f32 %v2159_v63 }
 0x97e   :  { %v6936_v35 = vpop.eup %6935 }
 0x97f   :  { %v6938_v58 = vpop.eup %6937  ;;  %v2162_v36 = vmul.f32 %v6936_v35, %v6932_v22  ;;  %v2727_v22 = vld [vmem:[%s9364_s19] sm:$0xff] }
 0x980   :  { %v2163_v59 = vmul.f32 %v6938_v58, %v6934_v39  ;;  %v2728_v39 = vld [vmem:[%s9364_s19 + $0x8] sm:$0xff] }
 0x981   :  { %v2164_v61 = vmul.f32 %v2162_v36, %v7432_v13 }
 0x982   :  { %v2165_v60 = vmul.f32 %v2163_v59, %v7435_v21 }
 0x984   :  { %2207 = vmatprep.subr.mxu0 %v2165_v60 }
 0x985   :  { %2208 = vmatpush1.msra.mxu0 %v2164_v61 }
 0x986   :  { %6216 = vmatmul.mubr.msk.f32.vlgmr.msra.gmra.mrb[38].mxu0 %vm2194_vm1, %v2166_v37 }
 0x987   :  { %2277 = vmatprep.mubr.f32.mxu0 %v7023_v0 }
 0x98a   :  { %6217 = vmatmul.mubr.msk.f32.gmra.mrb[40].mxu0 %vm2194_vm1, %v2167_v62 }
 0x98b   :  { %2283 = vmatprep.mubr.f32.mxu0 %v7023_v0 }
 0x98e   :  { %6218 = vmatmul.mubr.msk.f32.gmra.mrb[42].mxu0 %vm2194_vm1, %v2168_v1 }
 0x98f   :  { %2289 = vmatprep.mubr.f32.mxu0 %v7023_v0 }
 0x992   :  { %6219 = vmatmul.mubr.msk.f32.gmra.mrb[44].mxu0 %vm2194_vm1, %v2169_v46 }
 0x993   :  { %2444 = vmatprep.mubr.f32.mxu0 %v7023_v0 }
 0xa59   :  { %v2273_v8 = vpop.f32.mrb[38].mxu0 }
 0xa5a   :  { %v7934_v54 = vadd.f32 %v2273_v8, %v2177_v7  ;;  %v2275_v2 = vpop.f32.mrb[39].mxu0 }
 0xa5b   :  { %v7938_v47 = vadd.f32 %v2275_v2, %v2177_v7 }
 0xa5c   :  { %2296 = vrot.lane.b32.xlu1 %v7934_v54, %s7025_s6 }
 0xa5d   :  { %v2279_v6 = vpop.f32.mrb[40].mxu0 }
 0xa5e   :  { %v7940_v10 = vadd.f32 %v2279_v6, %v2182_v5  ;;  %v2281_v55 = vpop.f32.mrb[41].mxu0 }
 0xa5f   :  { %v7946_v12 = vadd.f32 %v2281_v55, %v2182_v5 }
 0xa60   :  { %2298 = vrot.lane.b32.xlu0 %v7940_v10, %s7025_s6  ;;  %2304 = vrot.lane.b32.xlu1 %v7938_v47, %s7025_s6 }
 0xa61   :  { %v2285_v11 = vpop.f32.mrb[42].mxu0 }
 0xa62   :  { %v7948_v14 = vadd.f32 %v2285_v11, %v2187_v32  ;;  %v2287_v15 = vpop.f32.mrb[43].mxu0 }
 0xa63   :  { %v7954_v19 = vadd.f32 %v2287_v15, %v2187_v32 }
 0xa64   :  { %2306 = vrot.lane.b32.xlu0 %v7946_v12, %s7025_s6  ;;  %2300 = vrot.lane.b32.xlu1 %v7948_v14, %s7025_s6 }
 0xa65   :  { %v2291_v48 = vpop.f32.mrb[44].mxu0 }
 0xa66   :  { %v7956_v20 = vadd.f32 %v2291_v48, %v2192_v17  ;;  %v2293_v24 = vpop.f32.mrb[45].mxu0 }
 0xa67   :  { %v7962_v25 = vadd.f32 %v2293_v24, %v2192_v17  ;;  %v6568_v24 = vpack.c.bf16 %v7946_v12, %v7938_v47 }
 0xa68   :  { %2302 = vrot.lane.b32.xlu0 %v7956_v20, %s7025_s6  ;;  %2308 = vrot.lane.b32.xlu1 %v7954_v19, %s7025_s6 }
 0xa6c   :  { %2310 = vrot.lane.b32.xlu0 %v7962_v25, %s7025_s6  ;;  %2328 = vrot.lane.b32.xlu1 %v7934_v54, %s7026_s28 }
 0xa70   :  { %2330 = vrot.lane.b32.xlu0 %v7940_v10, %s7026_s28  ;;  %2336 = vrot.lane.b32.xlu1 %v7938_v47, %s7026_s28 }
 0xa74   :  { %2338 = vrot.lane.b32.xlu0 %v7946_v12, %s7026_s28  ;;  %2332 = vrot.lane.b32.xlu1 %v7948_v14, %s7026_s28 }
 0xa78   :  { %2334 = vrot.lane.b32.xlu0 %v7956_v20, %s7026_s28  ;;  %2340 = vrot.lane.b32.xlu1 %v7954_v19, %s7026_s28 }
 0xa7c   :  { %2342 = vrot.lane.b32.xlu0 %v7962_v25, %s7026_s28  ;;  %2689 = vperm.xlu1 %6930, %v2683_v29   ;;  %v2364_v29 = vld [vmem:[%s9359_s14] sm:$0xff] }
 0xa80   :  { %2694 = vperm.xlu0 %6929, %v2684_v30   ;;  %2699 = vperm.xlu1 %6930, %v2685_v31  }
 0xa84   :  { %2704 = vperm.xlu0 %6929, %v2686_v34   ;;  %2733 = vperm.xlu1 %6930, %v2727_v22   ;;  %v6570_v22 = vpack.c.bf16 %v7940_v10, %v7934_v54 }
 0xa88   :  { %2738 = vperm.xlu0 %6929, %v2728_v39   ;;  %2743 = vperm.xlu1 %6930, %v2729_v41   ;;  %v6572_v41 = vpack.c.bf16 %v7962_v25, %v7954_v19 }
 0xa8c   :  { %2748 = vperm.xlu0 %6929, %v2730_v42   ;;  %v2365_v42 = vld [vmem:[%s9359_s14 + $0x8] sm:$0xff] }
 0xace   :  { %v2297_v23 = vpop.permute.xlu1 %2296 }
 0xad2   :  { %v2299_v43 = vpop.permute.xlu0 %2298  ;;  %v2305_v27 = vpop.permute.xlu1 %2304 }
 0xad3   :  { %v2312_v49 = vsel %vm314_vm3, %v2297_v23, %v2305_v27  ;;  %v2316_v44 = vsel %vm314_vm3, %v2305_v27, %v2297_v23 }
 0xad4   :  { %v2320_v63 = vmul.f32 %v7301_v51, %v2316_v44  ;;  %v2321_v35 = vmul.f32 %v7304_v52, %v2312_v49  ;;  %v6574_v49 = vpack.c.bf16 %v7956_v20, %v7948_v14 }
 0xad6   :  { %v2307_v28 = vpop.permute.xlu0 %2306  ;;  %v2301_v56 = vpop.permute.xlu1 %2300 }
 0xad7   :  { %v2313_v57 = vsel %vm314_vm3, %v2299_v43, %v2307_v28  ;;  %v2317_v33 = vsel %vm314_vm3, %v2307_v28, %v2299_v43  ;;  %v2366_v28 = vld [vmem:[%s9359_s14 + $0x10] sm:$0xff] }
 0xad8   :  { %v2322_v58 = vmul.f32 %v7301_v51, %v2317_v33  ;;  %v2323_v36 = vmul.f32 %v7304_v52, %v2313_v57 }
 0xada   :  { %v6562_v59 = vpack.c.bf16 %v2322_v58, %v2320_v63  ;;  %v2303_v60 = vpop.permute.xlu0 %2302  ;;  %v2309_v61 = vpop.permute.xlu1 %2308  ;;  %v6560_v37 = vpack.c.bf16 %v2323_v36, %v2321_v35  ;;  %v2367_v35 = vld [vmem:[%s9359_s14 + $0x18] sm:$0xff] }
 0xadb   :  { %v2314_v62 = vsel %vm314_vm3, %v2301_v56, %v2309_v61  ;;  %v2318_v1 = vsel %vm314_vm3, %v2309_v61, %v2301_v56 }
 0xadc   :  { %6561 = vmatprep.subr.bf16.mxu0 %v6560_v37  ;;  %v2324_v5 = vmul.f32 %v7301_v51, %v2318_v1  ;;  %v2325_v6 = vmul.f32 %v7304_v52, %v2314_v62  ;;  %v2360_v62 = vld [vmem:[%s9360_s15] sm:$0xff] }
 0xadd   :  { %6563 = vmatpush1.bf16.msra.mxu0 %v6562_v59 }
 0xade   :  { %v2311_v46 = vpop.permute.xlu0 %2310  ;;  %v2329_v7 = vpop.permute.xlu1 %2328 }
 0xadf   :  { %v2315_v8 = vsel %vm314_vm3, %v2303_v60, %v2311_v46  ;;  %v2319_v2 = vsel %vm314_vm3, %v2311_v46, %v2303_v60 }
 0xae0   :  { %v2326_v55 = vmul.f32 %v7301_v51, %v2319_v2  ;;  %v2327_v32 = vmul.f32 %v7304_v52, %v2315_v8 }
 0xae2   :  { %v6566_v11 = vpack.c.bf16 %v2326_v55, %v2324_v5  ;;  %v2331_v15 = vpop.permute.xlu0 %2330  ;;  %v6564_v17 = vpack.c.bf16 %v2327_v32, %v2325_v6  ;;  %v2337_v48 = vpop.permute.xlu1 %2336  ;;  %v2361_v6 = vld [vmem:[%s9360_s15 + $0x8] sm:$0xff]  ;;  %v2362_v32 = vld [vmem:[%s9360_s15 + $0x10] sm:$0xff] }
 0xae3   :  { %v2348_v31 = vsel %vm146_vm4, %v2337_v48, %v2329_v7  ;;  %v2344_v58 = vsel %vm146_vm4, %v2329_v7, %v2337_v48  ;;  %v2572_v48 = vld [vmem:[%s9361_s16 + $0x10] sm:$0xff] }
 0xae4   :  { %6565 = vmatprep.subr.bf16.mxu0 %v6564_v17  ;;  %v2353_v23 = vmul.f32 %v7341_v26, %v2348_v31  ;;  %v2352_v37 = vmul.f32 %v7366_v40, %v2344_v58  ;;  %v2571_v17 = vld [vmem:[%s9361_s16 + $0x8] sm:$0xff] }
 0xae5   :  { %6567 = vmatpush1.bf16.msra.mxu0 %v6566_v11  ;;  %v2363_v11 = vld [vmem:[%s9360_s15 + $0x18] sm:$0xff] }
 0xae6   :  { %v2339_v30 = vpop.permute.xlu0 %2338  ;;  %6569 = vmatprep.subr.bf16.mxu0 %v6568_v24  ;;  %v2333_v43 = vpop.permute.xlu1 %2332  ;;  %v2573_v24 = vld [vmem:[%s9361_s16 + $0x18] sm:$0xff] }
 0xae7   :  { %v2349_v34 = vsel %vm146_vm4, %v2339_v30, %v2331_v15  ;;  %v2345_v57 = vsel %vm146_vm4, %v2331_v15, %v2339_v30  ;;  %v2570_v15 = vld [vmem:[%s9361_s16] sm:$0xff] }
 0xae8   :  { %v2355_v39 = vmul.f32 %v7341_v26, %v2349_v34  ;;  %6220 = vmatmul.mubr.msk.f32.vlgmr.msra.gmra.mrb[46].mxu0 %vm372_vm6, %v2364_v29  ;;  %v2354_v36 = vmul.f32 %v7366_v40, %v2345_v57 }
 0xae9   :  { %6571 = vmatpush1.bf16.msra.mxu0 %v6570_v22  ;;  %2450 = vmatprep.mubr.f32.mxu0 %v7023_v0 }
 0xaea   :  { %v2335_v27 = vpop.permute.xlu0 %2334  ;;  %6573 = vmatprep.subr.bf16.mxu0 %v6572_v41  ;;  %v6576_v44 = vpack.c.bf16 %v2355_v39, %v2353_v23  ;;  %v2341_v33 = vpop.permute.xlu1 %2340  ;;  %v6578_v7 = vpack.c.bf16 %v2354_v36, %v2352_v37 }
 0xaeb   :  { %v2350_v59 = vsel %vm146_vm4, %v2341_v33, %v2333_v43  ;;  %v2346_v1 = vsel %vm146_vm4, %v2333_v43, %v2341_v33 }
 0xaec   :  { %6221 = vmatmul.mubr.msk.f32.gmra.mrb[48].mxu0 %vm372_vm6, %v2365_v42  ;;  %v2357_v46 = vmul.f32 %v7341_v26, %v2350_v59  ;;  %v2356_v5 = vmul.f32 %v7366_v40, %v2346_v1 }
 0xaed   :  { %6575 = vmatpush1.bf16.msra.mxu0 %v6574_v49  ;;  %2456 = vmatprep.mubr.f32.mxu0 %v7023_v0 }
 0xaee   :  { %v2343_v56 = vpop.permute.xlu0 %2342  ;;  %6577 = vmatprep.subr.bf16.mxu0 %v6576_v44 }
 0xaef   :  { %v2351_v63 = vsel %vm146_vm4, %v2343_v56, %v2335_v27  ;;  %v2347_v60 = vsel %vm146_vm4, %v2335_v27, %v2343_v56 }
 0xaf0   :  { %6222 = vmatmul.mubr.msk.f32.gmra.mrb[50].mxu0 %vm372_vm6, %v2366_v28  ;;  %v2359_v61 = vmul.f32 %v7341_v26, %v2351_v63  ;;  %v2358_v8 = vmul.f32 %v7366_v40, %v2347_v60 }
 0xaf1   :  { %2462 = vmatprep.mubr.f32.mxu0 %v7023_v0 }
 0xaf2   :  { %v6580_v2 = vpack.c.bf16 %v2359_v61, %v2357_v46  ;;  %v6582_v55 = vpack.c.bf16 %v2358_v8, %v2356_v5 }
 0xaf4   :  { %6223 = vmatmul.mubr.msk.f32.gmra.mrb[52].mxu0 %vm372_vm6, %v2367_v35 }
 0xaf5   :  { %2545 = vmatprep.mubr.f32.mxu0 %v7023_v0 }
 0xaf8   :  { %6224 = vmatmul.mubr.msk.f32.vlgmr.msra.gmra.mrb[46].mxu0 %vm372_vm6, %v2360_v62 }
 0xaf9   :  { %6579 = vmatpush1.bf16.msra.mxu0 %v6578_v7  ;;  %2551 = vmatprep.mubr.f32.mxu0 %v7023_v0 }
 0xafa   :  { %6581 = vmatprep.subr.bf16.mxu0 %v6580_v2 }
 0xafb   :  { %v2690_v31 = vpop.permute.xlu1 %2689 }
 0xafc   :  { %6225 = vmatmul.mubr.msk.f32.gmra.mrb[48].mxu0 %vm372_vm6, %v2361_v6  ;;  %v2723_v6 = vld [vmem:[%s9363_s18] sm:$0xff] }
 0xafd   :  { %6583 = vmatpush1.bf16.msra.mxu0 %v6582_v55  ;;  %2557 = vmatprep.mubr.f32.mxu0 %v7023_v0  ;;  %v2724_v55 = vld [vmem:[%s9363_s18 + $0x8] sm:$0xff] }
 0xaff   :  { %v2695_v22 = vpop.permute.xlu0 %2694  ;;  %v2700_v63 = vpop.permute.xlu1 %2699 }
 0xb00   :  { %6226 = vmatmul.mubr.msk.f32.gmra.mrb[50].mxu0 %vm372_vm6, %v2362_v32  ;;  %v2725_v32 = vld [vmem:[%s9363_s18 + $0x10] sm:$0xff] }
 0xb01   :  { %2563 = vmatprep.mubr.f32.mxu0 %v7023_v0 }
 0xb03   :  { %v2705_v36 = vpop.permute.xlu0 %2704 }
 0xb04   :  { %6227 = vmatmul.mubr.msk.f32.gmra.mrb[52].mxu0 %vm372_vm6, %v2363_v11  ;;  %v2726_v11 = vld [vmem:[%s9363_s18 + $0x18] sm:$0xff] }
 0xb05   :  { %2650 = vmatprep.mubr.f32.mxu0 %v7023_v0 }
 0xb08   :  { %6228 = vmatmul.mubr.msk.f32.vlgmr.msra.gmra.mrb[46].mxu0 %vm372_vm6, %v2570_v15  ;;  %v2734_v15 = vpop.permute.xlu1 %2733 }
 0xb09   :  { %2656 = vmatprep.mubr.f32.mxu0 %v7023_v0 }
 0xb0c   :  { %6229 = vmatmul.mubr.msk.f32.gmra.mrb[48].mxu0 %vm372_vm6, %v2571_v17 }
 0xb0d   :  { %2662 = vmatprep.mubr.f32.mxu0 %v7023_v0 }
 0xb10   :  { %6230 = vmatmul.mubr.msk.f32.gmra.mrb[50].mxu0 %vm372_vm6, %v2572_v48 }
 0xb11   :  { %2668 = vmatprep.mubr.f32.mxu0 %v7023_v0 }
 0xb14   :  { %6231 = vmatmul.mubr.msk.f32.gmra.mrb[52].mxu0 %vm372_vm6, %v2573_v24 }
 0xb15   :  { %3405 = vmatprep.mubr.f32.mxu0 %v7023_v0 }
 0xbdb   :  { %v2652_v29 = vpop.f32.mrb[46].mxu0 }
 0xbdc   :  { %v2654_v30 = vpop.f32.mrb[47].mxu0  ;;  %v2707_v34 = vadd.f32 %v2690_v31, %v2652_v29 }
 0xbdd   :  { %v2708_v39 = vadd.f32 %v2690_v31, %v2654_v30  ;;  %v2739_v31 = vpop.permute.xlu0 %2738 }
 0xbde   :  { %v2715_v27 = vmax.f32 %v2707_v34, 0.0 }
 0xbdf   :  { %v2658_v41 = vpop.f32.mrb[48].mxu0  ;;  %v2716_v44 = vmax.f32 %v2708_v39, 0.0 }
 0xbe0   :  { %v2709_v42 = vadd.f32 %v2695_v22, %v2658_v41  ;;  %v2660_v23 = vpop.f32.mrb[49].mxu0 }
 0xbe1   :  { %v2710_v43 = vadd.f32 %v2695_v22, %v2660_v23 }
 0xbe2   :  { %v2717_v49 = vmax.f32 %v2709_v42, 0.0 }
 0xbe3   :  { %v2718_v28 = vmax.f32 %v2710_v43, 0.0  ;;  %v2664_v56 = vpop.f32.mrb[50].mxu0 }
 0xbe4   :  { %v6586_v57 = vpack.c.bf16 %v2717_v49, %v2715_v27  ;;  %v2666_v33 = vpop.f32.mrb[51].mxu0  ;;  %v2711_v58 = vadd.f32 %v2700_v63, %v2664_v56  ;;  %v2744_v27 = vpop.permute.xlu1 %2743 }
 0xbe5   :  { %v6584_v35 = vpack.c.bf16 %v2718_v28, %v2716_v44  ;;  %v2712_v59 = vadd.f32 %v2700_v63, %v2666_v33 }
 0xbe6   :  { %v2719_v1 = vmax.f32 %v2711_v58, 0.0 }
 0xbe7   :  { %v2670_v60 = vpop.f32.mrb[52].mxu0  ;;  %6585 = vmatprep.subr.bf16.mxu1 %v6584_v35  ;;  %v2720_v7 = vmax.f32 %v2712_v59, 0.0 }
 0xbe8   :  { %v2713_v61 = vadd.f32 %v2705_v36, %v2670_v60  ;;  %v2672_v37 = vpop.f32.mrb[53].mxu0  ;;  %6587 = vmatpush1.bf16.msra.mxu1 %v6586_v57 }
 0xbe9   :  { %v2714_v62 = vadd.f32 %v2705_v36, %v2672_v37 }
 0xbea   :  { %v2721_v46 = vmax.f32 %v2713_v61, 0.0 }
 0xbeb   :  { %v2722_v8 = vmax.f32 %v2714_v62, 0.0 }
 0xbec   :  { %v6590_v2 = vpack.c.bf16 %v2721_v46, %v2719_v1  ;;  %v6262_v1 = vld [vmem:[%s9362_s17 + $0x30] sm:$0xff]  ;;  %v6263_v46 = vld [vmem:[%s9362_s17 + $0x38] sm:$0xff] }
 0xbed   :  { %v6588_v5 = vpack.c.bf16 %v2722_v8, %v2720_v7  ;;  %v6268_v7 = vld [vmem:[%s9364_s19 + $0x20] sm:$0xff]  ;;  %v6269_v8 = vld [vmem:[%s9364_s19 + $0x28] sm:$0xff] }
 0xbef   :  { %6589 = vmatprep.subr.bf16.mxu1 %v6588_v5  ;;  %v6271_v5 = vld [vmem:[%s9364_s19 + $0x38] sm:$0xff] }
 0xbf0   :  { %6591 = vmatpush1.bf16.msra.mxu1 %v6590_v2  ;;  %v6270_v2 = vld [vmem:[%s9364_s19 + $0x30] sm:$0xff] }
 0xbf3   :  { %6232 = vmatmul.mubr.msk.f32.vlgmr.msra.gmra.mrb[24].mxu1 %vm372_vm6, %v2723_v6 }
 0xbf4   :  { %2833 = vmatprep.mubr.f32.mxu1 %v7023_v0 }
 0xbf7   :  { %6233 = vmatmul.mubr.msk.f32.gmra.mrb[26].mxu1 %vm372_vm6, %v2724_v55 }
 0xbf8   :  { %2839 = vmatprep.mubr.f32.mxu1 %v7023_v0 }
 0xbfb   :  { %6234 = vmatmul.mubr.msk.f32.gmra.mrb[28].mxu1 %vm372_vm6, %v2725_v32 }
 0xbfc   :  { %2845 = vmatprep.mubr.f32.mxu1 %v7023_v0 }
 0xbff   :  { %6235 = vmatmul.mubr.msk.f32.gmra.mrb[30].mxu1 %vm372_vm6, %v2726_v11 }
 0xc00   :  { %3018 = vmatprep.mubr.f32.mxu1 %v7023_v0 }
 0xcc6   :  { %v2829_v17 = vpop.f32.mrb[24].mxu1 }
 0xcc7   :  { %v2830_v48 = vadd.f32 %v2829_v17, %v2734_v15  ;;  %v2831_v24 = vpop.f32.mrb[25].mxu1 }
 0xcc8   :  { %v2832_v29 = vadd.f32 %v2831_v24, %v2734_v15 }
 0xcc9   :  { %v2852_v30 = vadd.f32 %v2830_v48, %v7934_v54 }
 0xcca   :  { %v2835_v34 = vpop.f32.mrb[26].mxu1  ;;  %v2853_v39 = vadd.f32 %v2832_v29, %v7938_v47 }
 0xccb   :  { %v8144_v22 = vmul.f32 %v2852_v30, %v7432_v13  ;;  %v2836_v41 = vadd.f32 %v2835_v34, %v2739_v31  ;;  %v2837_v42 = vpop.f32.mrb[27].mxu1 }
 0xccc   :  { %v2838_v23 = vadd.f32 %v2837_v42, %v2739_v31  ;;  %v8151_v44 = vmul.f32 %v2853_v39, %v7435_v21 }
 0xccd   :  { %v2854_v43 = vadd.f32 %v2836_v41, %v7940_v10  ;;  %2868 = vrot.lane.b32.xlu1 %v8144_v22, %s7027_s24  ;;  %v2749_v10 = vpop.permute.xlu0 %2748 }
 0xcce   :  { %v2841_v49 = vpop.f32.mrb[28].mxu1  ;;  %v2855_v28 = vadd.f32 %v2838_v23, %v7946_v12 }
 0xccf   :  { %v8154_v54 = vmul.f32 %v2854_v43, %v7432_v13  ;;  %v2842_v56 = vadd.f32 %v2841_v49, %v2744_v27  ;;  %v2843_v47 = vpop.f32.mrb[29].mxu1 }
 0xcd0   :  { %v2844_v57 = vadd.f32 %v2843_v47, %v2744_v27  ;;  %v8163_v35 = vmul.f32 %v2855_v28, %v7435_v21 }
 0xcd1   :  { %v2856_v33 = vadd.f32 %v2842_v56, %v7948_v14  ;;  %2870 = vrot.lane.b32.xlu0 %v8154_v54, %s7027_s24  ;;  %2876 = vrot.lane.b32.xlu1 %v8151_v44, %s7027_s24 }
 0xcd2   :  { %v2847_v63 = vpop.f32.mrb[30].mxu1  ;;  %v2857_v12 = vadd.f32 %v2844_v57, %v7954_v19 }
 0xcd3   :  { %v8166_v58 = vmul.f32 %v2856_v33, %v7432_v13  ;;  %v2848_v36 = vadd.f32 %v2847_v63, %v2749_v10  ;;  %v2849_v59 = vpop.f32.mrb[31].mxu1 }
 0xcd4   :  { %v2850_v60 = vadd.f32 %v2849_v59, %v2749_v10  ;;  %v8175_v61 = vmul.f32 %v2857_v12, %v7435_v21 }
 0xcd5   :  { %v2858_v14 = vadd.f32 %v2848_v36, %v7956_v20  ;;  %2878 = vrot.lane.b32.xlu0 %v8163_v35, %s7027_s24  ;;  %2872 = vrot.lane.b32.xlu1 %v8166_v58, %s7027_s24  ;;  %v6260_v20 = vld [vmem:[%s9362_s17 + $0x20] sm:$0xff] }
 0xcd6   :  { %v2859_v62 = vadd.f32 %v2850_v60, %v7962_v25  ;;  %v6261_v25 = vld [vmem:[%s9362_s17 + $0x28] sm:$0xff] }
 0xcd7   :  { %v8178_v37 = vmul.f32 %v2858_v14, %v7432_v13 }
 0xcd8   :  { %v8186_v19 = vmul.f32 %v2859_v62, %v7435_v21  ;;  %v6600_v62 = vpack.c.bf16 %v8163_v35, %v8151_v44 }
 0xcd9   :  { %2874 = vrot.lane.b32.xlu0 %v8178_v37, %s7027_s24  ;;  %2880 = vrot.lane.b32.xlu1 %v8175_v61, %s7027_s24 }
 0xcdd   :  { %2882 = vrot.lane.b32.xlu0 %v8186_v19, %s7027_s24  ;;  %2900 = vrot.lane.b32.xlu1 %v8144_v22, %s7028_s4 }
 0xce1   :  { %2902 = vrot.lane.b32.xlu0 %v8154_v54, %s7028_s4  ;;  %2908 = vrot.lane.b32.xlu1 %v8151_v44, %s7028_s4 }
 0xce5   :  { %2910 = vrot.lane.b32.xlu0 %v8163_v35, %s7028_s4  ;;  %2904 = vrot.lane.b32.xlu1 %v8166_v58, %s7028_s4 }
 0xce9   :  { %2906 = vrot.lane.b32.xlu0 %v8178_v37, %s7028_s4  ;;  %2912 = vrot.lane.b32.xlu1 %v8175_v61, %s7028_s4 }
 0xced   :  { %2914 = vrot.lane.b32.xlu0 %v8186_v19, %s7028_s4  ;;  %3265 = vperm.xlu1 %6930, %v6260_v20   ;;  %v6240_v20 = vld [vmem:[%s9359_s14 + $0x20] sm:$0xff] }
 0xcf1   :  { %3270 = vperm.xlu0 %6929, %v6261_v25   ;;  %3275 = vperm.xlu1 %6930, %v6262_v1  }
 0xcf5   :  { %3280 = vperm.xlu0 %6929, %v6263_v46   ;;  %3311 = vperm.xlu1 %6930, %v6268_v7   ;;  %v6602_v7 = vpack.c.bf16 %v8154_v54, %v8144_v22 }
 0xcf9   :  { %3316 = vperm.xlu0 %6929, %v6269_v8   ;;  %3321 = vperm.xlu1 %6930, %v6270_v2   ;;  %v6604_v2 = vpack.c.bf16 %v8186_v19, %v8175_v61 }
 0xcfd   :  { %3326 = vperm.xlu0 %6929, %v6271_v5   ;;  %v6241_v5 = vld [vmem:[%s9359_s14 + $0x28] sm:$0xff] }
 0xd3f   :  { %v2869_v6 = vpop.permute.xlu1 %2868 }
 0xd43   :  { %v2871_v55 = vpop.permute.xlu0 %2870  ;;  %v2877_v32 = vpop.permute.xlu1 %2876 }
 0xd44   :  { %v2884_v11 = vsel %vm900_vm7, %v2869_v6, %v2877_v32  ;;  %v2888_v15 = vsel %vm900_vm7, %v2877_v32, %v2869_v6 }
 0xd45   :  { %v2892_v30 = vmul.f32 %v7528_v3, %v2888_v15  ;;  %v2893_v31 = vmul.f32 %v7531_v4, %v2884_v11  ;;  %v6606_v11 = vpack.c.bf16 %v8178_v37, %v8166_v58 }
 0xd47   :  { %v2879_v17 = vpop.permute.xlu0 %2878  ;;  %v2873_v48 = vpop.permute.xlu1 %2872 }
 0xd48   :  { %v2885_v24 = vsel %vm900_vm7, %v2871_v55, %v2879_v17  ;;  %v2889_v29 = vsel %vm900_vm7, %v2879_v17, %v2871_v55  ;;  %v6242_v17 = vld [vmem:[%s9359_s14 + $0x30] sm:$0xff] }
 0xd49   :  { %v2894_v34 = vmul.f32 %v7528_v3, %v2889_v29  ;;  %v2895_v39 = vmul.f32 %v7531_v4, %v2885_v24 }
 0xd4b   :  { %v6594_v41 = vpack.c.bf16 %v2894_v34, %v2892_v30  ;;  %v2875_v42 = vpop.permute.xlu0 %2874  ;;  %v2881_v23 = vpop.permute.xlu1 %2880  ;;  %v6592_v43 = vpack.c.bf16 %v2895_v39, %v2893_v31  ;;  %v6243_v31 = vld [vmem:[%s9359_s14 + $0x38] sm:$0xff] }
 0xd4c   :  { %v2886_v27 = vsel %vm900_vm7, %v2873_v48, %v2881_v23  ;;  %v2890_v49 = vsel %vm900_vm7, %v2881_v23, %v2873_v48 }
 0xd4d   :  { %6593 = vmatprep.subr.bf16.mxu1 %v6592_v43  ;;  %v2896_v33 = vmul.f32 %v7528_v3, %v2890_v49  ;;  %v2897_v10 = vmul.f32 %v7531_v4, %v2886_v27  ;;  %v6236_v27 = vld [vmem:[%s9360_s15 + $0x20] sm:$0xff] }
 0xd4e   :  { %6595 = vmatpush1.bf16.msra.mxu1 %v6594_v41 }
 0xd4f   :  { %v2883_v28 = vpop.permute.xlu0 %2882  ;;  %v2901_v56 = vpop.permute.xlu1 %2900 }
 0xd50   :  { %v2887_v47 = vsel %vm900_vm7, %v2875_v42, %v2883_v28  ;;  %v2891_v57 = vsel %vm900_vm7, %v2883_v28, %v2875_v42 }
 0xd51   :  { %v2898_v63 = vmul.f32 %v7528_v3, %v2891_v57  ;;  %v2899_v12 = vmul.f32 %v7531_v4, %v2887_v47 }
 0xd53   :  { %v6598_v36 = vpack.c.bf16 %v2898_v63, %v2896_v33  ;;  %v2903_v59 = vpop.permute.xlu0 %2902  ;;  %v6596_v60 = vpack.c.bf16 %v2899_v12, %v2897_v10  ;;  %v2909_v14 = vpop.permute.xlu1 %2908  ;;  %v6237_v10 = vld [vmem:[%s9360_s15 + $0x28] sm:$0xff]  ;;  %v6238_v12 = vld [vmem:[%s9360_s15 + $0x30] sm:$0xff] }
 0xd54   :  { %v2920_v1 = vsel %vm152_vm10, %v2909_v14, %v2901_v56  ;;  %v2916_v34 = vsel %vm152_vm10, %v2901_v56, %v2909_v14  ;;  %v6254_v14 = vld [vmem:[%s9361_s16 + $0x30] sm:$0xff] }
 0xd55   :  { %6597 = vmatprep.subr.bf16.mxu1 %v6596_v60  ;;  %v2925_v6 = vmul.f32 %v7565_v53, %v2920_v1  ;;  %v2924_v43 = vmul.f32 %v7601_v9, %v2916_v34  ;;  %v6253_v60 = vld [vmem:[%s9361_s16 + $0x28] sm:$0xff] }
 0xd56   :  { %6599 = vmatpush1.bf16.msra.mxu1 %v6598_v36  ;;  %v6239_v36 = vld [vmem:[%s9360_s15 + $0x38] sm:$0xff] }
 0xd57   :  { %v2911_v25 = vpop.permute.xlu0 %2910  ;;  %6601 = vmatprep.subr.bf16.mxu1 %v6600_v62  ;;  %v2905_v55 = vpop.permute.xlu1 %2904  ;;  %v6255_v62 = vld [vmem:[%s9361_s16 + $0x38] sm:$0xff] }
 0xd58   :  { %v2921_v46 = vsel %vm152_vm10, %v2911_v25, %v2903_v59  ;;  %v2917_v24 = vsel %vm152_vm10, %v2903_v59, %v2911_v25  ;;  %v6252_v59 = vld [vmem:[%s9361_s16 + $0x20] sm:$0xff] }
 0xd59   :  { %v2927_v8 = vmul.f32 %v7565_v53, %v2921_v46  ;;  %6244 = vmatmul.mubr.msk.f32.vlgmr.msra.gmra.mrb[32].mxu1 %vm372_vm6, %v6240_v20  ;;  %v2926_v39 = vmul.f32 %v7601_v9, %v2917_v24 }
 0xd5a   :  { %6603 = vmatpush1.bf16.msra.mxu1 %v6602_v7  ;;  %3024 = vmatprep.mubr.f32.mxu1 %v7023_v0 }
 0xd5b   :  { %v2907_v32 = vpop.permute.xlu0 %2906  ;;  %6605 = vmatprep.subr.bf16.mxu1 %v6604_v2  ;;  %v6608_v15 = vpack.c.bf16 %v2927_v8, %v2925_v6  ;;  %v2913_v29 = vpop.permute.xlu1 %2912  ;;  %v6610_v56 = vpack.c.bf16 %v2926_v39, %v2924_v43 }
 0xd5c   :  { %v2922_v41 = vsel %vm152_vm10, %v2913_v29, %v2905_v55  ;;  %v2918_v49 = vsel %vm152_vm10, %v2905_v55, %v2913_v29 }
 0xd5d   :  { %6245 = vmatmul.mubr.msk.f32.gmra.mrb[34].mxu1 %vm372_vm6, %v6241_v5  ;;  %v2929_v28 = vmul.f32 %v7565_v53, %v2922_v41  ;;  %v2928_v33 = vmul.f32 %v7601_v9, %v2918_v49 }
 0xd5e   :  { %6607 = vmatpush1.bf16.msra.mxu1 %v6606_v11  ;;  %3030 = vmatprep.mubr.f32.mxu1 %v7023_v0 }
 0xd5f   :  { %v2915_v48 = vpop.permute.xlu0 %2914  ;;  %6609 = vmatprep.subr.bf16.mxu1 %v6608_v15 }
 0xd60   :  { %v2923_v30 = vsel %vm152_vm10, %v2915_v48, %v2907_v32  ;;  %v2919_v42 = vsel %vm152_vm10, %v2907_v32, %v2915_v48 }
 0xd61   :  { %6246 = vmatmul.mubr.msk.f32.gmra.mrb[36].mxu1 %vm372_vm6, %v6242_v17  ;;  %v2931_v23 = vmul.f32 %v7565_v53, %v2923_v30  ;;  %v2930_v47 = vmul.f32 %v7601_v9, %v2919_v42 }
 0xd62   :  { %3036 = vmatprep.mubr.f32.mxu1 %v7023_v0 }
 0xd63   :  { %v6612_v57 = vpack.c.bf16 %v2931_v23, %v2929_v28  ;;  %v6614_v63 = vpack.c.bf16 %v2930_v47, %v2928_v33 }
 0xd65   :  { %6247 = vmatmul.mubr.msk.f32.gmra.mrb[38].mxu1 %vm372_vm6, %v6243_v31 }
 0xd66   :  { %3119 = vmatprep.mubr.f32.mxu1 %v7023_v0 }
 0xd69   :  { %6248 = vmatmul.mubr.msk.f32.vlgmr.msra.gmra.mrb[32].mxu1 %vm372_vm6, %v6236_v27 }
 0xd6a   :  { %6611 = vmatpush1.bf16.msra.mxu1 %v6610_v56  ;;  %3125 = vmatprep.mubr.f32.mxu1 %v7023_v0 }
 0xd6b   :  { %6613 = vmatprep.subr.bf16.mxu1 %v6612_v57 }
 0xd6c   :  { %v3266_v1 = vpop.permute.xlu1 %3265 }
 0xd6d   :  { %6249 = vmatmul.mubr.msk.f32.gmra.mrb[34].mxu1 %vm372_vm6, %v6237_v10  ;;  %v6264_v10 = vld [vmem:[%s9363_s18 + $0x20] sm:$0xff] }
 0xd6e   :  { %6615 = vmatpush1.bf16.msra.mxu1 %v6614_v63  ;;  %3131 = vmatprep.mubr.f32.mxu1 %v7023_v0  ;;  %v6265_v63 = vld [vmem:[%s9363_s18 + $0x28] sm:$0xff] }
 0xd70   :  { %v3271_v7 = vpop.permute.xlu0 %3270  ;;  %v3276_v30 = vpop.permute.xlu1 %3275 }
 0xd71   :  { %6250 = vmatmul.mubr.msk.f32.gmra.mrb[36].mxu1 %vm372_vm6, %v6238_v12  ;;  %v6266_v12 = vld [vmem:[%s9363_s18 + $0x30] sm:$0xff] }
 0xd72   :  { %3137 = vmatprep.mubr.f32.mxu1 %v7023_v0 }
 0xd74   :  { %v3281_v39 = vpop.permute.xlu0 %3280 }
 0xd75   :  { %6251 = vmatmul.mubr.msk.f32.gmra.mrb[38].mxu1 %vm372_vm6, %v6239_v36  ;;  %v6267_v36 = vld [vmem:[%s9363_s18 + $0x38] sm:$0xff] }
 0xd76   :  { %3225 = vmatprep.mubr.f32.mxu1 %v7023_v0 }
 0xd79   :  { %6256 = vmatmul.mubr.msk.f32.vlgmr.msra.gmra.mrb[32].mxu1 %vm372_vm6, %v6252_v59  ;;  %v3312_v59 = vpop.permute.xlu1 %3311 }
 0xd7a   :  { %3231 = vmatprep.mubr.f32.mxu1 %v7023_v0 }
 0xd7d   :  { %6257 = vmatmul.mubr.msk.f32.gmra.mrb[34].mxu1 %vm372_vm6, %v6253_v60 }
 0xd7e   :  { %3237 = vmatprep.mubr.f32.mxu1 %v7023_v0 }
 0xd81   :  { %6258 = vmatmul.mubr.msk.f32.gmra.mrb[36].mxu1 %vm372_vm6, %v6254_v14 }
 0xd82   :  { %3243 = vmatprep.mubr.f32.mxu1 %v7023_v0 }
 0xd85   :  { %6259 = vmatmul.mubr.msk.f32.gmra.mrb[38].mxu1 %vm372_vm6, %v6255_v62 }
 0xd86   :  { %3983 = vmatprep.mubr.f32.mxu1 %v7023_v0 }
 0xe4c   :  { %v3227_v20 = vpop.f32.mrb[32].mxu1 }
 0xe4d   :  { %v3229_v25 = vpop.f32.mrb[33].mxu1  ;;  %v3283_v46 = vadd.f32 %v3266_v1, %v3227_v20 }
 0xe4e   :  { %v3284_v8 = vadd.f32 %v3266_v1, %v3229_v25  ;;  %v3317_v1 = vpop.permute.xlu0 %3316 }
 0xe4f   :  { %v3291_v32 = vmax.f32 %v3283_v46, 0.0 }
 0xe50   :  { %v3233_v2 = vpop.f32.mrb[34].mxu1  ;;  %v3292_v15 = vmax.f32 %v3284_v8, 0.0 }
 0xe51   :  { %v3285_v5 = vadd.f32 %v3271_v7, %v3233_v2  ;;  %v3235_v6 = vpop.f32.mrb[35].mxu1 }
 0xe52   :  { %v3286_v55 = vadd.f32 %v3271_v7, %v3235_v6 }
 0xe53   :  { %v3293_v11 = vmax.f32 %v3285_v5, 0.0 }
 0xe54   :  { %v3294_v17 = vmax.f32 %v3286_v55, 0.0  ;;  %v3239_v48 = vpop.f32.mrb[36].mxu1 }
 0xe55   :  { %v6618_v24 = vpack.c.bf16 %v3293_v11, %v3291_v32  ;;  %v3241_v29 = vpop.f32.mrb[37].mxu1  ;;  %v3287_v34 = vadd.f32 %v3276_v30, %v3239_v48  ;;  %v3322_v32 = vpop.permute.xlu1 %3321 }
 0xe56   :  { %v6616_v31 = vpack.c.bf16 %v3294_v17, %v3292_v15  ;;  %v3288_v41 = vadd.f32 %v3276_v30, %v3241_v29 }
 0xe57   :  { %v3295_v49 = vmax.f32 %v3287_v34, 0.0 }
 0xe58   :  { %v3245_v42 = vpop.f32.mrb[38].mxu1  ;;  %6617 = vmatprep.subr.bf16.mxu0 %v6616_v31  ;;  %v3296_v56 = vmax.f32 %v3288_v41, 0.0 }
 0xe59   :  { %v3289_v23 = vadd.f32 %v3281_v39, %v3245_v42  ;;  %v3247_v43 = vpop.f32.mrb[39].mxu1  ;;  %6619 = vmatpush1.bf16.msra.mxu0 %v6618_v24 }
 0xe5a   :  { %v3290_v27 = vadd.f32 %v3281_v39, %v3247_v43 }
 0xe5b   :  { %v3297_v28 = vmax.f32 %v3289_v23, 0.0 }
 0xe5c   :  { %v3298_v47 = vmax.f32 %v3290_v27, 0.0 }
 0xe5d   :  { %v6622_v57 = vpack.c.bf16 %v3297_v28, %v3295_v49  ;;  %v6302_v49 = vld [vmem:[%s9362_s17 + $0x50] sm:$0xff]  ;;  %v6303_v28 = vld [vmem:[%s9362_s17 + $0x58] sm:$0xff] }
 0xe5e   :  { %v6620_v33 = vpack.c.bf16 %v3298_v47, %v3296_v56  ;;  %v6308_v56 = vld [vmem:[%s9364_s19 + $0x40] sm:$0xff]  ;;  %v6309_v47 = vld [vmem:[%s9364_s19 + $0x48] sm:$0xff] }
 0xe60   :  { %6621 = vmatprep.subr.bf16.mxu0 %v6620_v33  ;;  %v6311_v33 = vld [vmem:[%s9364_s19 + $0x58] sm:$0xff] }
 0xe61   :  { %6623 = vmatpush1.bf16.msra.mxu0 %v6622_v57  ;;  %v6310_v57 = vld [vmem:[%s9364_s19 + $0x50] sm:$0xff] }
 0xe64   :  { %6272 = vmatmul.mubr.msk.f32.vlgmr.msra.gmra.mrb[54].mxu0 %vm372_vm6, %v6264_v10  ;;  %v4025_v10 = vld [vmem:[%s9366_s21] sm:$0xff] }
 0xe65   :  { %3411 = vmatprep.mubr.f32.mxu0 %v7023_v0 }
 0xe68   :  { %6273 = vmatmul.mubr.msk.f32.gmra.mrb[56].mxu0 %vm372_vm6, %v6265_v63  ;;  %v6321_v63 = vld [vmem:[%s9358_s13 + $0x20] sm:$0xff] }
 0xe69   :  { %3417 = vmatprep.mubr.f32.mxu0 %v7023_v0 }
 0xe6c   :  { %6274 = vmatmul.mubr.msk.f32.gmra.mrb[58].mxu0 %vm372_vm6, %v6266_v12  ;;  %v6322_v12 = vld [vmem:[%s9358_s13 + $0x28] sm:$0xff] }
 0xe6d   :  { %3423 = vmatprep.mubr.f32.mxu0 %v7023_v0 }
 0xe70   :  { %6275 = vmatmul.mubr.msk.f32.gmra.mrb[60].mxu0 %vm372_vm6, %v6267_v36  ;;  %v6323_v36 = vld [vmem:[%s9358_s13 + $0x30] sm:$0xff] }
 0xe71   :  { %3596 = vmatprep.mubr.f32.mxu0 %v7023_v0 }
 0xf37   :  { %v3407_v60 = vpop.f32.mrb[54].mxu0 }
 0xf38   :  { %v3408_v14 = vadd.f32 %v3407_v60, %v3312_v59  ;;  %v3409_v62 = vpop.f32.mrb[55].mxu0 }
 0xf39   :  { %v3410_v20 = vadd.f32 %v3409_v62, %v3312_v59  ;;  %v6324_v59 = vld [vmem:[%s9358_s13 + $0x38] sm:$0xff] }
 0xf3a   :  { %v3430_v25 = vadd.f32 %v3408_v14, %v8144_v22 }
 0xf3b   :  { %v3413_v46 = vpop.f32.mrb[56].mxu0  ;;  %v3431_v8 = vadd.f32 %v3410_v20, %v8151_v44 }
 0xf3c   :  { %v8368_v7 = vmul.f32 %v3430_v25, %v7432_v13  ;;  %v3414_v2 = vadd.f32 %v3413_v46, %v3317_v1  ;;  %v3415_v5 = vpop.f32.mrb[57].mxu0 }
 0xf3d   :  { %v3416_v6 = vadd.f32 %v3415_v5, %v3317_v1  ;;  %v8375_v15 = vmul.f32 %v3431_v8, %v7435_v21 }
 0xf3e   :  { %v3432_v55 = vadd.f32 %v3414_v2, %v8154_v54  ;;  %3446 = vrot.lane.b32.xlu1 %v8368_v7, %s7029_s30  ;;  %v3327_v54 = vpop.permute.xlu0 %3326 }
 0xf3f   :  { %v3419_v11 = vpop.f32.mrb[58].mxu0  ;;  %v3433_v17 = vadd.f32 %v3416_v6, %v8163_v35 }
 0xf40   :  { %v8378_v22 = vmul.f32 %v3432_v55, %v7432_v13  ;;  %v3420_v48 = vadd.f32 %v3419_v11, %v3322_v32  ;;  %v3421_v44 = vpop.f32.mrb[59].mxu0 }
 0xf41   :  { %v3422_v24 = vadd.f32 %v3421_v44, %v3322_v32  ;;  %v8387_v31 = vmul.f32 %v3433_v17, %v7435_v21 }
 0xf42   :  { %v3434_v29 = vadd.f32 %v3420_v48, %v8166_v58  ;;  %3448 = vrot.lane.b32.xlu0 %v8378_v22, %s7029_s30  ;;  %3454 = vrot.lane.b32.xlu1 %v8375_v15, %s7029_s30 }
 0xf43   :  { %v3425_v30 = vpop.f32.mrb[60].mxu0  ;;  %v3435_v35 = vadd.f32 %v3422_v24, %v8175_v61 }
 0xf44   :  { %v8390_v34 = vmul.f32 %v3434_v29, %v7432_v13  ;;  %v3426_v39 = vadd.f32 %v3425_v30, %v3327_v54  ;;  %v3427_v41 = vpop.f32.mrb[61].mxu0 }
 0xf45   :  { %v3428_v42 = vadd.f32 %v3427_v41, %v3327_v54  ;;  %v8399_v23 = vmul.f32 %v3435_v35, %v7435_v21 }
 0xf46   :  { %v3436_v58 = vadd.f32 %v3426_v39, %v8178_v37  ;;  %3456 = vrot.lane.b32.xlu0 %v8387_v31, %s7029_s30  ;;  %3450 = vrot.lane.b32.xlu1 %v8390_v34, %s7029_s30  ;;  %v6300_v37 = vld [vmem:[%s9362_s17 + $0x40] sm:$0xff] }
 0xf47   :  { %v3437_v27 = vadd.f32 %v3428_v42, %v8186_v19  ;;  %v6301_v19 = vld [vmem:[%s9362_s17 + $0x48] sm:$0xff] }
 0xf48   :  { %v8402_v43 = vmul.f32 %v3436_v58, %v7432_v13 }
 0xf49   :  { %v8410_v61 = vmul.f32 %v3437_v27, %v7435_v21 }
 0xf4a   :  { %3452 = vrot.lane.b32.xlu0 %v8402_v43, %s7029_s30  ;;  %3458 = vrot.lane.b32.xlu1 %v8399_v23, %s7029_s30 }
 0xf4e   :  { %3460 = vrot.lane.b32.xlu0 %v8410_v61, %s7029_s30  ;;  %3478 = vrot.lane.b32.xlu1 %v8368_v7, %s9394_s0 }
 0xf52   :  { %3480 = vrot.lane.b32.xlu0 %v8378_v22, %s9394_s0  ;;  %3486 = vrot.lane.b32.xlu1 %v8375_v15, %s9394_s0 }
 0xf56   :  { %3488 = vrot.lane.b32.xlu0 %v8387_v31, %s9394_s0  ;;  %3482 = vrot.lane.b32.xlu1 %v8390_v34, %s9394_s0 }
 0xf5a   :  { %3484 = vrot.lane.b32.xlu0 %v8402_v43, %s9394_s0  ;;  %3490 = vrot.lane.b32.xlu1 %v8399_v23, %s9394_s0 }
 0xf5e   :  { %3492 = vrot.lane.b32.xlu0 %v8410_v61, %s9394_s0  ;;  %3843 = vperm.xlu1 %6930, %v6300_v37  }
 0xf62   :  { %3848 = vperm.xlu0 %6929, %v6301_v19   ;;  %3853 = vperm.xlu1 %6930, %v6302_v49  }
 0xf66   :  { %3858 = vperm.xlu0 %6929, %v6303_v28   ;;  %3889 = vperm.xlu1 %6930, %v6308_v56   ;;  %v6632_v56 = vpack.c.bf16 %v8387_v31, %v8375_v15 }
 0xf6a   :  { %3894 = vperm.xlu0 %6929, %v6309_v47   ;;  %3899 = vperm.xlu1 %6930, %v6310_v57   ;;  %v6280_v47 = vld [vmem:[%s9359_s14 + $0x40] sm:$0xff] }
 0xf6e   :  { %3904 = vperm.xlu0 %6929, %v6311_v33   ;;  %4028 = vperm.xlu1 %6930, %v4025_v10  }
 0xf72   :  { %4159 = vperm.xlu0 %6929, %v6321_v63   ;;  %4164 = vperm.xlu1 %6930, %v6322_v12   ;;  %v6634_v63 = vpack.c.bf16 %v8378_v22, %v8368_v7 }
 0xf76   :  { %4169 = vperm.xlu0 %6929, %v6323_v36   ;;  %4174 = vperm.xlu1 %6930, %v6324_v59   ;;  %v6636_v36 = vpack.c.bf16 %v8410_v61, %v8399_v23  ;;  %v6281_v59 = vld [vmem:[%s9359_s14 + $0x48] sm:$0xff] }
 0xfb0   :  { %v3447_v60 = vpop.permute.xlu1 %3446 }
 0xfb4   :  { %v3449_v14 = vpop.permute.xlu0 %3448  ;;  %v3455_v62 = vpop.permute.xlu1 %3454 }
 0xfb5   :  { %v3462_v20 = vsel %vm1480_vm12, %v3447_v60, %v3455_v62  ;;  %v3466_v25 = vsel %vm1480_vm12, %v3455_v62, %v3447_v60 }
 0xfb6   :  { %v3470_v5 = vmul.f32 %v7762_v18, %v3466_v25  ;;  %v3471_v6 = vmul.f32 %v7765_v38, %v3462_v20  ;;  %v6638_v20 = vpack.c.bf16 %v8402_v43, %v8390_v34 }
 0xfb8   :  { %v3457_v1 = vpop.permute.xlu0 %3456  ;;  %v3451_v46 = vpop.permute.xlu1 %3450 }
 0xfb9   :  { %v3463_v8 = vsel %vm1480_vm12, %v3449_v14, %v3457_v1  ;;  %v3467_v2 = vsel %vm1480_vm12, %v3457_v1, %v3449_v14  ;;  %v6282_v1 = vld [vmem:[%s9359_s14 + $0x50] sm:$0xff] }
 0xfba   :  { %v3472_v55 = vmul.f32 %v7762_v18, %v3467_v2  ;;  %v3473_v32 = vmul.f32 %v7765_v38, %v3463_v8 }
 0xfbc   :  { %v6626_v11 = vpack.c.bf16 %v3472_v55, %v3470_v5  ;;  %v3453_v17 = vpop.permute.xlu0 %3452  ;;  %v3459_v48 = vpop.permute.xlu1 %3458  ;;  %v6624_v44 = vpack.c.bf16 %v3473_v32, %v3471_v6  ;;  %v6283_v6 = vld [vmem:[%s9359_s14 + $0x58] sm:$0xff] }
 0xfbd   :  { %v3464_v24 = vsel %vm1480_vm12, %v3451_v46, %v3459_v48  ;;  %v3468_v29 = vsel %vm1480_vm12, %v3459_v48, %v3451_v46 }
 0xfbe   :  { %6625 = vmatprep.subr.bf16.mxu0 %v6624_v44  ;;  %v3474_v41 = vmul.f32 %v7762_v18, %v3468_v29  ;;  %v3475_v42 = vmul.f32 %v7765_v38, %v3464_v24  ;;  %v6276_v24 = vld [vmem:[%s9360_s15 + $0x40] sm:$0xff] }
 0xfbf   :  { %6627 = vmatpush1.bf16.msra.mxu0 %v6626_v11 }
 0xfc0   :  { %v3461_v54 = vpop.permute.xlu0 %3460  ;;  %v3479_v30 = vpop.permute.xlu1 %3478 }
 0xfc1   :  { %v3465_v35 = vsel %vm1480_vm12, %v3453_v17, %v3461_v54  ;;  %v3469_v39 = vsel %vm1480_vm12, %v3461_v54, %v3453_v17 }
 0xfc2   :  { %v3476_v58 = vmul.f32 %v7762_v18, %v3469_v39  ;;  %v3477_v27 = vmul.f32 %v7765_v38, %v3465_v35 }
 0xfc4   :  { %v6630_v37 = vpack.c.bf16 %v3476_v58, %v3474_v41  ;;  %v3481_v19 = vpop.permute.xlu0 %3480  ;;  %v6628_v49 = vpack.c.bf16 %v3477_v27, %v3475_v42  ;;  %v3487_v28 = vpop.permute.xlu1 %3486  ;;  %v6277_v42 = vld [vmem:[%s9360_s15 + $0x48] sm:$0xff]  ;;  %v6278_v27 = vld [vmem:[%s9360_s15 + $0x50] sm:$0xff] }
 0xfc5   :  { %v3498_v33 = vsel %vm158_vm15, %v3487_v28, %v3479_v30  ;;  %v3494_v55 = vsel %vm158_vm15, %v3479_v30, %v3487_v28  ;;  %v6294_v28 = vld [vmem:[%s9361_s16 + $0x50] sm:$0xff] }
 0xfc6   :  { %6629 = vmatprep.subr.bf16.mxu0 %v6628_v49  ;;  %v3503_v60 = vmul.f32 %v7799_v16, %v3498_v33  ;;  %v3502_v44 = vmul.f32 %v7835_v50, %v3494_v55  ;;  %v6293_v49 = vld [vmem:[%s9361_s16 + $0x48] sm:$0xff] }
 0xfc7   :  { %6631 = vmatpush1.bf16.msra.mxu0 %v6630_v37  ;;  %v6279_v37 = vld [vmem:[%s9360_s15 + $0x58] sm:$0xff] }
 0xfc8   :  { %v3489_v57 = vpop.permute.xlu0 %3488  ;;  %6633 = vmatprep.subr.bf16.mxu0 %v6632_v56  ;;  %v3483_v14 = vpop.permute.xlu1 %3482  ;;  %v6295_v56 = vld [vmem:[%s9361_s16 + $0x58] sm:$0xff] }
 0xfc9   :  { %v3499_v10 = vsel %vm158_vm15, %v3489_v57, %v3481_v19  ;;  %v3495_v8 = vsel %vm158_vm15, %v3481_v19, %v3489_v57  ;;  %v6292_v19 = vld [vmem:[%s9361_s16 + $0x40] sm:$0xff] }
 0xfca   :  { %v3505_v12 = vmul.f32 %v7799_v16, %v3499_v10  ;;  %6284 = vmatmul.mubr.msk.f32.vlgmr.msra.gmra.mrb[62].mxu0 %vm372_vm6, %v6280_v47  ;;  %v3504_v32 = vmul.f32 %v7835_v50, %v3495_v8 }
 0xfcb   :  { %6635 = vmatpush1.bf16.msra.mxu0 %v6634_v63  ;;  %3602 = vmatprep.mubr.f32.mxu0 %v7023_v0 }
 0xfcc   :  { %v3485_v62 = vpop.permute.xlu0 %3484  ;;  %6637 = vmatprep.subr.bf16.mxu0 %v6636_v36  ;;  %v6640_v25 = vpack.c.bf16 %v3505_v12, %v3503_v60  ;;  %v3491_v2 = vpop.permute.xlu1 %3490  ;;  %v6642_v30 = vpack.c.bf16 %v3504_v32, %v3502_v44 }
 0xfcd   :  { %v3500_v11 = vsel %vm158_vm15, %v3491_v2, %v3483_v14  ;;  %v3496_v29 = vsel %vm158_vm15, %v3483_v14, %v3491_v2 }
 0xfce   :  { %6285 = vmatmul.mubr.msk.f32.gmra.mrb[64].mxu0 %vm372_vm6, %v6281_v59  ;;  %v3507_v54 = vmul.f32 %v7799_v16, %v3500_v11  ;;  %v3506_v41 = vmul.f32 %v7835_v50, %v3496_v29 }
 0xfcf   :  { %6639 = vmatpush1.bf16.msra.mxu0 %v6638_v20  ;;  %3608 = vmatprep.mubr.f32.mxu0 %v7023_v0 }
 0xfd0   :  { %v3493_v46 = vpop.permute.xlu0 %3492  ;;  %6641 = vmatprep.subr.bf16.mxu0 %v6640_v25 }
 0xfd1   :  { %v3501_v5 = vsel %vm158_vm15, %v3493_v46, %v3485_v62  ;;  %v3497_v17 = vsel %vm158_vm15, %v3485_v62, %v3493_v46 }
 0xfd2   :  { %6286 = vmatmul.mubr.msk.f32.gmra.mrb[66].mxu0 %vm372_vm6, %v6282_v1  ;;  %v3509_v48 = vmul.f32 %v7799_v16, %v3501_v5  ;;  %v3508_v35 = vmul.f32 %v7835_v50, %v3497_v17 }
 0xfd3   :  { %3614 = vmatprep.mubr.f32.mxu0 %v7023_v0 }
 0xfd4   :  { %v6644_v39 = vpack.c.bf16 %v3509_v48, %v3507_v54  ;;  %v6646_v58 = vpack.c.bf16 %v3508_v35, %v3506_v41 }
 0xfd6   :  { %6287 = vmatmul.mubr.msk.f32.gmra.mrb[68].mxu0 %vm372_vm6, %v6283_v6 }
 0xfd7   :  { %3697 = vmatprep.mubr.f32.mxu0 %v7023_v0 }
 0xfda   :  { %6288 = vmatmul.mubr.msk.f32.vlgmr.msra.gmra.mrb[62].mxu0 %vm372_vm6, %v6276_v24 }
 0xfdb   :  { %6643 = vmatpush1.bf16.msra.mxu0 %v6642_v30  ;;  %3703 = vmatprep.mubr.f32.mxu0 %v7023_v0 }
 0xfdc   :  { %6645 = vmatprep.subr.bf16.mxu0 %v6644_v39 }
 0xfdd   :  { %v3844_v33 = vpop.permute.xlu1 %3843 }
 0xfde   :  { %6289 = vmatmul.mubr.msk.f32.gmra.mrb[64].mxu0 %vm372_vm6, %v6277_v42  ;;  %v6304_v42 = vld [vmem:[%s9363_s18 + $0x40] sm:$0xff] }
 0xfdf   :  { %6647 = vmatpush1.bf16.msra.mxu0 %v6646_v58  ;;  %3709 = vmatprep.mubr.f32.mxu0 %v7023_v0  ;;  %v6305_v58 = vld [vmem:[%s9363_s18 + $0x48] sm:$0xff] }
 0xfe1   :  { %v3849_v63 = vpop.permute.xlu0 %3848  ;;  %v3854_v5 = vpop.permute.xlu1 %3853 }
 0xfe2   :  { %6290 = vmatmul.mubr.msk.f32.gmra.mrb[66].mxu0 %vm372_vm6, %v6278_v27  ;;  %v6306_v27 = vld [vmem:[%s9363_s18 + $0x50] sm:$0xff] }
 0xfe3   :  { %3715 = vmatprep.mubr.f32.mxu0 %v7023_v0 }
 0xfe5   :  { %v3859_v32 = vpop.permute.xlu0 %3858 }
 0xfe6   :  { %6291 = vmatmul.mubr.msk.f32.gmra.mrb[68].mxu0 %vm372_vm6, %v6279_v37  ;;  %v6307_v37 = vld [vmem:[%s9363_s18 + $0x58] sm:$0xff] }
 0xfe7   :  { %3803 = vmatprep.mubr.f32.mxu0 %v7023_v0 }
 0xfea   :  { %6296 = vmatmul.mubr.msk.f32.vlgmr.msra.gmra.mrb[62].mxu0 %vm372_vm6, %v6292_v19  ;;  %v3890_v19 = vpop.permute.xlu1 %3889 }
 0xfeb   :  { %3809 = vmatprep.mubr.f32.mxu0 %v7023_v0 }
 0xfee   :  { %6297 = vmatmul.mubr.msk.f32.gmra.mrb[64].mxu0 %vm372_vm6, %v6293_v49 }
 0xfef   :  { %3815 = vmatprep.mubr.f32.mxu0 %v7023_v0 }
 0xff2   :  { %6298 = vmatmul.mubr.msk.f32.gmra.mrb[66].mxu0 %vm372_vm6, %v6294_v28 }
 0xff3   :  { %3821 = vmatprep.mubr.f32.mxu0 %v7023_v0 }
 0xff6   :  { %6299 = vmatmul.mubr.msk.f32.gmra.mrb[68].mxu0 %vm372_vm6, %v6295_v56 }
 0xff7   :  { %4815 = vmatprep.mubr.f32.mxu0 %v7023_v0 }
0x10bd   :  { %v3805_v47 = vpop.f32.mrb[62].mxu0 }
0x10be   :  { %v3807_v57 = vpop.f32.mrb[63].mxu0  ;;  %v3861_v10 = vadd.f32 %v3844_v33, %v3805_v47 }
0x10bf   :  { %v3862_v12 = vadd.f32 %v3844_v33, %v3807_v57  ;;  %v3895_v57 = vpop.permute.xlu0 %3894 }
0x10c0   :  { %v3869_v62 = vmax.f32 %v3861_v10, 0.0 }
0x10c1   :  { %v3811_v36 = vpop.f32.mrb[64].mxu0  ;;  %v3870_v25 = vmax.f32 %v3862_v12, 0.0 }
0x10c2   :  { %v3863_v59 = vadd.f32 %v3849_v63, %v3811_v36  ;;  %v3813_v60 = vpop.f32.mrb[65].mxu0 }
0x10c3   :  { %v3864_v14 = vadd.f32 %v3849_v63, %v3813_v60 }
0x10c4   :  { %v3871_v20 = vmax.f32 %v3863_v59, 0.0 }
0x10c5   :  { %v3872_v1 = vmax.f32 %v3864_v14, 0.0  ;;  %v3817_v46 = vpop.f32.mrb[66].mxu0  ;;  %v3900_v14 = vpop.permute.xlu1 %3899 }
0x10c6   :  { %v6650_v8 = vpack.c.bf16 %v3871_v20, %v3869_v62  ;;  %v3819_v2 = vpop.f32.mrb[67].mxu0  ;;  %v3865_v55 = vadd.f32 %v3854_v5, %v3817_v46 }
0x10c7   :  { %v6648_v6 = vpack.c.bf16 %v3872_v1, %v3870_v25  ;;  %v3866_v11 = vadd.f32 %v3854_v5, %v3819_v2 }
0x10c8   :  { %v3873_v29 = vmax.f32 %v3865_v55, 0.0 }
0x10c9   :  { %v3823_v17 = vpop.f32.mrb[68].mxu0  ;;  %6649 = vmatprep.subr.bf16.mxu1 %v6648_v6  ;;  %v3874_v30 = vmax.f32 %v3866_v11, 0.0 }
0x10ca   :  { %v3867_v48 = vadd.f32 %v3859_v32, %v3823_v17  ;;  %v3825_v44 = vpop.f32.mrb[69].mxu0  ;;  %6651 = vmatpush1.bf16.msra.mxu1 %v6650_v8 }
0x10cb   :  { %v3868_v24 = vadd.f32 %v3859_v32, %v3825_v44 }
0x10cc   :  { %v3875_v54 = vmax.f32 %v3867_v48, 0.0 }
0x10cd   :  { %v3876_v35 = vmax.f32 %v3868_v24, 0.0 }
0x10ce   :  { %v6654_v39 = vpack.c.bf16 %v3875_v54, %v3873_v29 }
0x10cf   :  { %v6652_v41 = vpack.c.bf16 %v3876_v35, %v3874_v30 }
0x10d1   :  { %6653 = vmatprep.subr.bf16.mxu1 %v6652_v41 }
0x10d2   :  { %6655 = vmatpush1.bf16.msra.mxu1 %v6654_v39 }
0x10d5   :  { %6312 = vmatmul.mubr.msk.f32.vlgmr.msra.gmra.mrb[40].mxu1 %vm372_vm6, %v6304_v42 }
0x10d6   :  { %3989 = vmatprep.mubr.f32.mxu1 %v7023_v0 }
0x10d9   :  { %6313 = vmatmul.mubr.msk.f32.gmra.mrb[42].mxu1 %vm372_vm6, %v6305_v58 }
0x10da   :  { %3995 = vmatprep.mubr.f32.mxu1 %v7023_v0 }
0x10dd   :  { %6314 = vmatmul.mubr.msk.f32.gmra.mrb[44].mxu1 %vm372_vm6, %v6306_v27 }
0x10de   :  { %4001 = vmatprep.mubr.f32.mxu1 %v7023_v0 }
0x10e1   :  { %6315 = vmatmul.mubr.msk.f32.gmra.mrb[46].mxu1 %vm372_vm6, %v6307_v37 }
0x10e2   :  { %4098 = vmatprep.mubr.f32.mxu1 %v7023_v0 }
0x11a8   :  { %v3985_v49 = vpop.f32.mrb[40].mxu1 }
0x11a9   :  { %v3986_v28 = vadd.f32 %v3985_v49, %v3890_v19  ;;  %v3987_v56 = vpop.f32.mrb[41].mxu1 }
0x11aa   :  { %v3988_v47 = vadd.f32 %v3987_v56, %v3890_v19 }
0x11ab   :  { %v4008_v10 = vadd.f32 %v3986_v28, %v8368_v7 }
0x11ac   :  { %v3991_v33 = vpop.f32.mrb[42].mxu1  ;;  %v4009_v36 = vadd.f32 %v3988_v47, %v8375_v15  ;;  %v3905_v15 = vpop.permute.xlu0 %3904 }
0x11ad   :  { %v3992_v63 = vadd.f32 %v3991_v33, %v3895_v57  ;;  %v3993_v12 = vpop.f32.mrb[43].mxu1  ;;  %v4016_v25 = vmul.f32 %v4008_v10, %v7432_v13 }
0x11ae   :  { %v3994_v59 = vadd.f32 %v3993_v12, %v3895_v57  ;;  %v4017_v2 = vmul.f32 %v4009_v36, %v7435_v21 }
0x11af   :  { %v4010_v60 = vadd.f32 %v3992_v63, %v8378_v22 }
0x11b0   :  { %v4011_v62 = vadd.f32 %v3994_v59, %v8387_v31  ;;  %v3997_v20 = vpop.f32.mrb[44].mxu1 }
0x11b1   :  { %v4018_v1 = vmul.f32 %v4010_v60, %v7432_v13  ;;  %v3998_v46 = vadd.f32 %v3997_v20, %v3900_v14  ;;  %v3999_v8 = vpop.f32.mrb[45].mxu1 }
0x11b2   :  { %v4019_v7 = vmul.f32 %v4011_v62, %v7435_v21  ;;  %v4000_v5 = vadd.f32 %v3999_v8, %v3900_v14 }
0x11b3   :  { %v6658_v6 = vpack.c.bf16 %v4018_v1, %v4016_v25  ;;  %v4012_v22 = vadd.f32 %v3998_v46, %v8390_v34 }
0x11b4   :  { %v4003_v55 = vpop.f32.mrb[46].mxu1  ;;  %v6656_v32 = vpack.c.bf16 %v4019_v7, %v4017_v2  ;;  %v4013_v17 = vadd.f32 %v4000_v5, %v8399_v23  ;;  %v4024_v23 = vld [vmem:[%s9365_s20] sm:$0xff] }
0x11b5   :  { %v4004_v11 = vadd.f32 %v4003_v55, %v3905_v15  ;;  %v4005_v31 = vpop.f32.mrb[47].mxu1  ;;  %v4020_v29 = vmul.f32 %v4012_v22, %v7432_v13 }
0x11b6   :  { %v4006_v48 = vadd.f32 %v4005_v31, %v3905_v15  ;;  %6657 = vmatprep.subr.bf16.mxu1 %v6656_v32  ;;  %v4021_v30 = vmul.f32 %v4013_v17, %v7435_v21 }
0x11b7   :  { %v4014_v44 = vadd.f32 %v4004_v11, %v8402_v43  ;;  %6659 = vmatpush1.bf16.msra.mxu1 %v6658_v6  ;;  %v4029_v43 = vpop.permute.xlu1 %4028 }
0x11b8   :  { %v4015_v24 = vadd.f32 %v4006_v48, %v8410_v61 }
0x11b9   :  { %v4022_v54 = vmul.f32 %v4014_v44, %v7432_v13 }
0x11ba   :  { %v4023_v35 = vmul.f32 %v4015_v24, %v7435_v21 }
0x11bb   :  { %v6662_v34 = vpack.c.bf16 %v4022_v54, %v4020_v29 }
0x11bc   :  { %v6660_v39 = vpack.c.bf16 %v4023_v35, %v4021_v30  ;;  %v6317_v30 = vld [vmem:[%s9357_s12 + $0x20] sm:$0xff]  ;;  %v6318_v35 = vld [vmem:[%s9357_s12 + $0x28] sm:$0xff] }
0x11be   :  { %6661 = vmatprep.subr.bf16.mxu1 %v6660_v39  ;;  %v6320_v39 = vld [vmem:[%s9357_s12 + $0x38] sm:$0xff] }
0x11bf   :  { %6663 = vmatpush1.bf16.msra.mxu1 %v6662_v34  ;;  %v6319_v34 = vld [vmem:[%s9357_s12 + $0x30] sm:$0xff] }
0x11c2   :  { %6316 = vmatmul.mubr.msk.f32.vlgmr.msra.gmra.mrb[48].mxu1 %vm372_vm6, %v4024_v23  ;;  %v4160_v23 = vpop.permute.xlu0 %4159 }
0x11c3   :  { %4253 = vmatprep.mubr.f32.mxu1 %v7023_v0 }
0x1295   :  { %v4100_v61 = vpop.f32.mrb[48].mxu1 }
0x1296   :  { %v4101_v41 = vadd.f32 %v4100_v61, %v4029_v43  ;;  %v4102_v42 = vpop.f32.mrb[49].mxu1 }
0x1297   :  { %v4103_v58 = vadd.f32 %v4102_v42, %v4029_v43  ;;  %v4165_v42 = vpop.permute.xlu1 %4164 }
0x1298   :  { %v4105_v27 = vmul.f32 %v4101_v41, %v7432_v13 }
0x1299   :  { %v4106_v37 = vmul.f32 %v4103_v58, %v7435_v21 }
0x129a   :  { %4108 = vst [vmem:[#allocation7 + $0x10] sm:$0xff] %v4105_v27  ;;  %v4111_v19 = vrot.slane %v4105_v27, 4 }
0x129b   :  { %4110 = vst [vmem:[#allocation7 + $0x18] sm:$0xff] %v4106_v37  ;;  %v4117_v49 = vrot.slane %v4106_v37, 4 }
0x129c   :  { %v4112_v28 = vmax.f32 %v4105_v27, %v4111_v19 }
0x129d   :  { %v4118_v56 = vmax.f32 %v4106_v37, %v4117_v49  ;;  %v4170_v49 = vpop.permute.xlu0 %4169 }
0x129e   :  { %v4113_v47 = vrot.slane %v4112_v28, 2 }
0x129f   :  { %v4119_v57 = vrot.slane %v4118_v56, 2 }
0x12a0   :  { %v4114_v33 = vmax.f32 %v4112_v28, %v4113_v47 }
0x12a1   :  { %v4120_v10 = vmax.f32 %v4118_v56, %v4119_v57 }
0x12a2   :  { %v4115_v63 = vrot.slane %v4114_v33, 1 }
0x12a3   :  { %v4121_v12 = vrot.slane %v4120_v10, 1 }
0x12a4   :  { %v4116_v36 = vmax.f32 %v4114_v33, %v4115_v63  ;;  %v4175_v33 = vpop.permute.xlu1 %4174 }
0x12a5   :  { %v4122_v59 = vmax.f32 %v4120_v10, %v4121_v12 }
0x12a6   :  { %v4123_v60 = vsub.f32 %v4105_v27, %v4116_v36 }
0x12a7   :  { %v4124_v14 = vsub.f32 %v4106_v37, %v4122_v59 }
0x12a8   :  { %v4125_v62 = vmul.f32 1.442695, %v4123_v60  ;;  %v6353_v60 = vld [vmem:[%s9362_s17 + $0x60] sm:$0xff] }
0x12a9   :  { %v4127_v20 = vmul.f32 1.442695, %v4124_v14  ;;  %v6354_v14 = vld [vmem:[%s9362_s17 + $0x68] sm:$0xff] }
0x12aa   :  { %6939 = vpow2.f32 %v4125_v62  ;;  %v6355_v62 = vld [vmem:[%s9362_s17 + $0x70] sm:$0xff] }
0x12ab   :  { %6941 = vpow2.f32 %v4127_v20  ;;  %v6356_v20 = vld [vmem:[%s9362_s17 + $0x78] sm:$0xff] }
0x12b4   :  { %v6940_v25 = vpop.eup %6939 }
0x12b5   :  { %v6942_v1 = vpop.eup %6941  ;;  %v4129_v46 = vrot.slane %v6940_v25, 4 }
0x12b6   :  { %v4135_v8 = vrot.slane %v6942_v1, 4 }
0x12b7   :  { %v4130_v2 = vadd.f32 %v6940_v25, %v4129_v46  ;;  %v6363_v46 = vld [vmem:[%s9364_s19 + $0x70] sm:$0xff] }
0x12b8   :  { %v4136_v7 = vadd.f32 %v6942_v1, %v4135_v8  ;;  %v6364_v8 = vld [vmem:[%s9364_s19 + $0x78] sm:$0xff] }
0x12b9   :  { %v4131_v5 = vrot.slane %v4130_v2, 2 }
0x12ba   :  { %v4137_v6 = vrot.slane %v4136_v7, 2 }
0x12bb   :  { %v4132_v15 = vadd.f32 %v4131_v5, %v4130_v2 }
0x12bc   :  { %v4138_v55 = vadd.f32 %v4137_v6, %v4136_v7 }
0x12bd   :  { %v4133_v32 = vrot.slane %v4132_v15, 1 }
0x12be   :  { %v4139_v22 = vrot.slane %v4138_v55, 1 }
0x12bf   :  { %v4134_v11 = vadd.f32 %v4133_v32, %v4132_v15 }
0x12c0   :  { %v4140_v31 = vadd.f32 %v4139_v22, %v4138_v55 }
0x12c1   :  { %6943 = vrcp.f32 %v4134_v11 }
0x12c2   :  { %6945 = vrcp.f32 %v4140_v31 }
0x12cb   :  { %v6944_v17 = vpop.eup %6943 }
0x12cc   :  { %v6946_v48 = vpop.eup %6945  ;;  %v4143_v44 = vmul.f32 %v6944_v17, %v6940_v25  ;;  %v6361_v25 = vld [vmem:[%s9364_s19 + $0x60] sm:$0xff] }
0x12cd   :  { %v4144_v24 = vmul.f32 %v6946_v48, %v6942_v1  ;;  %v6362_v1 = vld [vmem:[%s9364_s19 + $0x68] sm:$0xff] }
0x12ce   :  { %v4145_v54 = vmul.f32 %v4143_v44, %v7432_v13 }
0x12cf   :  { %v4146_v29 = vmul.f32 %v4144_v24, %v7435_v21 }
0x12d1   :  { %4189 = vmatprep.subr.mxu1 %v4146_v29 }
0x12d2   :  { %4190 = vmatpush1.msra.mxu1 %v4145_v54 }
0x12d3   :  { %6325 = vmatmul.mubr.msk.f32.vlgmr.msra.gmra.mrb[50].mxu1 %vm2194_vm1, %v6317_v30 }
0x12d4   :  { %4259 = vmatprep.mubr.f32.mxu1 %v7023_v0 }
0x12d7   :  { %6326 = vmatmul.mubr.msk.f32.gmra.mrb[52].mxu1 %vm2194_vm1, %v6318_v35 }
0x12d8   :  { %4265 = vmatprep.mubr.f32.mxu1 %v7023_v0 }
0x12db   :  { %6327 = vmatmul.mubr.msk.f32.gmra.mrb[54].mxu1 %vm2194_vm1, %v6319_v34 }
0x12dc   :  { %4271 = vmatprep.mubr.f32.mxu1 %v7023_v0 }
0x12df   :  { %6328 = vmatmul.mubr.msk.f32.gmra.mrb[56].mxu1 %vm2194_vm1, %v6320_v39 }
0x12e0   :  { %4428 = vmatprep.mubr.f32.mxu1 %v7023_v0 }
0x13a6   :  { %v4255_v43 = vpop.f32.mrb[50].mxu1 }
0x13a7   :  { %v8650_v61 = vadd.f32 %v4255_v43, %v4160_v23  ;;  %v4257_v41 = vpop.f32.mrb[51].mxu1 }
0x13a8   :  { %v8654_v27 = vadd.f32 %v4257_v41, %v4160_v23 }
0x13a9   :  { %4278 = vrot.lane.b32.xlu0 %v8650_v61, %s7025_s6 }
0x13aa   :  { %v4261_v58 = vpop.f32.mrb[52].mxu1 }
0x13ab   :  { %v8656_v37 = vadd.f32 %v4261_v58, %v4165_v42  ;;  %v4263_v19 = vpop.f32.mrb[53].mxu1 }
0x13ac   :  { %v8662_v56 = vadd.f32 %v4263_v19, %v4165_v42 }
0x13ad   :  { %4280 = vrot.lane.b32.xlu1 %v8656_v37, %s7025_s6  ;;  %4286 = vrot.lane.b32.xlu0 %v8654_v27, %s7025_s6 }
0x13ae   :  { %v4267_v28 = vpop.f32.mrb[54].mxu1 }
0x13af   :  { %v8664_v47 = vadd.f32 %v4267_v28, %v4170_v49  ;;  %v4269_v57 = vpop.f32.mrb[55].mxu1 }
0x13b0   :  { %v8670_v63 = vadd.f32 %v4269_v57, %v4170_v49 }
0x13b1   :  { %4288 = vrot.lane.b32.xlu1 %v8662_v56, %s7025_s6  ;;  %4282 = vrot.lane.b32.xlu0 %v8664_v47, %s7025_s6 }
0x13b2   :  { %v4273_v10 = vpop.f32.mrb[56].mxu1 }
0x13b3   :  { %v8672_v12 = vadd.f32 %v4273_v10, %v4175_v33  ;;  %v4275_v36 = vpop.f32.mrb[57].mxu1 }
0x13b4   :  { %v8678_v59 = vadd.f32 %v4275_v36, %v4175_v33  ;;  %v6672_v36 = vpack.c.bf16 %v8662_v56, %v8654_v27 }
0x13b5   :  { %4284 = vrot.lane.b32.xlu1 %v8672_v12, %s7025_s6  ;;  %4290 = vrot.lane.b32.xlu0 %v8670_v63, %s7025_s6 }
0x13b9   :  { %4292 = vrot.lane.b32.xlu1 %v8678_v59, %s7025_s6  ;;  %4310 = vrot.lane.b32.xlu0 %v8650_v61, %s7026_s28 }
0x13bd   :  { %4312 = vrot.lane.b32.xlu1 %v8656_v37, %s7026_s28  ;;  %4318 = vrot.lane.b32.xlu0 %v8654_v27, %s7026_s28 }
0x13c1   :  { %4320 = vrot.lane.b32.xlu1 %v8662_v56, %s7026_s28  ;;  %4314 = vrot.lane.b32.xlu0 %v8664_v47, %s7026_s28 }
0x13c5   :  { %4316 = vrot.lane.b32.xlu1 %v8672_v12, %s7026_s28  ;;  %4322 = vrot.lane.b32.xlu0 %v8670_v63, %s7026_s28 }
0x13c9   :  { %4324 = vrot.lane.b32.xlu1 %v8678_v59, %s7026_s28  ;;  %4675 = vperm.xlu0 %6929, %v6353_v60   ;;  %v6333_v60 = vld [vmem:[%s9359_s14 + $0x60] sm:$0xff] }
0x13cd   :  { %4680 = vperm.xlu1 %6930, %v6354_v14   ;;  %4685 = vperm.xlu0 %6929, %v6355_v62   ;;  %v6674_v62 = vpack.c.bf16 %v8656_v37, %v8650_v61 }
0x13d1   :  { %4690 = vperm.xlu1 %6930, %v6356_v20   ;;  %4721 = vperm.xlu0 %6929, %v6361_v25   ;;  %v6676_v25 = vpack.c.bf16 %v8678_v59, %v8670_v63 }
0x13d5   :  { %4726 = vperm.xlu1 %6930, %v6362_v1   ;;  %4731 = vperm.xlu0 %6929, %v6363_v46   ;;  %v6334_v1 = vld [vmem:[%s9359_s14 + $0x68] sm:$0xff] }
0x13d9   :  { %4736 = vperm.xlu1 %6930, %v6364_v8  }
0x141b   :  { %v4279_v2 = vpop.permute.xlu0 %4278 }
0x141f   :  { %v4281_v7 = vpop.permute.xlu1 %4280  ;;  %v4287_v5 = vpop.permute.xlu0 %4286 }
0x1420   :  { %v4294_v6 = vsel %vm314_vm3, %v4279_v2, %v4287_v5  ;;  %v4298_v15 = vsel %vm314_vm3, %v4287_v5, %v4279_v2 }
0x1421   :  { %v4302_v31 = vmul.f32 %v7301_v51, %v4298_v15  ;;  %v4303_v17 = vmul.f32 %v7304_v52, %v4294_v6  ;;  %v6335_v6 = vld [vmem:[%s9359_s14 + $0x70] sm:$0xff] }
0x1423   :  { %v4289_v55 = vpop.permute.xlu1 %4288  ;;  %v4283_v32 = vpop.permute.xlu0 %4282 }
0x1424   :  { %v4295_v22 = vsel %vm314_vm3, %v4281_v7, %v4289_v55  ;;  %v4299_v11 = vsel %vm314_vm3, %v4289_v55, %v4281_v7  ;;  %v6678_v7 = vpack.c.bf16 %v8672_v12, %v8664_v47 }
0x1425   :  { %v4304_v48 = vmul.f32 %v7301_v51, %v4299_v11  ;;  %v4305_v44 = vmul.f32 %v7304_v52, %v4295_v22  ;;  %v6336_v11 = vld [vmem:[%s9359_s14 + $0x78] sm:$0xff] }
0x1427   :  { %v6666_v24 = vpack.c.bf16 %v4304_v48, %v4302_v31  ;;  %v4285_v29 = vpop.permute.xlu1 %4284  ;;  %v4291_v54 = vpop.permute.xlu0 %4290  ;;  %v6664_v30 = vpack.c.bf16 %v4305_v44, %v4303_v17 }
0x1428   :  { %v4296_v35 = vsel %vm314_vm3, %v4283_v32, %v4291_v54  ;;  %v4300_v34 = vsel %vm314_vm3, %v4291_v54, %v4283_v32  ;;  %v6329_v54 = vld [vmem:[%s9360_s15 + $0x60] sm:$0xff] }
0x1429   :  { %6665 = vmatprep.subr.bf16.mxu1 %v6664_v30  ;;  %v4306_v42 = vmul.f32 %v7301_v51, %v4300_v34  ;;  %v4307_v58 = vmul.f32 %v7304_v52, %v4296_v35 }
0x142a   :  { %6667 = vmatpush1.bf16.msra.mxu1 %v6666_v24 }
0x142b   :  { %v4293_v39 = vpop.permute.xlu1 %4292  ;;  %v4311_v23 = vpop.permute.xlu0 %4310 }
0x142c   :  { %v4297_v43 = vsel %vm314_vm3, %v4285_v29, %v4293_v39  ;;  %v4301_v41 = vsel %vm314_vm3, %v4293_v39, %v4285_v29 }
0x142d   :  { %v4308_v19 = vmul.f32 %v7301_v51, %v4301_v41  ;;  %v4309_v49 = vmul.f32 %v7304_v52, %v4297_v43  ;;  %v6330_v41 = vld [vmem:[%s9360_s15 + $0x68] sm:$0xff] }
0x142f   :  { %v6670_v28 = vpack.c.bf16 %v4308_v19, %v4306_v42  ;;  %v4313_v57 = vpop.permute.xlu1 %4312  ;;  %v6668_v33 = vpack.c.bf16 %v4309_v49, %v4307_v58  ;;  %v4319_v10 = vpop.permute.xlu0 %4318  ;;  %v6345_v58 = vld [vmem:[%s9361_s16 + $0x60] sm:$0xff]  ;;  %v6346_v19 = vld [vmem:[%s9361_s16 + $0x68] sm:$0xff]  ;;  %v6347_v49 = vld [vmem:[%s9361_s16 + $0x70] sm:$0xff] }
0x1430   :  { %v4330_v51 = vsel %vm146_vm4, %v4319_v10, %v4311_v23  ;;  %v4326_v31 = vsel %vm146_vm4, %v4311_v23, %v4319_v10 }
0x1431   :  { %6669 = vmatprep.subr.bf16.mxu1 %v6668_v33  ;;  %v4335_v46 = vmul.f32 %v7341_v26, %v4330_v51  ;;  %v4334_v29 = vmul.f32 %v7366_v40, %v4326_v31 }
0x1432   :  { %6671 = vmatpush1.bf16.msra.mxu1 %v6670_v28  ;;  %v6348_v28 = vld [vmem:[%s9361_s16 + $0x78] sm:$0xff] }
0x1433   :  { %v4321_v14 = vpop.permute.xlu1 %4320  ;;  %6673 = vmatprep.subr.bf16.mxu1 %v6672_v36  ;;  %v4315_v8 = vpop.permute.xlu0 %4314 }
0x1434   :  { %v4331_v52 = vsel %vm146_vm4, %v4321_v14, %v4313_v57  ;;  %v4327_v55 = vsel %vm146_vm4, %v4313_v57, %v4321_v14 }
0x1435   :  { %v4337_v20 = vmul.f32 %v7341_v26, %v4331_v52  ;;  %6337 = vmatmul.mubr.msk.f32.vlgmr.msra.gmra.mrb[58].mxu1 %vm372_vm6, %v6333_v60  ;;  %v4336_v17 = vmul.f32 %v7366_v40, %v4327_v55 }
0x1436   :  { %6675 = vmatpush1.bf16.msra.mxu1 %v6674_v62  ;;  %4434 = vmatprep.mubr.f32.mxu1 %v7023_v0 }
0x1437   :  { %v4317_v2 = vpop.permute.xlu1 %4316  ;;  %6677 = vmatprep.subr.bf16.mxu1 %v6676_v25  ;;  %v6680_v5 = vpack.c.bf16 %v4337_v20, %v4335_v46  ;;  %v4323_v32 = vpop.permute.xlu0 %4322  ;;  %v6682_v34 = vpack.c.bf16 %v4336_v17, %v4334_v29 }
0x1438   :  { %v4332_v48 = vsel %vm146_vm4, %v4323_v32, %v4315_v8  ;;  %v4328_v30 = vsel %vm146_vm4, %v4315_v8, %v4323_v32 }
0x1439   :  { %6338 = vmatmul.mubr.msk.f32.gmra.mrb[60].mxu1 %vm372_vm6, %v6334_v1  ;;  %v4339_v35 = vmul.f32 %v7341_v26, %v4332_v48  ;;  %v4338_v43 = vmul.f32 %v7366_v40, %v4328_v30 }
0x143a   :  { %6679 = vmatpush1.bf16.msra.mxu1 %v6678_v7  ;;  %4440 = vmatprep.mubr.f32.mxu1 %v7023_v0 }
0x143b   :  { %v4325_v15 = vpop.permute.xlu1 %4324  ;;  %6681 = vmatprep.subr.bf16.mxu1 %v6680_v5 }
0x143c   :  { %v4333_v22 = vsel %vm146_vm4, %v4325_v15, %v4317_v2  ;;  %v4329_v44 = vsel %vm146_vm4, %v4317_v2, %v4325_v15 }
0x143d   :  { %6339 = vmatmul.mubr.msk.f32.gmra.mrb[62].mxu1 %vm372_vm6, %v6335_v6  ;;  %v4341_v24 = vmul.f32 %v7341_v26, %v4333_v22  ;;  %v4340_v39 = vmul.f32 %v7366_v40, %v4329_v44  ;;  %v6331_v26 = vld [vmem:[%s9360_s15 + $0x70] sm:$0xff]  ;;  %v6332_v40 = vld [vmem:[%s9360_s15 + $0x78] sm:$0xff] }
0x143e   :  { %4446 = vmatprep.mubr.f32.mxu1 %v7023_v0 }
0x143f   :  { %v6684_v23 = vpack.c.bf16 %v4341_v24, %v4339_v35  ;;  %v6686_v42 = vpack.c.bf16 %v4340_v39, %v4338_v43  ;;  %v6358_v39 = vld [vmem:[%s9363_s18 + $0x68] sm:$0xff]  ;;  %v6360_v43 = vld [vmem:[%s9363_s18 + $0x78] sm:$0xff] }
0x1441   :  { %6340 = vmatmul.mubr.msk.f32.gmra.mrb[64].mxu1 %vm372_vm6, %v6336_v11 }
0x1442   :  { %4529 = vmatprep.mubr.f32.mxu1 %v7023_v0 }
0x1445   :  { %6341 = vmatmul.mubr.msk.f32.vlgmr.msra.gmra.mrb[58].mxu1 %vm372_vm6, %v6329_v54 }
0x1446   :  { %6683 = vmatpush1.bf16.msra.mxu1 %v6682_v34  ;;  %4535 = vmatprep.mubr.f32.mxu1 %v7023_v0  ;;  %v6357_v34 = vld [vmem:[%s9363_s18 + $0x60] sm:$0xff] }
0x1447   :  { %6685 = vmatprep.subr.bf16.mxu1 %v6684_v23  ;;  %v6359_v23 = vld [vmem:[%s9363_s18 + $0x70] sm:$0xff] }
0x1448   :  { %v4676_v10 = vpop.permute.xlu0 %4675 }
0x1449   :  { %6342 = vmatmul.mubr.msk.f32.gmra.mrb[60].mxu1 %vm372_vm6, %v6330_v41 }
0x144a   :  { %6687 = vmatpush1.bf16.msra.mxu1 %v6686_v42  ;;  %4541 = vmatprep.mubr.f32.mxu1 %v7023_v0 }
0x144c   :  { %v4681_v60 = vpop.permute.xlu1 %4680  ;;  %v4686_v6 = vpop.permute.xlu0 %4685 }
0x144d   :  { %6343 = vmatmul.mubr.msk.f32.gmra.mrb[62].mxu1 %vm372_vm6, %v6331_v26 }
0x144e   :  { %4547 = vmatprep.mubr.f32.mxu1 %v7023_v0 }
0x1450   :  { %v4691_v32 = vpop.permute.xlu1 %4690  ;;  %v4722_v41 = vpop.permute.xlu0 %4721 }
0x1451   :  { %6344 = vmatmul.mubr.msk.f32.gmra.mrb[64].mxu1 %vm372_vm6, %v6332_v40 }
0x1452   :  { %4635 = vmatprep.mubr.f32.mxu1 %v7023_v0 }
0x1455   :  { %6349 = vmatmul.mubr.msk.f32.vlgmr.msra.gmra.mrb[58].mxu1 %vm372_vm6, %v6345_v58 }
0x1456   :  { %4641 = vmatprep.mubr.f32.mxu1 %v7023_v0 }
0x1459   :  { %6350 = vmatmul.mubr.msk.f32.gmra.mrb[60].mxu1 %vm372_vm6, %v6346_v19 }
0x145a   :  { %4647 = vmatprep.mubr.f32.mxu1 %v7023_v0 }
0x145d   :  { %6351 = vmatmul.mubr.msk.f32.gmra.mrb[62].mxu1 %vm372_vm6, %v6347_v49  ;;  %v4727_v49 = vpop.permute.xlu1 %4726 }
0x145e   :  { %4653 = vmatprep.mubr.f32.mxu1 %v7023_v0 }
0x1461   :  { %6352 = vmatmul.mubr.msk.f32.gmra.mrb[64].mxu1 %vm372_vm6, %v6348_v28 }
0x1462   :  { %5393 = vmatprep.mubr.f32.mxu1 %v7023_v0 }
0x1528   :  { %v4637_v57 = vpop.f32.mrb[58].mxu1 }
0x1529   :  { %v4639_v33 = vpop.f32.mrb[59].mxu1  ;;  %v4693_v36 = vadd.f32 %v4676_v10, %v4637_v57 }
0x152a   :  { %v4694_v14 = vadd.f32 %v4676_v10, %v4639_v33 }
0x152b   :  { %v4701_v25 = vmax.f32 %v4693_v36, 0.0 }
0x152c   :  { %v4643_v51 = vpop.f32.mrb[60].mxu1  ;;  %v4702_v46 = vmax.f32 %v4694_v14, 0.0 }
0x152d   :  { %v4695_v52 = vadd.f32 %v4681_v60, %v4643_v51  ;;  %v4645_v62 = vpop.f32.mrb[61].mxu1  ;;  %v4732_v51 = vpop.permute.xlu0 %4731 }
0x152e   :  { %v4696_v20 = vadd.f32 %v4681_v60, %v4645_v62 }
0x152f   :  { %v4703_v1 = vmax.f32 %v4695_v52, 0.0 }
0x1530   :  { %v4704_v8 = vmax.f32 %v4696_v20, 0.0  ;;  %v4649_v2 = vpop.f32.mrb[62].mxu1 }
0x1531   :  { %v6690_v7 = vpack.c.bf16 %v4703_v1, %v4701_v25  ;;  %v4651_v5 = vpop.f32.mrb[63].mxu1  ;;  %v4697_v55 = vadd.f32 %v4686_v6, %v4649_v2 }
0x1532   :  { %v6688_v15 = vpack.c.bf16 %v4704_v8, %v4702_v46  ;;  %v4698_v22 = vadd.f32 %v4686_v6, %v4651_v5 }
0x1533   :  { %v4705_v44 = vmax.f32 %v4697_v55, 0.0 }
0x1534   :  { %v4655_v11 = vpop.f32.mrb[64].mxu1  ;;  %6689 = vmatprep.subr.bf16.mxu0 %v6688_v15  ;;  %v4706_v29 = vmax.f32 %v4698_v22, 0.0 }
0x1535   :  { %v4699_v31 = vadd.f32 %v4691_v32, %v4655_v11  ;;  %v4657_v17 = vpop.f32.mrb[65].mxu1  ;;  %6691 = vmatpush1.bf16.msra.mxu0 %v6690_v7  ;;  %v6395_v11 = vld [vmem:[%s9362_s17 + $0x90] sm:$0xff] }
0x1536   :  { %v4700_v48 = vadd.f32 %v4691_v32, %v4657_v17  ;;  %v6401_v17 = vld [vmem:[%s9364_s19 + $0x80] sm:$0xff] }
0x1537   :  { %v4707_v24 = vmax.f32 %v4699_v31, 0.0  ;;  %v6396_v31 = vld [vmem:[%s9362_s17 + $0x98] sm:$0xff] }
0x1538   :  { %v4708_v54 = vmax.f32 %v4700_v48, 0.0  ;;  %v6402_v48 = vld [vmem:[%s9364_s19 + $0x88] sm:$0xff] }
0x1539   :  { %v6694_v30 = vpack.c.bf16 %v4707_v24, %v4705_v44  ;;  %v6403_v44 = vld [vmem:[%s9364_s19 + $0x90] sm:$0xff]  ;;  %v6404_v24 = vld [vmem:[%s9364_s19 + $0x98] sm:$0xff] }
0x153a   :  { %v6692_v35 = vpack.c.bf16 %v4708_v54, %v4706_v29 }
0x153c   :  { %6693 = vmatprep.subr.bf16.mxu0 %v6692_v35 }
0x153d   :  { %6695 = vmatpush1.bf16.msra.mxu0 %v6694_v30 }
0x1540   :  { %6365 = vmatmul.mubr.msk.f32.vlgmr.msra.gmra.mrb[70].mxu0 %vm372_vm6, %v6357_v34 }
0x1541   :  { %4821 = vmatprep.mubr.f32.mxu0 %v7023_v0 }
0x1544   :  { %6366 = vmatmul.mubr.msk.f32.gmra.mrb[72].mxu0 %vm372_vm6, %v6358_v39 }
0x1545   :  { %4827 = vmatprep.mubr.f32.mxu0 %v7023_v0 }
0x1548   :  { %6367 = vmatmul.mubr.msk.f32.gmra.mrb[74].mxu0 %vm372_vm6, %v6359_v23 }
0x1549   :  { %4833 = vmatprep.mubr.f32.mxu0 %v7023_v0 }
0x154c   :  { %6368 = vmatmul.mubr.msk.f32.gmra.mrb[76].mxu0 %vm372_vm6, %v6360_v43 }
0x154d   :  { %5006 = vmatprep.mubr.f32.mxu0 %v7023_v0 }
0x1613   :  { %v4817_v42 = vpop.f32.mrb[70].mxu0 }
0x1614   :  { %v4818_v26 = vadd.f32 %v4817_v42, %v4722_v41  ;;  %v4819_v40 = vpop.f32.mrb[71].mxu0 }
0x1615   :  { %v4820_v58 = vadd.f32 %v4819_v40, %v4722_v41 }
0x1616   :  { %v4840_v19 = vadd.f32 %v4818_v26, %v8650_v61 }
0x1617   :  { %v4823_v28 = vpop.f32.mrb[72].mxu0  ;;  %v4841_v33 = vadd.f32 %v4820_v58, %v8654_v27 }
0x1618   :  { %v8860_v57 = vmul.f32 %v4840_v19, %v7432_v13  ;;  %v4824_v10 = vadd.f32 %v4823_v28, %v4727_v49  ;;  %v4825_v36 = vpop.f32.mrb[73].mxu0 }
0x1619   :  { %v4826_v60 = vadd.f32 %v4825_v36, %v4727_v49  ;;  %v8867_v62 = vmul.f32 %v4841_v33, %v7435_v21 }
0x161a   :  { %v4842_v14 = vadd.f32 %v4824_v10, %v8656_v37  ;;  %4856 = vrot.lane.b32.xlu0 %v8860_v57, %s7027_s24  ;;  %v4737_v37 = vpop.permute.xlu1 %4736 }
0x161b   :  { %v4829_v52 = vpop.f32.mrb[74].mxu0  ;;  %v4843_v20 = vadd.f32 %v4826_v60, %v8662_v56 }
0x161c   :  { %v8870_v61 = vmul.f32 %v4842_v14, %v7432_v13  ;;  %v4830_v25 = vadd.f32 %v4829_v52, %v4732_v51  ;;  %v4831_v27 = vpop.f32.mrb[75].mxu0 }
0x161d   :  { %v4832_v1 = vadd.f32 %v4831_v27, %v4732_v51  ;;  %v8879_v2 = vmul.f32 %v4843_v20, %v7435_v21 }
0x161e   :  { %v4844_v46 = vadd.f32 %v4830_v25, %v8664_v47  ;;  %4858 = vrot.lane.b32.xlu1 %v8870_v61, %s7027_s24  ;;  %4864 = vrot.lane.b32.xlu0 %v8867_v62, %s7027_s24 }
0x161f   :  { %v4835_v8 = vpop.f32.mrb[76].mxu0  ;;  %v4845_v56 = vadd.f32 %v4832_v1, %v8670_v63 }
0x1620   :  { %v8882_v7 = vmul.f32 %v4844_v46, %v7432_v13  ;;  %v4836_v5 = vadd.f32 %v4835_v8, %v4737_v37  ;;  %v4837_v6 = vpop.f32.mrb[77].mxu0 }
0x1621   :  { %v4838_v15 = vadd.f32 %v4837_v6, %v4737_v37  ;;  %v8891_v55 = vmul.f32 %v4845_v56, %v7435_v21  ;;  %v6373_v6 = vld [vmem:[%s9359_s14 + $0x80] sm:$0xff] }
0x1622   :  { %v4846_v47 = vadd.f32 %v4836_v5, %v8672_v12  ;;  %4866 = vrot.lane.b32.xlu1 %v8879_v2, %s7027_s24  ;;  %4860 = vrot.lane.b32.xlu0 %v8882_v7, %s7027_s24  ;;  %v6393_v12 = vld [vmem:[%s9362_s17 + $0x80] sm:$0xff]  ;;  %v6704_v5 = vpack.c.bf16 %v8879_v2, %v8867_v62 }
0x1623   :  { %v4847_v22 = vadd.f32 %v4838_v15, %v8678_v59  ;;  %v6394_v59 = vld [vmem:[%s9362_s17 + $0x88] sm:$0xff] }
0x1624   :  { %v8894_v32 = vmul.f32 %v4846_v47, %v7432_v13  ;;  %v6706_v47 = vpack.c.bf16 %v8870_v61, %v8860_v57 }
0x1625   :  { %v8902_v63 = vmul.f32 %v4847_v22, %v7435_v21 }
0x1626   :  { %4862 = vrot.lane.b32.xlu1 %v8894_v32, %s7027_s24  ;;  %4868 = vrot.lane.b32.xlu0 %v8891_v55, %s7027_s24 }
0x162a   :  { %4870 = vrot.lane.b32.xlu1 %v8902_v63, %s7027_s24  ;;  %4888 = vrot.lane.b32.xlu0 %v8860_v57, %s7028_s4 }
0x162e   :  { %4890 = vrot.lane.b32.xlu1 %v8870_v61, %s7028_s4  ;;  %4896 = vrot.lane.b32.xlu0 %v8867_v62, %s7028_s4 }
0x1632   :  { %4898 = vrot.lane.b32.xlu1 %v8879_v2, %s7028_s4  ;;  %4892 = vrot.lane.b32.xlu0 %v8882_v7, %s7028_s4 }
0x1636   :  { %4894 = vrot.lane.b32.xlu1 %v8894_v32, %s7028_s4  ;;  %4900 = vrot.lane.b32.xlu0 %v8891_v55, %s7028_s4 }
0x163a   :  { %4902 = vrot.lane.b32.xlu1 %v8902_v63, %s7028_s4  ;;  %5253 = vperm.xlu0 %6929, %v6393_v12   ;;  %v6708_v12 = vpack.c.bf16 %v8902_v63, %v8891_v55 }
0x163e   :  { %5258 = vperm.xlu1 %6930, %v6394_v59   ;;  %5263 = vperm.xlu0 %6929, %v6395_v11   ;;  %v6374_v59 = vld [vmem:[%s9359_s14 + $0x88] sm:$0xff] }
0x1642   :  { %5268 = vperm.xlu1 %6930, %v6396_v31   ;;  %5299 = vperm.xlu0 %6929, %v6401_v17  }
0x1646   :  { %5304 = vperm.xlu1 %6930, %v6402_v48   ;;  %5309 = vperm.xlu0 %6929, %v6403_v44   ;;  %v6710_v48 = vpack.c.bf16 %v8894_v32, %v8882_v7 }
0x164a   :  { %5314 = vperm.xlu1 %6930, %v6404_v24   ;;  %v6375_v24 = vld [vmem:[%s9359_s14 + $0x90] sm:$0xff] }
0x168c   :  { %v4857_v29 = vpop.permute.xlu0 %4856 }
0x1690   :  { %v4859_v54 = vpop.permute.xlu1 %4858  ;;  %v4865_v30 = vpop.permute.xlu0 %4864 }
0x1691   :  { %v4872_v35 = vsel %vm900_vm7, %v4857_v29, %v4865_v30  ;;  %v4876_v34 = vsel %vm900_vm7, %v4865_v30, %v4857_v29 }
0x1692   :  { %v4880_v42 = vmul.f32 %v7528_v3, %v4876_v34  ;;  %v4881_v26 = vmul.f32 %v7531_v4, %v4872_v35  ;;  %v6376_v34 = vld [vmem:[%s9359_s14 + $0x98] sm:$0xff] }
0x1694   :  { %v4867_v39 = vpop.permute.xlu1 %4866  ;;  %v4861_v23 = vpop.permute.xlu0 %4860 }
0x1695   :  { %v4873_v43 = vsel %vm900_vm7, %v4859_v54, %v4867_v39  ;;  %v4877_v41 = vsel %vm900_vm7, %v4867_v39, %v4859_v54 }
0x1696   :  { %v4882_v40 = vmul.f32 %v7528_v3, %v4877_v41  ;;  %v4883_v58 = vmul.f32 %v7531_v4, %v4873_v43 }
0x1698   :  { %v6698_v19 = vpack.c.bf16 %v4882_v40, %v4880_v42  ;;  %v4863_v49 = vpop.permute.xlu1 %4862  ;;  %v4869_v28 = vpop.permute.xlu0 %4868  ;;  %v6696_v33 = vpack.c.bf16 %v4883_v58, %v4881_v26  ;;  %v6369_v40 = vld [vmem:[%s9360_s15 + $0x80] sm:$0xff] }
0x1699   :  { %v4874_v10 = vsel %vm900_vm7, %v4861_v23, %v4869_v28  ;;  %v4878_v36 = vsel %vm900_vm7, %v4869_v28, %v4861_v23 }
0x169a   :  { %6697 = vmatprep.subr.bf16.mxu0 %v6696_v33  ;;  %v4884_v20 = vmul.f32 %v7528_v3, %v4878_v36  ;;  %v4885_v25 = vmul.f32 %v7531_v4, %v4874_v10  ;;  %v6370_v36 = vld [vmem:[%s9360_s15 + $0x88] sm:$0xff] }
0x169b   :  { %6699 = vmatpush1.bf16.msra.mxu0 %v6698_v19 }
0x169c   :  { %v4871_v60 = vpop.permute.xlu1 %4870  ;;  %v4889_v14 = vpop.permute.xlu0 %4888 }
0x169d   :  { %v4875_v51 = vsel %vm900_vm7, %v4863_v49, %v4871_v60  ;;  %v4879_v52 = vsel %vm900_vm7, %v4871_v60, %v4863_v49 }
0x169e   :  { %v4886_v27 = vmul.f32 %v7528_v3, %v4879_v52  ;;  %v4887_v1 = vmul.f32 %v7531_v4, %v4875_v51  ;;  %v6386_v51 = vld [vmem:[%s9361_s16 + $0x88] sm:$0xff]  ;;  %v6387_v52 = vld [vmem:[%s9361_s16 + $0x90] sm:$0xff] }
0x16a0   :  { %v6702_v46 = vpack.c.bf16 %v4886_v27, %v4884_v20  ;;  %v4891_v37 = vpop.permute.xlu1 %4890  ;;  %v6700_v8 = vpack.c.bf16 %v4887_v1, %v4885_v25  ;;  %v4897_v56 = vpop.permute.xlu0 %4896  ;;  %v6388_v20 = vld [vmem:[%s9361_s16 + $0x98] sm:$0xff] }
0x16a1   :  { %v4908_v3 = vsel %vm152_vm10, %v4897_v56, %v4889_v14  ;;  %v4904_v39 = vsel %vm152_vm10, %v4889_v14, %v4897_v56  ;;  %v6385_v14 = vld [vmem:[%s9361_s16 + $0x80] sm:$0xff] }
0x16a2   :  { %6701 = vmatprep.subr.bf16.mxu0 %v6700_v8  ;;  %v4913_v11 = vmul.f32 %v7565_v53, %v4908_v3  ;;  %v4912_v26 = vmul.f32 %v7601_v9, %v4904_v39 }
0x16a3   :  { %6703 = vmatpush1.bf16.msra.mxu0 %v6702_v46 }
0x16a4   :  { %v4899_v15 = vpop.permute.xlu1 %4898  ;;  %6705 = vmatprep.subr.bf16.mxu0 %v6704_v5  ;;  %v4893_v31 = vpop.permute.xlu0 %4892 }
0x16a5   :  { %v4909_v4 = vsel %vm152_vm10, %v4899_v15, %v4891_v37  ;;  %v4905_v54 = vsel %vm152_vm10, %v4891_v37, %v4899_v15 }
0x16a6   :  { %v4915_v22 = vmul.f32 %v7565_v53, %v4909_v4  ;;  %6377 = vmatmul.mubr.msk.f32.vlgmr.msra.gmra.mrb[78].mxu0 %vm372_vm6, %v6373_v6  ;;  %v4914_v23 = vmul.f32 %v7601_v9, %v4905_v54 }
0x16a7   :  { %6707 = vmatpush1.bf16.msra.mxu0 %v6706_v47  ;;  %5012 = vmatprep.mubr.f32.mxu0 %v7023_v0 }
0x16a8   :  { %v4895_v17 = vpop.permute.xlu1 %4894  ;;  %6709 = vmatprep.subr.bf16.mxu0 %v6708_v12  ;;  %v6712_v44 = vpack.c.bf16 %v4915_v22, %v4913_v11  ;;  %v4901_v30 = vpop.permute.xlu0 %4900  ;;  %v6714_v49 = vpack.c.bf16 %v4914_v23, %v4912_v26  ;;  %v6397_v26 = vld [vmem:[%s9363_s18 + $0x80] sm:$0xff] }
0x16a9   :  { %v4910_v43 = vsel %vm152_vm10, %v4901_v30, %v4893_v31  ;;  %v4906_v58 = vsel %vm152_vm10, %v4893_v31, %v4901_v30 }
0x16aa   :  { %6378 = vmatmul.mubr.msk.f32.gmra.mrb[80].mxu0 %vm372_vm6, %v6374_v59  ;;  %v4917_v19 = vmul.f32 %v7565_v53, %v4910_v43  ;;  %v4916_v10 = vmul.f32 %v7601_v9, %v4906_v58  ;;  %v6399_v58 = vld [vmem:[%s9363_s18 + $0x90] sm:$0xff] }
0x16ab   :  { %6711 = vmatpush1.bf16.msra.mxu0 %v6710_v48  ;;  %5018 = vmatprep.mubr.f32.mxu0 %v7023_v0 }
0x16ac   :  { %v4903_v29 = vpop.permute.xlu1 %4902  ;;  %6713 = vmatprep.subr.bf16.mxu0 %v6712_v44 }
0x16ad   :  { %v4911_v35 = vsel %vm152_vm10, %v4903_v29, %v4895_v17  ;;  %v4907_v41 = vsel %vm152_vm10, %v4895_v17, %v4903_v29 }
0x16ae   :  { %6379 = vmatmul.mubr.msk.f32.gmra.mrb[82].mxu0 %vm372_vm6, %v6375_v24  ;;  %v4919_v42 = vmul.f32 %v7565_v53, %v4911_v35  ;;  %v4918_v28 = vmul.f32 %v7601_v9, %v4907_v41  ;;  %v6371_v53 = vld [vmem:[%s9360_s15 + $0x90] sm:$0xff]  ;;  %v6372_v9 = vld [vmem:[%s9360_s15 + $0x98] sm:$0xff] }
0x16af   :  { %5024 = vmatprep.mubr.f32.mxu0 %v7023_v0 }
0x16b0   :  { %v6716_v33 = vpack.c.bf16 %v4919_v42, %v4917_v19  ;;  %v6718_v60 = vpack.c.bf16 %v4918_v28, %v4916_v10  ;;  %v6400_v19 = vld [vmem:[%s9363_s18 + $0x98] sm:$0xff] }
0x16b2   :  { %6380 = vmatmul.mubr.msk.f32.gmra.mrb[84].mxu0 %vm372_vm6, %v6376_v34 }
0x16b3   :  { %5107 = vmatprep.mubr.f32.mxu0 %v7023_v0 }
0x16b6   :  { %6381 = vmatmul.mubr.msk.f32.vlgmr.msra.gmra.mrb[78].mxu0 %vm372_vm6, %v6369_v40  ;;  %v6398_v40 = vld [vmem:[%s9363_s18 + $0x88] sm:$0xff] }
0x16b7   :  { %6715 = vmatpush1.bf16.msra.mxu0 %v6714_v49  ;;  %5113 = vmatprep.mubr.f32.mxu0 %v7023_v0 }
0x16b8   :  { %6717 = vmatprep.subr.bf16.mxu0 %v6716_v33 }
0x16b9   :  { %v5254_v1 = vpop.permute.xlu0 %5253 }
0x16ba   :  { %6382 = vmatmul.mubr.msk.f32.gmra.mrb[80].mxu0 %vm372_vm6, %v6370_v36 }
0x16bb   :  { %6719 = vmatpush1.bf16.msra.mxu0 %v6718_v60  ;;  %5119 = vmatprep.mubr.f32.mxu0 %v7023_v0 }
0x16bd   :  { %v5259_v37 = vpop.permute.xlu1 %5258  ;;  %v5264_v31 = vpop.permute.xlu0 %5263 }
0x16be   :  { %6383 = vmatmul.mubr.msk.f32.gmra.mrb[82].mxu0 %vm372_vm6, %v6371_v53 }
0x16bf   :  { %5125 = vmatprep.mubr.f32.mxu0 %v7023_v0 }
0x16c1   :  { %v5269_v44 = vpop.permute.xlu1 %5268  ;;  %v5300_v49 = vpop.permute.xlu0 %5299 }
0x16c2   :  { %6384 = vmatmul.mubr.msk.f32.gmra.mrb[84].mxu0 %vm372_vm6, %v6372_v9 }
0x16c3   :  { %5213 = vmatprep.mubr.f32.mxu0 %v7023_v0 }
0x16c5   :  { %v5305_v53 = vpop.permute.xlu1 %5304 }
0x16c6   :  { %6389 = vmatmul.mubr.msk.f32.vlgmr.msra.gmra.mrb[78].mxu0 %vm372_vm6, %v6385_v14 }
0x16c7   :  { %5219 = vmatprep.mubr.f32.mxu0 %v7023_v0 }
0x16ca   :  { %6390 = vmatmul.mubr.msk.f32.gmra.mrb[80].mxu0 %vm372_vm6, %v6386_v51 }
0x16cb   :  { %5225 = vmatprep.mubr.f32.mxu0 %v7023_v0 }
0x16ce   :  { %6391 = vmatmul.mubr.msk.f32.gmra.mrb[82].mxu0 %vm372_vm6, %v6387_v52 }
0x16cf   :  { %5231 = vmatprep.mubr.f32.mxu0 %v7023_v0 }
0x16d2   :  { %6392 = vmatmul.mubr.msk.f32.gmra.mrb[84].mxu0 %vm372_vm6, %v6388_v20 }
0x16d3   :  { %5971 = vmatprep.mubr.f32.mxu0 %v7023_v0 }
0x1799   :  { %v5215_v25 = vpop.f32.mrb[78].mxu0 }
0x179a   :  { %v5217_v27 = vpop.f32.mrb[79].mxu0  ;;  %v5271_v46 = vadd.f32 %v5254_v1, %v5215_v25 }
0x179b   :  { %v5272_v8 = vadd.f32 %v5254_v1, %v5217_v27  ;;  %v5310_v1 = vpop.permute.xlu0 %5309 }
0x179c   :  { %v5279_v3 = vmax.f32 %v5271_v46, 0.0 }
0x179d   :  { %v5221_v56 = vpop.f32.mrb[80].mxu0  ;;  %v5280_v47 = vmax.f32 %v5272_v8, 0.0 }
0x179e   :  { %v5273_v5 = vadd.f32 %v5259_v37, %v5221_v56  ;;  %v5223_v6 = vpop.f32.mrb[81].mxu0 }
0x179f   :  { %v5274_v15 = vadd.f32 %v5259_v37, %v5223_v6 }
0x17a0   :  { %v5281_v4 = vmax.f32 %v5273_v5, 0.0 }
0x17a1   :  { %v5282_v22 = vmax.f32 %v5274_v15, 0.0  ;;  %v5227_v12 = vpop.f32.mrb[82].mxu0 }
0x17a2   :  { %v6722_v59 = vpack.c.bf16 %v5281_v4, %v5279_v3  ;;  %v5229_v11 = vpop.f32.mrb[83].mxu0  ;;  %v5275_v48 = vadd.f32 %v5264_v31, %v5227_v12 }
0x17a3   :  { %v6720_v17 = vpack.c.bf16 %v5282_v22, %v5280_v47  ;;  %v5276_v24 = vadd.f32 %v5264_v31, %v5229_v11 }
0x17a4   :  { %v5283_v34 = vmax.f32 %v5275_v48, 0.0  ;;  %v6436_v48 = vld [vmem:[%s9362_s17 + $0xb8] sm:$0xff] }
0x17a5   :  { %v5233_v29 = vpop.f32.mrb[84].mxu0  ;;  %6721 = vmatprep.subr.bf16.mxu1 %v6720_v17  ;;  %v5284_v23 = vmax.f32 %v5276_v24, 0.0  ;;  %v6435_v17 = vld [vmem:[%s9362_s17 + $0xb0] sm:$0xff]  ;;  %v6442_v24 = vld [vmem:[%s9364_s19 + $0xa8] sm:$0xff] }
0x17a6   :  { %v5277_v54 = vadd.f32 %v5269_v44, %v5233_v29  ;;  %v5235_v30 = vpop.f32.mrb[85].mxu0  ;;  %6723 = vmatpush1.bf16.msra.mxu1 %v6722_v59  ;;  %v6443_v29 = vld [vmem:[%s9364_s19 + $0xb0] sm:$0xff] }
0x17a7   :  { %v5278_v35 = vadd.f32 %v5269_v44, %v5235_v30  ;;  %v6441_v44 = vld [vmem:[%s9364_s19 + $0xa0] sm:$0xff]  ;;  %v6450_v30 = vld [vmem:[%s9366_s21 + $0x8] sm:$0xff] }
0x17a8   :  { %v5285_v39 = vmax.f32 %v5277_v54, 0.0  ;;  %v6444_v54 = vld [vmem:[%s9364_s19 + $0xb8] sm:$0xff] }
0x17a9   :  { %v5286_v43 = vmax.f32 %v5278_v35, 0.0 }
0x17aa   :  { %v6726_v41 = vpack.c.bf16 %v5285_v39, %v5283_v34 }
0x17ab   :  { %v6724_v42 = vpack.c.bf16 %v5286_v43, %v5284_v23 }
0x17ad   :  { %6725 = vmatprep.subr.bf16.mxu1 %v6724_v42 }
0x17ae   :  { %6727 = vmatpush1.bf16.msra.mxu1 %v6726_v41 }
0x17b1   :  { %6405 = vmatmul.mubr.msk.f32.vlgmr.msra.gmra.mrb[66].mxu1 %vm372_vm6, %v6397_v26 }
0x17b2   :  { %5399 = vmatprep.mubr.f32.mxu1 %v7023_v0 }
0x17b5   :  { %6406 = vmatmul.mubr.msk.f32.gmra.mrb[68].mxu1 %vm372_vm6, %v6398_v40 }
0x17b6   :  { %5405 = vmatprep.mubr.f32.mxu1 %v7023_v0 }
0x17b9   :  { %6407 = vmatmul.mubr.msk.f32.gmra.mrb[70].mxu1 %vm372_vm6, %v6399_v58 }
0x17ba   :  { %5411 = vmatprep.mubr.f32.mxu1 %v7023_v0 }
0x17bd   :  { %6408 = vmatmul.mubr.msk.f32.gmra.mrb[72].mxu1 %vm372_vm6, %v6400_v19 }
0x17be   :  { %5584 = vmatprep.mubr.f32.mxu1 %v7023_v0 }
0x1884   :  { %v5395_v28 = vpop.f32.mrb[66].mxu1 }
0x1885   :  { %v5396_v33 = vadd.f32 %v5395_v28, %v5300_v49  ;;  %v5397_v10 = vpop.f32.mrb[67].mxu1 }
0x1886   :  { %v5398_v36 = vadd.f32 %v5397_v10, %v5300_v49 }
0x1887   :  { %v5418_v60 = vadd.f32 %v5396_v33, %v8860_v57 }
0x1888   :  { %v5401_v9 = vpop.f32.mrb[68].mxu1  ;;  %v5419_v51 = vadd.f32 %v5398_v36, %v8867_v62 }
0x1889   :  { %v9084_v14 = vmul.f32 %v5418_v60, %v7432_v13  ;;  %v5402_v52 = vadd.f32 %v5401_v9, %v5305_v53  ;;  %v5403_v20 = vpop.f32.mrb[69].mxu1 }
0x188a   :  { %v5404_v25 = vadd.f32 %v5403_v20, %v5305_v53  ;;  %v9091_v37 = vmul.f32 %v5419_v51, %v7435_v21 }
0x188b   :  { %v5420_v27 = vadd.f32 %v5402_v52, %v8870_v61  ;;  %5434 = vrot.lane.b32.xlu0 %v9084_v14, %s7029_s30  ;;  %v5315_v61 = vpop.permute.xlu1 %5314 }
0x188c   :  { %v5407_v46 = vpop.f32.mrb[70].mxu1  ;;  %v5421_v8 = vadd.f32 %v5404_v25, %v8879_v2 }
0x188d   :  { %v9094_v57 = vmul.f32 %v5420_v27, %v7432_v13  ;;  %v5408_v56 = vadd.f32 %v5407_v46, %v5310_v1  ;;  %v5409_v62 = vpop.f32.mrb[71].mxu1 }
0x188e   :  { %v5410_v5 = vadd.f32 %v5409_v62, %v5310_v1  ;;  %v9103_v3 = vmul.f32 %v5421_v8, %v7435_v21 }
0x188f   :  { %v5422_v6 = vadd.f32 %v5408_v56, %v8882_v7  ;;  %5436 = vrot.lane.b32.xlu1 %v9094_v57, %s7029_s30  ;;  %5442 = vrot.lane.b32.xlu0 %v9091_v37, %s7029_s30 }
0x1890   :  { %v5413_v15 = vpop.f32.mrb[72].mxu1  ;;  %v5423_v2 = vadd.f32 %v5410_v5, %v8891_v55 }
0x1891   :  { %v9106_v4 = vmul.f32 %v5422_v6, %v7432_v13  ;;  %v5414_v47 = vadd.f32 %v5413_v15, %v5315_v61  ;;  %v5415_v22 = vpop.f32.mrb[73].mxu1  ;;  %v6413_v15 = vld [vmem:[%s9359_s14 + $0xa0] sm:$0xff] }
0x1892   :  { %v5416_v12 = vadd.f32 %v5415_v22, %v5315_v61  ;;  %v9115_v59 = vmul.f32 %v5423_v2, %v7435_v21  ;;  %v6736_v61 = vpack.c.bf16 %v9103_v3, %v9091_v37 }
0x1893   :  { %v5424_v7 = vadd.f32 %v5414_v47, %v8894_v32  ;;  %5444 = vrot.lane.b32.xlu1 %v9103_v3, %s7029_s30  ;;  %5438 = vrot.lane.b32.xlu0 %v9106_v4, %s7029_s30  ;;  %v6433_v32 = vld [vmem:[%s9362_s17 + $0xa0] sm:$0xff]  ;;  %v6738_v47 = vpack.c.bf16 %v9094_v57, %v9084_v14 }
0x1894   :  { %v5425_v31 = vadd.f32 %v5416_v12, %v8902_v63  ;;  %v6434_v63 = vld [vmem:[%s9362_s17 + $0xa8] sm:$0xff] }
0x1895   :  { %v9118_v11 = vmul.f32 %v5424_v7, %v7432_v13  ;;  %v6414_v7 = vld [vmem:[%s9359_s14 + $0xa8] sm:$0xff] }
0x1896   :  { %v9126_v55 = vmul.f32 %v5425_v31, %v7435_v21 }
0x1897   :  { %5440 = vrot.lane.b32.xlu1 %v9118_v11, %s7029_s30  ;;  %5446 = vrot.lane.b32.xlu0 %v9115_v59, %s7029_s30 }
0x1898   :  { %v6740_v12 = vpack.c.bf16 %v9126_v55, %v9115_v59 }
0x189b   :  { %5448 = vrot.lane.b32.xlu1 %v9126_v55, %s7029_s30  ;;  %5466 = vrot.lane.b32.xlu0 %v9084_v14, %s9394_s0 }
0x189f   :  { %5468 = vrot.lane.b32.xlu1 %v9094_v57, %s9394_s0  ;;  %5474 = vrot.lane.b32.xlu0 %v9091_v37, %s9394_s0 }
0x18a3   :  { %5476 = vrot.lane.b32.xlu1 %v9103_v3, %s9394_s0  ;;  %5470 = vrot.lane.b32.xlu0 %v9106_v4, %s9394_s0 }
0x18a7   :  { %5472 = vrot.lane.b32.xlu1 %v9118_v11, %s9394_s0  ;;  %5478 = vrot.lane.b32.xlu0 %v9115_v59, %s9394_s0 }
0x18ab   :  { %5480 = vrot.lane.b32.xlu1 %v9126_v55, %s9394_s0  ;;  %5831 = vperm.xlu0 %6929, %v6433_v32  }
0x18af   :  { %5836 = vperm.xlu1 %6930, %v6434_v63   ;;  %5841 = vperm.xlu0 %6929, %v6435_v17   ;;  %v6742_v17 = vpack.c.bf16 %v9118_v11, %v9106_v4 }
0x18b3   :  { %5846 = vperm.xlu1 %6930, %v6436_v48   ;;  %5877 = vperm.xlu0 %6929, %v6441_v44   ;;  %v6415_v44 = vld [vmem:[%s9359_s14 + $0xb0] sm:$0xff] }
0x18b7   :  { %5882 = vperm.xlu1 %6930, %v6442_v24   ;;  %5887 = vperm.xlu0 %6929, %v6443_v29  }
0x18bb   :  { %5892 = vperm.xlu1 %6930, %v6444_v54   ;;  %6018 = vperm.xlu0 %6929, %v6450_v30  }
0x18fd   :  { %v5435_v35 = vpop.permute.xlu0 %5434 }
0x1901   :  { %v5437_v34 = vpop.permute.xlu1 %5436  ;;  %v5443_v39 = vpop.permute.xlu0 %5442 }
0x1902   :  { %v5450_v23 = vsel %vm1480_vm12, %v5435_v35, %v5443_v39  ;;  %v5454_v43 = vsel %vm1480_vm12, %v5443_v39, %v5435_v35  ;;  %v6416_v35 = vld [vmem:[%s9359_s14 + $0xb8] sm:$0xff] }
0x1903   :  { %v5458_v58 = vmul.f32 %v7762_v18, %v5454_v43  ;;  %v5459_v19 = vmul.f32 %v7765_v38, %v5450_v23 }
0x1905   :  { %v5445_v41 = vpop.permute.xlu1 %5444  ;;  %v5439_v42 = vpop.permute.xlu0 %5438 }
0x1906   :  { %v5451_v26 = vsel %vm1480_vm12, %v5437_v34, %v5445_v41  ;;  %v5455_v40 = vsel %vm1480_vm12, %v5445_v41, %v5437_v34 }
0x1907   :  { %v5460_v49 = vmul.f32 %v7762_v18, %v5455_v40  ;;  %v5461_v28 = vmul.f32 %v7765_v38, %v5451_v26  ;;  %v6409_v26 = vld [vmem:[%s9360_s15 + $0xa0] sm:$0xff] }
0x1909   :  { %v6730_v33 = vpack.c.bf16 %v5460_v49, %v5458_v58  ;;  %v5441_v10 = vpop.permute.xlu1 %5440  ;;  %v5447_v36 = vpop.permute.xlu0 %5446  ;;  %v6728_v60 = vpack.c.bf16 %v5461_v28, %v5459_v19 }
0x190a   :  { %v5452_v53 = vsel %vm1480_vm12, %v5439_v42, %v5447_v36  ;;  %v5456_v9 = vsel %vm1480_vm12, %v5447_v36, %v5439_v42  ;;  %v6425_v36 = vld [vmem:[%s9361_s16 + $0xa0] sm:$0xff] }
0x190b   :  { %6729 = vmatprep.subr.bf16.mxu1 %v6728_v60  ;;  %v5462_v27 = vmul.f32 %v7762_v18, %v5456_v9  ;;  %v5463_v1 = vmul.f32 %v7765_v38, %v5452_v53  ;;  %v6426_v60 = vld [vmem:[%s9361_s16 + $0xa8] sm:$0xff]  ;;  %v6427_v53 = vld [vmem:[%s9361_s16 + $0xb0] sm:$0xff]  ;;  %v6428_v9 = vld [vmem:[%s9361_s16 + $0xb8] sm:$0xff] }
0x190c   :  { %6731 = vmatpush1.bf16.msra.mxu1 %v6730_v33 }
0x190d   :  { %v5449_v51 = vpop.permute.xlu1 %5448  ;;  %v5467_v52 = vpop.permute.xlu0 %5466 }
0x190e   :  { %v5453_v20 = vsel %vm1480_vm12, %v5441_v10, %v5449_v51  ;;  %v5457_v25 = vsel %vm1480_vm12, %v5449_v51, %v5441_v10  ;;  %v6410_v10 = vld [vmem:[%s9360_s15 + $0xa8] sm:$0xff] }
0x190f   :  { %v5464_v46 = vmul.f32 %v7762_v18, %v5457_v25  ;;  %v5465_v8 = vmul.f32 %v7765_v38, %v5453_v20 }
0x1911   :  { %v6734_v56 = vpack.c.bf16 %v5464_v46, %v5462_v27  ;;  %v5469_v62 = vpop.permute.xlu1 %5468  ;;  %v6732_v5 = vpack.c.bf16 %v5465_v8, %v5463_v1  ;;  %v5475_v6 = vpop.permute.xlu0 %5474 }
0x1912   :  { %v5486_v18 = vsel %vm158_vm15, %v5475_v6, %v5467_v52  ;;  %v5482_v34 = vsel %vm158_vm15, %v5467_v52, %v5475_v6 }
0x1913   :  { %6733 = vmatprep.subr.bf16.mxu1 %v6732_v5  ;;  %v5491_v31 = vmul.f32 %v7799_v16, %v5486_v18  ;;  %v5490_v42 = vmul.f32 %v7835_v50, %v5482_v34  ;;  %v6437_v34 = vld [vmem:[%s9363_s18 + $0xa0] sm:$0xff] }
0x1914   :  { %6735 = vmatpush1.bf16.msra.mxu1 %v6734_v56 }
0x1915   :  { %v5477_v2 = vpop.permute.xlu1 %5476  ;;  %6737 = vmatprep.subr.bf16.mxu1 %v6736_v61  ;;  %v5471_v32 = vpop.permute.xlu0 %5470 }
0x1916   :  { %v5487_v38 = vsel %vm158_vm15, %v5477_v2, %v5469_v62  ;;  %v5483_v29 = vsel %vm158_vm15, %v5469_v62, %v5477_v2 }
0x1917   :  { %v5493_v22 = vmul.f32 %v7799_v16, %v5487_v38  ;;  %6417 = vmatmul.mubr.msk.f32.vlgmr.msra.gmra.mrb[74].mxu1 %vm372_vm6, %v6413_v15  ;;  %v5492_v39 = vmul.f32 %v7835_v50, %v5483_v29 }
0x1918   :  { %6739 = vmatpush1.bf16.msra.mxu1 %v6738_v47  ;;  %5590 = vmatprep.mubr.f32.mxu1 %v7023_v0 }
0x1919   :  { %v5473_v63 = vpop.permute.xlu1 %5472  ;;  %6741 = vmatprep.subr.bf16.mxu1 %v6740_v12  ;;  %v6744_v48 = vpack.c.bf16 %v5493_v22, %v5491_v31  ;;  %v5479_v54 = vpop.permute.xlu0 %5478  ;;  %v6746_v19 = vpack.c.bf16 %v5492_v39, %v5490_v42  ;;  %v6438_v39 = vld [vmem:[%s9363_s18 + $0xa8] sm:$0xff] }
0x191a   :  { %v5488_v23 = vsel %vm158_vm15, %v5479_v54, %v5471_v32  ;;  %v5484_v40 = vsel %vm158_vm15, %v5471_v32, %v5479_v54 }
0x191b   :  { %6418 = vmatmul.mubr.msk.f32.gmra.mrb[76].mxu1 %vm372_vm6, %v6414_v7  ;;  %v5495_v58 = vmul.f32 %v7799_v16, %v5488_v23  ;;  %v5494_v33 = vmul.f32 %v7835_v50, %v5484_v40  ;;  %v6439_v23 = vld [vmem:[%s9363_s18 + $0xb0] sm:$0xff] }
0x191c   :  { %6743 = vmatpush1.bf16.msra.mxu1 %v6742_v17  ;;  %5596 = vmatprep.mubr.f32.mxu1 %v7023_v0 }
0x191d   :  { %v5481_v24 = vpop.permute.xlu1 %5480  ;;  %6745 = vmatprep.subr.bf16.mxu1 %v6744_v48 }
0x191e   :  { %v5489_v30 = vsel %vm158_vm15, %v5481_v24, %v5473_v63  ;;  %v5485_v43 = vsel %vm158_vm15, %v5473_v63, %v5481_v24 }
0x191f   :  { %6419 = vmatmul.mubr.msk.f32.gmra.mrb[78].mxu1 %vm372_vm6, %v6415_v44  ;;  %v5497_v41 = vmul.f32 %v7799_v16, %v5489_v30  ;;  %v5496_v49 = vmul.f32 %v7835_v50, %v5485_v43  ;;  %v6411_v16 = vld [vmem:[%s9360_s15 + $0xb0] sm:$0xff]  ;;  %v6412_v50 = vld [vmem:[%s9360_s15 + $0xb8] sm:$0xff] }
0x1920   :  { %5602 = vmatprep.mubr.f32.mxu1 %v7023_v0  ;;  %v6440_v43 = vld [vmem:[%s9363_s18 + $0xb8] sm:$0xff] }
0x1921   :  { %v6748_v28 = vpack.c.bf16 %v5497_v41, %v5495_v58  ;;  %v6750_v45 = vpack.c.bf16 %v5496_v49, %v5494_v33 }
0x1923   :  { %6420 = vmatmul.mubr.msk.f32.gmra.mrb[80].mxu1 %vm372_vm6, %v6416_v35 }
0x1924   :  { %5685 = vmatprep.mubr.f32.mxu1 %v7023_v0 }
0x1927   :  { %6421 = vmatmul.mubr.msk.f32.vlgmr.msra.gmra.mrb[74].mxu1 %vm372_vm6, %v6409_v26 }
0x1928   :  { %6747 = vmatpush1.bf16.msra.mxu1 %v6746_v19  ;;  %5691 = vmatprep.mubr.f32.mxu1 %v7023_v0 }
0x1929   :  { %6749 = vmatprep.subr.bf16.mxu1 %v6748_v28 }
0x192a   :  { %v5832_v20 = vpop.permute.xlu0 %5831 }
0x192b   :  { %6422 = vmatmul.mubr.msk.f32.gmra.mrb[76].mxu1 %vm372_vm6, %v6410_v10 }
0x192c   :  { %6751 = vmatpush1.bf16.msra.mxu1 %v6750_v45  ;;  %5697 = vmatprep.mubr.f32.mxu1 %v7023_v0 }
0x192e   :  { %v5837_v27 = vpop.permute.xlu1 %5836  ;;  %v5842_v47 = vpop.permute.xlu0 %5841 }
0x192f   :  { %6423 = vmatmul.mubr.msk.f32.gmra.mrb[78].mxu1 %vm372_vm6, %v6411_v16 }
0x1930   :  { %5703 = vmatprep.mubr.f32.mxu1 %v7023_v0 }
0x1932   :  { %v5847_v7 = vpop.permute.xlu1 %5846  ;;  %v5878_v41 = vpop.permute.xlu0 %5877 }
0x1933   :  { %6424 = vmatmul.mubr.msk.f32.gmra.mrb[80].mxu1 %vm372_vm6, %v6412_v50 }
0x1934   :  { %5791 = vmatprep.mubr.f32.mxu1 %v7023_v0 }
0x1936   :  { %v5883_v19 = vpop.permute.xlu1 %5882 }
0x1937   :  { %6429 = vmatmul.mubr.msk.f32.vlgmr.msra.gmra.mrb[74].mxu1 %vm372_vm6, %v6425_v36  ;;  %v5888_v36 = vpop.permute.xlu0 %5887 }
0x1938   :  { %5797 = vmatprep.mubr.f32.mxu1 %v7023_v0 }
0x193b   :  { %6430 = vmatmul.mubr.msk.f32.gmra.mrb[76].mxu1 %vm372_vm6, %v6426_v60 }
0x193c   :  { %5803 = vmatprep.mubr.f32.mxu1 %v7023_v0 }
0x193f   :  { %6431 = vmatmul.mubr.msk.f32.gmra.mrb[78].mxu1 %vm372_vm6, %v6427_v53 }
0x1940   :  { %5809 = vmatprep.mubr.f32.mxu1 %v7023_v0 }
0x1943   :  { %6432 = vmatmul.mubr.msk.f32.gmra.mrb[80].mxu1 %vm372_vm6, %v6428_v9 }
0x1a0a   :  { %v5793_v51 = vpop.f32.mrb[74].mxu1 }
0x1a0b   :  { %v5795_v52 = vpop.f32.mrb[75].mxu1  ;;  %v5849_v25 = vadd.f32 %v5832_v20, %v5793_v51 }
0x1a0c   :  { %v5850_v1 = vadd.f32 %v5832_v20, %v5795_v52 }
0x1a0d   :  { %v5857_v5 = vmax.f32 %v5849_v25, 0.0 }
0x1a0e   :  { %v5799_v46 = vpop.f32.mrb[76].mxu1  ;;  %v5858_v61 = vmax.f32 %v5850_v1, 0.0 }
0x1a0f   :  { %v5851_v8 = vadd.f32 %v5837_v27, %v5799_v46  ;;  %v5801_v56 = vpop.f32.mrb[77].mxu1 }
0x1a10   :  { %v5852_v62 = vadd.f32 %v5837_v27, %v5801_v56 }
0x1a11   :  { %v5859_v6 = vmax.f32 %v5851_v8, 0.0 }
0x1a12   :  { %v5860_v15 = vmax.f32 %v5852_v62, 0.0  ;;  %v5805_v2 = vpop.f32.mrb[78].mxu1 }
0x1a13   :  { %v6754_v18 = vpack.c.bf16 %v5859_v6, %v5857_v5  ;;  %v5807_v38 = vpop.f32.mrb[79].mxu1  ;;  %v5853_v12 = vadd.f32 %v5842_v47, %v5805_v2 }
0x1a14   :  { %v6752_v22 = vpack.c.bf16 %v5860_v15, %v5858_v61  ;;  %v5854_v31 = vadd.f32 %v5842_v47, %v5807_v38 }
0x1a15   :  { %v5861_v44 = vmax.f32 %v5853_v12, 0.0 }
0x1a16   :  { %v5811_v32 = vpop.f32.mrb[80].mxu1  ;;  %6753 = vmatprep.subr.bf16.mxu0 %v6752_v22  ;;  %v5862_v29 = vmax.f32 %v5854_v31, 0.0 }
0x1a17   :  { %v5855_v63 = vadd.f32 %v5847_v7, %v5811_v32  ;;  %v5813_v17 = vpop.f32.mrb[81].mxu1  ;;  %6755 = vmatpush1.bf16.msra.mxu0 %v6754_v18 }
0x1a18   :  { %v5856_v48 = vadd.f32 %v5847_v7, %v5813_v17 }
0x1a19   :  { %v5863_v24 = vmax.f32 %v5855_v63, 0.0 }
0x1a1a   :  { %v5864_v54 = vmax.f32 %v5856_v48, 0.0 }
0x1a1b   :  { %v6758_v30 = vpack.c.bf16 %v5863_v24, %v5861_v44 }
0x1a1c   :  { %v6756_v35 = vpack.c.bf16 %v5864_v54, %v5862_v29 }
0x1a1e   :  { %6757 = vmatprep.subr.bf16.mxu0 %v6756_v35 }
0x1a1f   :  { %6759 = vmatpush1.bf16.msra.mxu0 %v6758_v30 }
0x1a22   :  { %6445 = vmatmul.mubr.msk.f32.vlgmr.msra.gmra.mrb[86].mxu0 %vm372_vm6, %v6437_v34 }
0x1a23   :  { %5977 = vmatprep.mubr.f32.mxu0 %v7023_v0 }
0x1a26   :  { %6446 = vmatmul.mubr.msk.f32.gmra.mrb[88].mxu0 %vm372_vm6, %v6438_v39 }
0x1a27   :  { %5983 = vmatprep.mubr.f32.mxu0 %v7023_v0 }
0x1a2a   :  { %6447 = vmatmul.mubr.msk.f32.gmra.mrb[90].mxu0 %vm372_vm6, %v6439_v23 }
0x1a2b   :  { %5989 = vmatprep.mubr.f32.mxu0 %v7023_v0 }
0x1a2e   :  { %6448 = vmatmul.mubr.msk.f32.gmra.mrb[92].mxu0 %vm372_vm6, %v6440_v43 }
0x1a2f   :  { %6088 = vmatprep.mubr.f32.mxu0 %v7023_v0 }
0x1af5   :  { %v5973_v42 = vpop.f32.mrb[86].mxu0 }
0x1af6   :  { %v5974_v26 = vadd.f32 %v5973_v42, %v5878_v41  ;;  %v5975_v40 = vpop.f32.mrb[87].mxu0 }
0x1af7   :  { %v5976_v58 = vadd.f32 %v5975_v40, %v5878_v41 }
0x1af8   :  { %v5996_v28 = vadd.f32 %v5974_v26, %v9084_v14 }
0x1af9   :  { %v5979_v49 = vpop.f32.mrb[88].mxu0  ;;  %v5997_v45 = vadd.f32 %v5976_v58, %v9091_v37  ;;  %v5893_v37 = vpop.permute.xlu1 %5892 }
0x1afa   :  { %v5980_v33 = vadd.f32 %v5979_v49, %v5883_v19  ;;  %v5981_v10 = vpop.f32.mrb[89].mxu0  ;;  %v6004_v53 = vmul.f32 %v5996_v28, %v7432_v13 }
0x1afb   :  { %v5982_v16 = vadd.f32 %v5981_v10, %v5883_v19  ;;  %v6005_v20 = vmul.f32 %v5997_v45, %v7435_v21 }
0x1afc   :  { %v5998_v50 = vadd.f32 %v5980_v33, %v9094_v57 }
0x1afd   :  { %v5999_v60 = vadd.f32 %v5982_v16, %v9103_v3  ;;  %v5985_v0 = vpop.f32.mrb[90].mxu0 }
0x1afe   :  { %v6006_v9 = vmul.f32 %v5998_v50, %v7432_v13  ;;  %v5986_v51 = vadd.f32 %v5985_v0, %v5888_v36  ;;  %v5987_v52 = vpop.f32.mrb[91].mxu0 }
0x1aff   :  { %v6007_v14 = vmul.f32 %v5999_v60, %v7435_v21  ;;  %v5988_v25 = vadd.f32 %v5987_v52, %v5888_v36 }
0x1b00   :  { %v6762_v27 = vpack.c.bf16 %v6006_v9, %v6004_v53  ;;  %v6000_v57 = vadd.f32 %v5986_v51, %v9106_v4 }
0x1b01   :  { %v5991_v1 = vpop.f32.mrb[92].mxu0  ;;  %v6760_v46 = vpack.c.bf16 %v6007_v14, %v6005_v20  ;;  %v6001_v56 = vadd.f32 %v5988_v25, %v9115_v59  ;;  %v6449_v59 = vld [vmem:[%s9365_s20 + $0x8] sm:$0xff] }
0x1b02   :  { %v5992_v8 = vadd.f32 %v5991_v1, %v5893_v37  ;;  %v5993_v3 = vpop.f32.mrb[93].mxu0  ;;  %v6008_v61 = vmul.f32 %v6000_v57, %v7432_v13 }
0x1b03   :  { %v5994_v62 = vadd.f32 %v5993_v3, %v5893_v37  ;;  %6761 = vmatprep.subr.bf16.mxu0 %v6760_v46  ;;  %v6009_v2 = vmul.f32 %v6001_v56, %v7435_v21 }
0x1b04   :  { %v6002_v5 = vadd.f32 %v5992_v8, %v9118_v11  ;;  %6763 = vmatpush1.bf16.msra.mxu0 %v6762_v27  ;;  %v6019_v11 = vpop.permute.xlu0 %6018 }
0x1b05   :  { %v6003_v6 = vadd.f32 %v5994_v62, %v9126_v55 }
0x1b06   :  { %v6010_v15 = vmul.f32 %v6002_v5, %v7432_v13 }
0x1b07   :  { %v6011_v18 = vmul.f32 %v6003_v6, %v7435_v21 }
0x1b08   :  { %v6766_v4 = vpack.c.bf16 %v6010_v15, %v6008_v61 }
0x1b09   :  { %v6764_v38 = vpack.c.bf16 %v6011_v18, %v6009_v2 }
0x1b0b   :  { %6765 = vmatprep.subr.bf16.mxu0 %v6764_v38 }
0x1b0c   :  { %6767 = vmatpush1.bf16.msra.mxu0 %v6766_v4 }
0x1b0f   :  { %6451 = vmatmul.mubr.msk.f32.vlgmr.msra.gmra.mrb[94].mxu0 %vm372_vm6, %v6449_v59 }
0x1be2   :  { %v6090_v55 = vpop.f32.mrb[94].mxu0 }
0x1be3   :  { %v6091_v47 = vadd.f32 %v6090_v55, %v6019_v11  ;;  %v6092_v22 = vpop.f32.mrb[95].mxu0 }
0x1be4   :  { %v6093_v12 = vadd.f32 %v6092_v22, %v6019_v11 }
0x1be5   :  { %v6095_v7 = vmul.f32 %v6091_v47, %v7432_v13 }
0x1be6   :  { %v6096_v31 = vmul.f32 %v6093_v12, %v7435_v21 }
0x1be7   :  { %6098 = vst [vmem:[#allocation7 + $0x20] sm:$0xff] %v6095_v7 }
0x1be8   :  { %6100 = vst [vmem:[#allocation7 + $0x28] sm:$0xff] %v6096_v31 }
0x1be9   :  { %7002 = shalt.err (!%p6999_p6)
}
0x1bea   :  { %s9395_s14 = sld [smem:[#allocation18_spill]] }
0x1bf0   :  { %s7003_s30 = scalar_lea.hbm %s9395_s14, 768 }
0x1bf1   :  { %p7004_p7 = scmp.ne.s32.totalorder %s9395_s14, %s7003_s30  ;;  %p7007_p8 = scmp.lt.u32.totalorder %s7003_s30, %s9395_s14 }
0x1bf3   :  { %p7009_p9 = pnand %p7007_p8, %p7004_p7 }
0x1bf5   :  { %7012 = shalt.err (!%p7009_p9)
}
0x1bf6   :  { %s9396_s4 = smov 8   ;;  %s9397_s12 = smov 128  }
0x1bf7   :  { %6112 = dma.vmem_to_hbm [thread:$0]  %s6107_s27, 768, %s9395_s14, [#allocation4], %s9397_s12, %s9397_s12, %s9396_s4  }
0x1bf8   :  { %7017 = dma.done.wait [#allocation4], 768  }
0x1bf9   :  { %7018 = vsyncadd [#allocation4], 4294966528 }
0x1bfa   :  { %6116 = vsyncpa [#allocation3], 1 }
0x1bfb   :  { %6117 = vsyncpa [#allocation6], 1 }
0x1bfc   :  { %6118 = vsyncpa [#allocation4], 1 }

</bundles_post_ra>
